<compile_context>
chip_gen: v7x
topology: tpu7x:2x2x1
jax: 0.10.0
libtpu: 0.0.40
codegen_flags: <defaults>
</compile_context>

<pallas_src>
import numpy as np
import jax
import jax.numpy as jnp
from jax.experimental import pallas as pl
from jax.experimental.pallas import tpu as pltpu

BN_EPS = 1e-5
OUTPUT_DIM = 100

_VMEM = pl.BlockSpec(memory_space=pltpu.MemorySpace.VMEM)


# ---------------------------------------------------------------------------
# Small helpers
# ---------------------------------------------------------------------------
def _vmem_bytes(shape, dtype):
    """Rough padded-VMEM footprint of one operand (lane->128, sublane->8)."""
    shape = (1, 1) + tuple(int(d) for d in shape)
    lead = 1
    for d in shape[:-2]:
        lead *= d
    sub = -(-shape[-2] // 8) * 8
    lane = -(-shape[-1] // 128) * 128
    return lead * sub * lane * np.dtype(dtype).itemsize


def _mosaic_params(operands, extra_bytes=0):
    """Explicit scoped-VMEM budget (default 16/32 MiB limits are too small at
    training batch sizes for these gridless single-block kernels)."""
    live = sum(_vmem_bytes(t.shape, t.dtype) for t in operands) + extra_bytes
    limit = int(min(64 << 20, max(2 * live, 8 << 20)))
    return pltpu.CompilerParams(vmem_limit_bytes=limit)


def im2col_nhwc(x, kh, kw, stride, pad):
    """NHWC im2col with (kh, kw, cin) column order (matches the weight reshape)."""
    n, h, w, c = x.shape
    xp = jnp.pad(x, ((0, 0), (pad, pad), (pad, pad), (0, 0)))
    oh = (h + 2 * pad - kh) // stride + 1
    ow = (w + 2 * pad - kw) // stride + 1
    cols = []
    for i in range(kh):
        for j in range(kw):
            cols.append(xp[:, i:i + stride * oh:stride,
                           j:j + stride * ow:stride, :])
    return jnp.concatenate(cols, axis=-1), oh, ow      # (N, OH, OW, KH*KW*C)


# ---------------------------------------------------------------------------
# Pallas kernels
# ---------------------------------------------------------------------------
def _conv1_bn_relu_pool_kernel(p_ref, w_ref, g_ref, bt_ref, o_ref):
    """conv1 (im2col matmul, bf16 operands / f32 accum) + BatchNorm(batch stats)
    + ReLU + 2x2 maxpool, fully fused.

    p_ref: (4, m, 16) bf16 — one slab per 2x2 pooling-window offset, m = N*7*7.
    """
    w = w_ref[...]
    ys = [jnp.dot(p_ref[i], w, preferred_element_type=jnp.float32)
          for i in range(4)]                                   # 4 x (m, 64) f32
    m = ys[0].shape[0]
    inv_cnt = 1.0 / (4.0 * m)
    # Training-mode BN statistics over all N*14*14 pre-pool pixels (the union
    # of the four slabs); biased variance, two-pass (numerically safe).
    mean = (jnp.sum(ys[0], axis=0, keepdims=True)
            + jnp.sum(ys[1], axis=0, keepdims=True)
            + jnp.sum(ys[2], axis=0, keepdims=True)
            + jnp.sum(ys[3], axis=0, keepdims=True)) * inv_cnt
    mean_b = jnp.broadcast_to(mean, ys[0].shape)               # hoisted (4 uses)
    var = (jnp.sum((ys[0] - mean_b) ** 2, axis=0, keepdims=True)
           + jnp.sum((ys[1] - mean_b) ** 2, axis=0, keepdims=True)
           + jnp.sum((ys[2] - mean_b) ** 2, axis=0, keepdims=True)
           + jnp.sum((ys[3] - mean_b) ** 2, axis=0, keepdims=True)) * inv_cnt
    # Conv bias is omitted on purpose: it cancels exactly in (y - mean).
    scale = jax.lax.rsqrt(var + BN_EPS) * g_ref[...]           # (1, 64)
    shift = bt_ref[...] - mean * scale                         # (1, 64)
    # MaxPool commutes with the monotone affine+ReLU epilogue:
    #   max_i relu(y_i*s + t) = relu((s>=0 ? max_i y_i : min_i y_i)*s + t)
    # so the BN/ReLU math runs once on the pooled tile instead of 4x.
    y_hi = jnp.maximum(jnp.maximum(ys[0], ys[1]), jnp.maximum(ys[2], ys[3]))
    y_lo = jnp.minimum(jnp.minimum(ys[0], ys[1]), jnp.minimum(ys[2], ys[3]))
    pooled = jnp.where(scale >= 0.0, y_hi, y_lo)               # (m, 64)
    o_ref[...] = jnp.maximum(pooled * scale + shift, 0.0).astype(o_ref.dtype)


def _conv2_tail_kernel(p_ref, w2_ref, g_ref, bt_ref, w3_ref, b3_ref,
                       fc1w_ref, fc1b_ref, wh_ref, bh_ref, o_ref):
    """conv2 + BN + ReLU + conv3(valid 3x3 window)+ReLU + fc1+ReLU +
    (fc21|fc22)+Sigmoid, fully fused in one kernel.

    p_ref: (9, N, 1024) bf16 — conv2 im2col patches, one slab per output pixel.
    """
    w2 = w2_ref[...]
    ys = [jnp.dot(p_ref[p], w2, preferred_element_type=jnp.float32)
          for p in range(9)]                                   # 9 x (N, 128) f32
    n = ys[0].shape[0]
    inv_cnt = 1.0 / (9.0 * n)
    mean = sum(jnp.sum(y, axis=0, keepdims=True) for y in ys) * inv_cnt
    mean_b = jnp.broadcast_to(mean, ys[0].shape)               # hoisted (9 uses)
    var = sum(jnp.sum((y - mean_b) ** 2, axis=0, keepdims=True)
              for y in ys) * inv_cnt
    scale = jax.lax.rsqrt(var + BN_EPS) * g_ref[...]           # (1, 128)
    shift = bt_ref[...] - mean * scale
    scale_b = jnp.broadcast_to(scale, ys[0].shape)             # hoisted (9 uses)
    shift_b = jnp.broadcast_to(shift, ys[0].shape)
    # conv3 (k4,s2,p1 on a 3x3 map == dot with its valid 3x3x128 weight window)
    # as accumulated lane reductions on the XLU — no MXU, no reshape, no pad.
    h3 = None
    for p in range(9):
        h2p = jnp.maximum(ys[p] * scale_b + shift_b, 0.0)      # (N, 128)
        part = jnp.sum(h2p * w3_ref[p], axis=-1, keepdims=True)
        h3 = part if h3 is None else h3 + part
    h3 = jnp.maximum(h3 + b3_ref[...], 0.0)                    # (N, 1)
    # fc1: Linear(1 -> 1024): K=1 matmul is MXU waste -> VPU broadcast.
    f1 = jnp.maximum(h3 * fc1w_ref[...] + fc1b_ref[...], 0.0)  # (N, 1024)
    # fc21 | fc22 fused, lane-padded to 256-wide output, Sigmoid epilogue.
    y = jnp.dot(f1.astype(jnp.bfloat16), wh_ref[...],
                preferred_element_type=jnp.float32) + bh_ref[...]
    o_ref[...] = jax.nn.sigmoid(y).astype(o_ref.dtype)


# ---------------------------------------------------------------------------
# pallas_call wrappers (layout-only JAX glue around the kernels)
# ---------------------------------------------------------------------------
def conv1_bn_relu_pool(x_nhwc, w, gamma, beta):
    n = x_nhwc.shape[0]
    # im2col in bf16 so the 16x patch blow-up flows through HBM half-sized.
    patches, oh, ow = im2col_nhwc(x_nhwc.astype(jnp.bfloat16), 4, 4, 2, 1)
    ph, pw = oh // 2, ow // 2                                  # 7, 7
    m = n * ph * pw
    # One stacked (4, m, 16) operand: slab p = pooling-window offset (dh, dw).
    slabs = jnp.stack([patches[:, dh::2, dw::2, :].reshape(m, 16)
                       for dh in (0, 1) for dw in (0, 1)], axis=0)
    wmat = jnp.transpose(w, (2, 3, 1, 0)).reshape(16, 64).astype(jnp.bfloat16)
    operands = (slabs, wmat, gamma.reshape(1, 64), beta.reshape(1, 64))
    out = pl.pallas_call(
        _conv1_bn_relu_pool_kernel,
        out_shape=jax.ShapeDtypeStruct((m, 64), jnp.bfloat16),
        in_specs=[_VMEM] * len(operands),
        out_specs=_VMEM,
        compiler_params=_mosaic_params(
            operands, extra_bytes=_vmem_bytes((m, 64), jnp.bfloat16)
                                  + 4 * m * 64 * 4),           # f32 ys residency
        cost_estimate=pl.CostEstimate(
            flops=2 * 4 * m * 16 * 64,
            transcendentals=64,
            bytes_accessed=2 * (4 * m * 16 + 16 * 64 + m * 64)),
    )(*operands)
    return out.reshape(n, ph, pw, 64)                          # (N, 7, 7, 64) bf16


def conv2_tail(h1_nhwc, params):
    """conv2+BN+ReLU and the whole tail (conv3, fc1, fc21|fc22) in one kernel."""
    n = h1_nhwc.shape[0]
    patches, oh, ow = im2col_nhwc(h1_nhwc, 4, 4, 2, 1)         # (N, 3, 3, 1024) bf16
    npos = oh * ow                                             # 9
    pstack = jnp.transpose(patches.reshape(n, npos, 1024), (1, 0, 2))  # (9, N, 1024)
    w2 = jnp.transpose(params["c2_w"], (2, 3, 1, 0)).reshape(1024, 128)
    w2 = w2.astype(jnp.bfloat16)
    # conv3's valid window: k4/s2/p1 on a 3x3 map touches kernel taps [1:4,1:4].
    w3f = jnp.transpose(params["c3_w"][0, :, 1:4, 1:4], (1, 2, 0)).reshape(npos, 128)
    b3 = params["c3_b"].reshape(1, 1)
    fc1_w = params["fc1_w"].reshape(1, 1024)                   # Linear(1,1024) row
    fc1_b = params["fc1_b"].reshape(1, 1024)
    # fc21/fc22 fused and lane-padded to 256 (unmasked vst output).
    wh = jnp.concatenate([params["fc21_w"].T, params["fc22_w"].T], axis=1)
    wh = jnp.pad(wh, ((0, 0), (0, 256 - 2 * OUTPUT_DIM))).astype(jnp.bfloat16)
    bh = jnp.concatenate([params["fc21_b"], params["fc22_b"]])
    bh = jnp.pad(bh, (0, 256 - 2 * OUTPUT_DIM)).reshape(1, 256)
    operands = (pstack, w2, params["bn2_gamma"].reshape(1, 128),
                params["bn2_beta"].reshape(1, 128), w3f, b3,
                fc1_w, fc1_b, wh, bh)
    out = pl.pallas_call(
        _conv2_tail_kernel,
        out_shape=jax.ShapeDtypeStruct((n, 256), jnp.float32),
        in_specs=[_VMEM] * len(operands),
        out_specs=_VMEM,
        compiler_params=_mosaic_params(
            operands, extra_bytes=_vmem_bytes((n, 256), jnp.float32)
                                  + (9 * n * 128 + n * 1024) * 4),
        cost_estimate=pl.CostEstimate(
            flops=2 * npos * n * 1024 * 128 + 2 * n * 1024 * 256,
            transcendentals=n * 256,
            bytes_accessed=2 * (npos * n * 1024 + 1024 * 128 + 1024 * 256)
                           + 4 * n * 256),
    )(*operands)
    return out                                                 # (N, 256) f32


# ---------------------------------------------------------------------------
# Parameters (mirrors initialize_weights: N(0, 0.02) weights, zero biases,
# BatchNorm affine params at their PyTorch defaults gamma=1 / beta=0).
# Conv biases c1_b / c2_b are kept for parity but are mathematically absorbed
# by the BatchNorm mean subtraction, so the kernels do not read them.
# ---------------------------------------------------------------------------
def init_params(key):
    ks = jax.random.split(key, 6)
    std = 0.02
    return {
        "c1_w": std * jax.random.normal(ks[0], (64, 1, 4, 4), jnp.float32),
        "c1_b": jnp.zeros((64,), jnp.float32),
        "bn1_gamma": jnp.ones((64,), jnp.float32),
        "bn1_beta": jnp.zeros((64,), jnp.float32),
        "c2_w": std * jax.random.normal(ks[1], (128, 64, 4, 4), jnp.float32),
        "c2_b": jnp.zeros((128,), jnp.float32),
        "bn2_gamma": jnp.ones((128,), jnp.float32),
        "bn2_beta": jnp.zeros((128,), jnp.float32),
        "c3_w": std * jax.random.normal(ks[2], (1, 128, 4, 4), jnp.float32),
        "c3_b": jnp.zeros((1,), jnp.float32),
        # PyTorch Linear layout: (out_features, in_features)
        "fc1_w": std * jax.random.normal(ks[3], (1024, 1), jnp.float32),
        "fc1_b": jnp.zeros((1024,), jnp.float32),
        "fc21_w": std * jax.random.normal(ks[4], (100, 1024), jnp.float32),
        "fc21_b": jnp.zeros((100,), jnp.float32),
        "fc22_w": std * jax.random.normal(ks[5], (100, 1024), jnp.float32),
        "fc22_b": jnp.zeros((100,), jnp.float32),
    }


# ---------------------------------------------------------------------------
# Forward pass (matches encoder.forward, training-mode BatchNorm)
# ---------------------------------------------------------------------------
def encoder_forward(params, x):
    # x: (N, 1, 28, 28) float32, NCHW at the PyTorch boundary.
    n = x.shape[0]
    x = jnp.transpose(x, (0, 2, 3, 1))                         # NHWC, once
    # Conv(1->64,k4,s2,p1)+BN+ReLU+MaxPool(2,2)   -> (N, 7, 7, 64) bf16
    h1 = conv1_bn_relu_pool(x, params["c1_w"],
                            params["bn1_gamma"], params["bn1_beta"])
    # Conv(64->128)+BN+ReLU, Conv(128->1)+ReLU, fc1+ReLU, fc21|fc22+Sigmoid
    out = conv2_tail(h1, params)                               # (N, 256) f32
    # PyTorch applies the Linears to the 4-D tensor; output keeps (N,1,1,*).
    mu = out[:, :OUTPUT_DIM].reshape(n, 1, 1, OUTPUT_DIM)
    log_var = out[:, OUTPUT_DIM:2 * OUTPUT_DIM].reshape(n, 1, 1, OUTPUT_DIM)
    return mu, log_var


if __name__ == "__main__":
    key = jax.random.PRNGKey(0)
    pkey, xkey = jax.random.split(key)
    params = init_params(pkey)
    x = jax.random.normal(xkey, (2, 1, 28, 28), jnp.float32)

    mu, log_var = jax.jit(encoder_forward)(params, x)
    jax.block_until_ready((mu, log_var))
    assert mu.shape == (2, 1, 1, 100) and log_var.shape == (2, 1, 1, 100)
    assert mu.dtype == jnp.float32 and log_var.dtype == jnp.float32
    assert bool(jnp.all(jnp.isfinite(mu))) and bool(jnp.all(jnp.isfinite(log_var)))
    print("KERNEL_OK")
</pallas_src>

<mosaic_0001>
module attributes {stable_mosaic.version = 11 : i64} {
  func.func @_conv1_bn_relu_pool_kernel(%arg0: memref<4x98x16xbf16, #tpu.memory_space<vmem>>, %arg1: memref<16x64xbf16, #tpu.memory_space<vmem>>, %arg2: memref<1x64xf32, #tpu.memory_space<vmem>>, %arg3: memref<1x64xf32, #tpu.memory_space<vmem>>, %arg4: memref<98x64xbf16, #tpu.memory_space<vmem>>) attributes {dimension_semantics = [], scalar_prefetch = 0 : i64, scratch_operands = 0 : i64, tpu.core_type = #tpu.core_type<tc>} {
    %c0 = arith.constant 0 : index
    %c0_0 = arith.constant 0 : index
    %0 = vector.load %arg1[%c0, %c0_0] : memref<16x64xbf16, #tpu.memory_space<vmem>>, vector<16x64xbf16>
    %c0_1 = arith.constant 0 : index
    %c0_2 = arith.constant 0 : index
    %c0_3 = arith.constant 0 : index
    %1 = vector.load %arg0[%c0_1, %c0_2, %c0_3] : memref<4x98x16xbf16, #tpu.memory_space<vmem>>, vector<1x98x16xbf16>
    %2 = vector.shape_cast %1 : vector<1x98x16xbf16> to vector<98x16xbf16>
    %cst = arith.constant dense<0.000000e+00> : vector<98x64xf32>
    %3 = tpu.matmul %2, %0, %cst {dimension_numbers = #tpu.dot_dimension_numbers<[1], [0], [0], [1], [0, 0, 1, 1], [], []>} : vector<98x16xbf16>, vector<16x64xbf16>, vector<98x64xf32> -> vector<98x64xf32>
    %c1 = arith.constant 1 : index
    %c0_4 = arith.constant 0 : index
    %c0_5 = arith.constant 0 : index
    %4 = vector.load %arg0[%c1, %c0_4, %c0_5] : memref<4x98x16xbf16, #tpu.memory_space<vmem>>, vector<1x98x16xbf16>
    %5 = vector.shape_cast %4 : vector<1x98x16xbf16> to vector<98x16xbf16>
    %cst_6 = arith.constant dense<0.000000e+00> : vector<98x64xf32>
    %6 = tpu.matmul %5, %0, %cst_6 {dimension_numbers = #tpu.dot_dimension_numbers<[1], [0], [0], [1], [0, 0, 1, 1], [], []>} : vector<98x16xbf16>, vector<16x64xbf16>, vector<98x64xf32> -> vector<98x64xf32>
    %c2 = arith.constant 2 : index
    %c0_7 = arith.constant 0 : index
    %c0_8 = arith.constant 0 : index
    %7 = vector.load %arg0[%c2, %c0_7, %c0_8] : memref<4x98x16xbf16, #tpu.memory_space<vmem>>, vector<1x98x16xbf16>
    %8 = vector.shape_cast %7 : vector<1x98x16xbf16> to vector<98x16xbf16>
    %cst_9 = arith.constant dense<0.000000e+00> : vector<98x64xf32>
    %9 = tpu.matmul %8, %0, %cst_9 {dimension_numbers = #tpu.dot_dimension_numbers<[1], [0], [0], [1], [0, 0, 1, 1], [], []>} : vector<98x16xbf16>, vector<16x64xbf16>, vector<98x64xf32> -> vector<98x64xf32>
    %c3 = arith.constant 3 : index
    %c0_10 = arith.constant 0 : index
    %c0_11 = arith.constant 0 : index
    %10 = vector.load %arg0[%c3, %c0_10, %c0_11] : memref<4x98x16xbf16, #tpu.memory_space<vmem>>, vector<1x98x16xbf16>
    %11 = vector.shape_cast %10 : vector<1x98x16xbf16> to vector<98x16xbf16>
    %cst_12 = arith.constant dense<0.000000e+00> : vector<98x64xf32>
    %12 = tpu.matmul %11, %0, %cst_12 {dimension_numbers = #tpu.dot_dimension_numbers<[1], [0], [0], [1], [0, 0, 1, 1], [], []>} : vector<98x16xbf16>, vector<16x64xbf16>, vector<98x64xf32> -> vector<98x64xf32>
    %cst_13 = arith.constant dense<0.000000e+00> : vector<64xf32>
    %13 = vector.multi_reduction <add>, %3, %cst_13 [0] : vector<98x64xf32> to vector<64xf32>
    %14 = vector.shape_cast %13 : vector<64xf32> to vector<1x64xf32>
    %cst_14 = arith.constant dense<0.000000e+00> : vector<64xf32>
    %15 = vector.multi_reduction <add>, %6, %cst_14 [0] : vector<98x64xf32> to vector<64xf32>
    %16 = vector.shape_cast %15 : vector<64xf32> to vector<1x64xf32>
    %17 = arith.addf %14, %16 : vector<1x64xf32>
    %cst_15 = arith.constant dense<0.000000e+00> : vector<64xf32>
    %18 = vector.multi_reduction <add>, %9, %cst_15 [0] : vector<98x64xf32> to vector<64xf32>
    %19 = vector.shape_cast %18 : vector<64xf32> to vector<1x64xf32>
    %20 = arith.addf %17, %19 : vector<1x64xf32>
    %cst_16 = arith.constant dense<0.000000e+00> : vector<64xf32>
    %21 = vector.multi_reduction <add>, %12, %cst_16 [0] : vector<98x64xf32> to vector<64xf32>
    %22 = vector.shape_cast %21 : vector<64xf32> to vector<1x64xf32>
    %23 = arith.addf %20, %22 : vector<1x64xf32>
    %cst_17 = arith.constant 0.00255102036 : f32
    %24 = vector.broadcast %cst_17 : f32 to vector<1x64xf32>
    %25 = arith.mulf %23, %24 : vector<1x64xf32>
    %26 = vector.shape_cast %25 : vector<1x64xf32> to vector<1x64xf32>
    %27 = vector.broadcast %26 : vector<1x64xf32> to vector<98x64xf32>
    %28 = arith.subf %3, %27 : vector<98x64xf32>
    %29 = arith.mulf %28, %28 : vector<98x64xf32>
    %cst_18 = arith.constant dense<0.000000e+00> : vector<64xf32>
    %30 = vector.multi_reduction <add>, %29, %cst_18 [0] : vector<98x64xf32> to vector<64xf32>
    %31 = vector.shape_cast %30 : vector<64xf32> to vector<1x64xf32>
    %32 = arith.subf %6, %27 : vector<98x64xf32>
    %33 = arith.mulf %32, %32 : vector<98x64xf32>
    %cst_19 = arith.constant dense<0.000000e+00> : vector<64xf32>
    %34 = vector.multi_reduction <add>, %33, %cst_19 [0] : vector<98x64xf32> to vector<64xf32>
    %35 = vector.shape_cast %34 : vector<64xf32> to vector<1x64xf32>
    %36 = arith.addf %31, %35 : vector<1x64xf32>
    %37 = arith.subf %9, %27 : vector<98x64xf32>
    %38 = arith.mulf %37, %37 : vector<98x64xf32>
    %cst_20 = arith.constant dense<0.000000e+00> : vector<64xf32>
    %39 = vector.multi_reduction <add>, %38, %cst_20 [0] : vector<98x64xf32> to vector<64xf32>
    %40 = vector.shape_cast %39 : vector<64xf32> to vector<1x64xf32>
    %41 = arith.addf %36, %40 : vector<1x64xf32>
    %42 = arith.subf %12, %27 : vector<98x64xf32>
    %43 = arith.mulf %42, %42 : vector<98x64xf32>
    %cst_21 = arith.constant dense<0.000000e+00> : vector<64xf32>
    %44 = vector.multi_reduction <add>, %43, %cst_21 [0] : vector<98x64xf32> to vector<64xf32>
    %45 = vector.shape_cast %44 : vector<64xf32> to vector<1x64xf32>
    %46 = arith.addf %41, %45 : vector<1x64xf32>
    %cst_22 = arith.constant 0.00255102036 : f32
    %47 = vector.broadcast %cst_22 : f32 to vector<1x64xf32>
    %48 = arith.mulf %46, %47 : vector<1x64xf32>
    %cst_23 = arith.constant 9.99999974E-6 : f32
    %49 = vector.broadcast %cst_23 : f32 to vector<1x64xf32>
    %50 = arith.addf %48, %49 : vector<1x64xf32>
    %51 = math.rsqrt %50 : vector<1x64xf32>
    %c0_24 = arith.constant 0 : index
    %c0_25 = arith.constant 0 : index
    %52 = vector.load %arg2[%c0_24, %c0_25] : memref<1x64xf32, #tpu.memory_space<vmem>>, vector<1x64xf32>
    %53 = arith.mulf %51, %52 : vector<1x64xf32>
    %c0_26 = arith.constant 0 : index
    %c0_27 = arith.constant 0 : index
    %54 = vector.load %arg3[%c0_26, %c0_27] : memref<1x64xf32, #tpu.memory_space<vmem>>, vector<1x64xf32>
    %55 = arith.mulf %25, %53 : vector<1x64xf32>
    %56 = arith.subf %54, %55 : vector<1x64xf32>
    %57 = arith.maximumf %3, %6 : vector<98x64xf32>
    %58 = arith.maximumf %9, %12 : vector<98x64xf32>
    %59 = arith.maximumf %57, %58 : vector<98x64xf32>
    %60 = arith.minimumf %3, %6 : vector<98x64xf32>
    %61 = arith.minimumf %9, %12 : vector<98x64xf32>
    %62 = arith.minimumf %60, %61 : vector<98x64xf32>
    %cst_28 = arith.constant 0.000000e+00 : f32
    %63 = vector.broadcast %cst_28 : f32 to vector<1x64xf32>
    %64 = arith.cmpf oge, %53, %63 : vector<1x64xf32>
    %65 = vector.shape_cast %64 : vector<1x64xi1> to vector<1x64xi1>
    %66 = vector.broadcast %65 : vector<1x64xi1> to vector<98x64xi1>
    %67 = arith.select %66, %59, %62 : vector<98x64xi1>, vector<98x64xf32>
    %68 = vector.broadcast %53 : vector<1x64xf32> to vector<98x64xf32>
    %69 = arith.mulf %67, %68 : vector<98x64xf32>
    %70 = vector.broadcast %56 : vector<1x64xf32> to vector<98x64xf32>
    %71 = arith.addf %69, %70 : vector<98x64xf32>
    %cst_29 = arith.constant 0.000000e+00 : f32
    %72 = vector.broadcast %cst_29 : f32 to vector<98x64xf32>
    %73 = arith.maximumf %71, %72 : vector<98x64xf32>
    %74 = arith.truncf %73 : vector<98x64xf32> to vector<98x64xbf16>
    %c0_30 = arith.constant 0 : index
    %c0_31 = arith.constant 0 : index
    %75 = vector.load %arg4[%c0_30, %c0_31] : memref<98x64xbf16, #tpu.memory_space<vmem>>, vector<98x64xbf16>
    tpu.vector_store %arg4[%c0_30, %c0_31], %74 {strides = array<i32>} : memref<98x64xbf16, #tpu.memory_space<vmem>>, vector<98x64xbf16>,
    return
  }
}

module attributes {stable_mosaic.version = 11 : i64} {
  func.func @_conv2_tail_kernel(%arg0: memref<9x2x1024xbf16, #tpu.memory_space<vmem>>, %arg1: memref<1024x128xbf16, #tpu.memory_space<vmem>>, %arg2: memref<1x128xf32, #tpu.memory_space<vmem>>, %arg3: memref<1x128xf32, #tpu.memory_space<vmem>>, %arg4: memref<9x128xf32, #tpu.memory_space<vmem>>, %arg5: memref<1x1xf32, #tpu.memory_space<vmem>>, %arg6: memref<1x1024xf32, #tpu.memory_space<vmem>>, %arg7: memref<1x1024xf32, #tpu.memory_space<vmem>>, %arg8: memref<1024x256xbf16, #tpu.memory_space<vmem>>, %arg9: memref<1x256xf32, #tpu.memory_space<vmem>>, %arg10: memref<2x256xf32, #tpu.memory_space<vmem>>) attributes {dimension_semantics = [], scalar_prefetch = 0 : i64, scratch_operands = 0 : i64, tpu.core_type = #tpu.core_type<tc>} {
    %c0 = arith.constant 0 : index
    %c0_0 = arith.constant 0 : index
    %0 = vector.load %arg1[%c0, %c0_0] : memref<1024x128xbf16, #tpu.memory_space<vmem>>, vector<1024x128xbf16>
    %c0_1 = arith.constant 0 : index
    %c0_2 = arith.constant 0 : index
    %c0_3 = arith.constant 0 : index
    %1 = vector.load %arg0[%c0_1, %c0_2, %c0_3] : memref<9x2x1024xbf16, #tpu.memory_space<vmem>>, vector<1x2x1024xbf16>
    %2 = vector.shape_cast %1 : vector<1x2x1024xbf16> to vector<2x1024xbf16>
    %cst = arith.constant dense<0.000000e+00> : vector<2x128xf32>
    %3 = tpu.matmul %2, %0, %cst {dimension_numbers = #tpu.dot_dimension_numbers<[1], [0], [0], [1], [0, 0, 1, 1], [], []>} : vector<2x1024xbf16>, vector<1024x128xbf16>, vector<2x128xf32> -> vector<2x128xf32>
    %c1 = arith.constant 1 : index
    %c0_4 = arith.constant 0 : index
    %c0_5 = arith.constant 0 : index
    %4 = vector.load %arg0[%c1, %c0_4, %c0_5] : memref<9x2x1024xbf16, #tpu.memory_space<vmem>>, vector<1x2x1024xbf16>
    %5 = vector.shape_cast %4 : vector<1x2x1024xbf16> to vector<2x1024xbf16>
    %cst_6 = arith.constant dense<0.000000e+00> : vector<2x128xf32>
    %6 = tpu.matmul %5, %0, %cst_6 {dimension_numbers = #tpu.dot_dimension_numbers<[1], [0], [0], [1], [0, 0, 1, 1], [], []>} : vector<2x1024xbf16>, vector<1024x128xbf16>, vector<2x128xf32> -> vector<2x128xf32>
    %c2 = arith.constant 2 : index
    %c0_7 = arith.constant 0 : index
    %c0_8 = arith.constant 0 : index
    %7 = vector.load %arg0[%c2, %c0_7, %c0_8] : memref<9x2x1024xbf16, #tpu.memory_space<vmem>>, vector<1x2x1024xbf16>
    %8 = vector.shape_cast %7 : vector<1x2x1024xbf16> to vector<2x1024xbf16>
    %cst_9 = arith.constant dense<0.000000e+00> : vector<2x128xf32>
    %9 = tpu.matmul %8, %0, %cst_9 {dimension_numbers = #tpu.dot_dimension_numbers<[1], [0], [0], [1], [0, 0, 1, 1], [], []>} : vector<2x1024xbf16>, vector<1024x128xbf16>, vector<2x128xf32> -> vector<2x128xf32>
    %c3 = arith.constant 3 : index
    %c0_10 = arith.constant 0 : index
    %c0_11 = arith.constant 0 : index
    %10 = vector.load %arg0[%c3, %c0_10, %c0_11] : memref<9x2x1024xbf16, #tpu.memory_space<vmem>>, vector<1x2x1024xbf16>
    %11 = vector.shape_cast %10 : vector<1x2x1024xbf16> to vector<2x1024xbf16>
    %cst_12 = arith.constant dense<0.000000e+00> : vector<2x128xf32>
    %12 = tpu.matmul %11, %0, %cst_12 {dimension_numbers = #tpu.dot_dimension_numbers<[1], [0], [0], [1], [0, 0, 1, 1], [], []>} : vector<2x1024xbf16>, vector<1024x128xbf16>, vector<2x128xf32> -> vector<2x128xf32>
    %c4 = arith.constant 4 : index
    %c0_13 = arith.constant 0 : index
    %c0_14 = arith.constant 0 : index
    %13 = vector.load %arg0[%c4, %c0_13, %c0_14] : memref<9x2x1024xbf16, #tpu.memory_space<vmem>>, vector<1x2x1024xbf16>
    %14 = vector.shape_cast %13 : vector<1x2x1024xbf16> to vector<2x1024xbf16>
    %cst_15 = arith.constant dense<0.000000e+00> : vector<2x128xf32>
    %15 = tpu.matmul %14, %0, %cst_15 {dimension_numbers = #tpu.dot_dimension_numbers<[1], [0], [0], [1], [0, 0, 1, 1], [], []>} : vector<2x1024xbf16>, vector<1024x128xbf16>, vector<2x128xf32> -> vector<2x128xf32>
    %c5 = arith.constant 5 : index
    %c0_16 = arith.constant 0 : index
    %c0_17 = arith.constant 0 : index
    %16 = vector.load %arg0[%c5, %c0_16, %c0_17] : memref<9x2x1024xbf16, #tpu.memory_space<vmem>>, vector<1x2x1024xbf16>
    %17 = vector.shape_cast %16 : vector<1x2x1024xbf16> to vector<2x1024xbf16>
    %cst_18 = arith.constant dense<0.000000e+00> : vector<2x128xf32>
    %18 = tpu.matmul %17, %0, %cst_18 {dimension_numbers = #tpu.dot_dimension_numbers<[1], [0], [0], [1], [0, 0, 1, 1], [], []>} : vector<2x1024xbf16>, vector<1024x128xbf16>, vector<2x128xf32> -> vector<2x128xf32>
    %c6 = arith.constant 6 : index
    %c0_19 = arith.constant 0 : index
    %c0_20 = arith.constant 0 : index
    %19 = vector.load %arg0[%c6, %c0_19, %c0_20] : memref<9x2x1024xbf16, #tpu.memory_space<vmem>>, vector<1x2x1024xbf16>
    %20 = vector.shape_cast %19 : vector<1x2x1024xbf16> to vector<2x1024xbf16>
    %cst_21 = arith.constant dense<0.000000e+00> : vector<2x128xf32>
    %21 = tpu.matmul %20, %0, %cst_21 {dimension_numbers = #tpu.dot_dimension_numbers<[1], [0], [0], [1], [0, 0, 1, 1], [], []>} : vector<2x1024xbf16>, vector<1024x128xbf16>, vector<2x128xf32> -> vector<2x128xf32>
    %c7 = arith.constant 7 : index
    %c0_22 = arith.constant 0 : index
    %c0_23 = arith.constant 0 : index
    %22 = vector.load %arg0[%c7, %c0_22, %c0_23] : memref<9x2x1024xbf16, #tpu.memory_space<vmem>>, vector<1x2x1024xbf16>
    %23 = vector.shape_cast %22 : vector<1x2x1024xbf16> to vector<2x1024xbf16>
    %cst_24 = arith.constant dense<0.000000e+00> : vector<2x128xf32>
    %24 = tpu.matmul %23, %0, %cst_24 {dimension_numbers = #tpu.dot_dimension_numbers<[1], [0], [0], [1], [0, 0, 1, 1], [], []>} : vector<2x1024xbf16>, vector<1024x128xbf16>, vector<2x128xf32> -> vector<2x128xf32>
    %c8 = arith.constant 8 : index
    %c0_25 = arith.constant 0 : index
    %c0_26 = arith.constant 0 : index
    %25 = vector.load %arg0[%c8, %c0_25, %c0_26] : memref<9x2x1024xbf16, #tpu.memory_space<vmem>>, vector<1x2x1024xbf16>
    %26 = vector.shape_cast %25 : vector<1x2x1024xbf16> to vector<2x1024xbf16>
    %cst_27 = arith.constant dense<0.000000e+00> : vector<2x128xf32>
    %27 = tpu.matmul %26, %0, %cst_27 {dimension_numbers = #tpu.dot_dimension_numbers<[1], [0], [0], [1], [0, 0, 1, 1], [], []>} : vector<2x1024xbf16>, vector<1024x128xbf16>, vector<2x128xf32> -> vector<2x128xf32>
    %cst_28 = arith.constant dense<0.000000e+00> : vector<128xf32>
    %28 = vector.multi_reduction <add>, %3, %cst_28 [0] : vector<2x128xf32> to vector<128xf32>
    %29 = vector.shape_cast %28 : vector<128xf32> to vector<1x128xf32>
    %cst_29 = arith.constant 0.000000e+00 : f32
    %30 = vector.broadcast %cst_29 : f32 to vector<1x128xf32>
    %31 = arith.addf %30, %29 : vector<1x128xf32>
    %cst_30 = arith.constant dense<0.000000e+00> : vector<128xf32>
    %32 = vector.multi_reduction <add>, %6, %cst_30 [0] : vector<2x128xf32> to vector<128xf32>
    %33 = vector.shape_cast %32 : vector<128xf32> to vector<1x128xf32>
    %34 = arith.addf %31, %33 : vector<1x128xf32>
    %cst_31 = arith.constant dense<0.000000e+00> : vector<128xf32>
    %35 = vector.multi_reduction <add>, %9, %cst_31 [0] : vector<2x128xf32> to vector<128xf32>
    %36 = vector.shape_cast %35 : vector<128xf32> to vector<1x128xf32>
    %37 = arith.addf %34, %36 : vector<1x128xf32>
    %cst_32 = arith.constant dense<0.000000e+00> : vector<128xf32>
    %38 = vector.multi_reduction <add>, %12, %cst_32 [0] : vector<2x128xf32> to vector<128xf32>
    %39 = vector.shape_cast %38 : vector<128xf32> to vector<1x128xf32>
    %40 = arith.addf %37, %39 : vector<1x128xf32>
    %cst_33 = arith.constant dense<0.000000e+00> : vector<128xf32>
    %41 = vector.multi_reduction <add>, %15, %cst_33 [0] : vector<2x128xf32> to vector<128xf32>
    %42 = vector.shape_cast %41 : vector<128xf32> to vector<1x128xf32>
    %43 = arith.addf %40, %42 : vector<1x128xf32>
    %cst_34 = arith.constant dense<0.000000e+00> : vector<128xf32>
    %44 = vector.multi_reduction <add>, %18, %cst_34 [0] : vector<2x128xf32> to vector<128xf32>
    %45 = vector.shape_cast %44 : vector<128xf32> to vector<1x128xf32>
    %46 = arith.addf %43, %45 : vector<1x128xf32>
    %cst_35 = arith.constant dense<0.000000e+00> : vector<128xf32>
    %47 = vector.multi_reduction <add>, %21, %cst_35 [0] : vector<2x128xf32> to vector<128xf32>
    %48 = vector.shape_cast %47 : vector<128xf32> to vector<1x128xf32>
    %49 = arith.addf %46, %48 : vector<1x128xf32>
    %cst_36 = arith.constant dense<0.000000e+00> : vector<128xf32>
    %50 = vector.multi_reduction <add>, %24, %cst_36 [0] : vector<2x128xf32> to vector<128xf32>
    %51 = vector.shape_cast %50 : vector<128xf32> to vector<1x128xf32>
    %52 = arith.addf %49, %51 : vector<1x128xf32>
    %cst_37 = arith.constant dense<0.000000e+00> : vector<128xf32>
    %53 = vector.multi_reduction <add>, %27, %cst_37 [0] : vector<2x128xf32> to vector<128xf32>
    %54 = vector.shape_cast %53 : vector<128xf32> to vector<1x128xf32>
    %55 = arith.addf %52, %54 : vector<1x128xf32>
    %cst_38 = arith.constant 0.055555556 : f32
    %56 = vector.broadcast %cst_38 : f32 to vector<1x128xf32>
    %57 = arith.mulf %55, %56 : vector<1x128xf32>
    %58 = vector.shape_cast %57 : vector<1x128xf32> to vector<1x128xf32>
    %59 = vector.broadcast %58 : vector<1x128xf32> to vector<2x128xf32>
    %60 = arith.subf %3, %59 : vector<2x128xf32>
    %61 = arith.mulf %60, %60 : vector<2x128xf32>
    %cst_39 = arith.constant dense<0.000000e+00> : vector<128xf32>
    %62 = vector.multi_reduction <add>, %61, %cst_39 [0] : vector<2x128xf32> to vector<128xf32>
    %63 = vector.shape_cast %62 : vector<128xf32> to vector<1x128xf32>
    %cst_40 = arith.constant 0.000000e+00 : f32
    %64 = vector.broadcast %cst_40 : f32 to vector<1x128xf32>
    %65 = arith.addf %64, %63 : vector<1x128xf32>
    %66 = arith.subf %6, %59 : vector<2x128xf32>
    %67 = arith.mulf %66, %66 : vector<2x128xf32>
    %cst_41 = arith.constant dense<0.000000e+00> : vector<128xf32>
    %68 = vector.multi_reduction <add>, %67, %cst_41 [0] : vector<2x128xf32> to vector<128xf32>
    %69 = vector.shape_cast %68 : vector<128xf32> to vector<1x128xf32>
    %70 = arith.addf %65, %69 : vector<1x128xf32>
    %71 = arith.subf %9, %59 : vector<2x128xf32>
    %72 = arith.mulf %71, %71 : vector<2x128xf32>
    %cst_42 = arith.constant dense<0.000000e+00> : vector<128xf32>
    %73 = vector.multi_reduction <add>, %72, %cst_42 [0] : vector<2x128xf32> to vector<128xf32>
    %74 = vector.shape_cast %73 : vector<128xf32> to vector<1x128xf32>
    %75 = arith.addf %70, %74 : vector<1x128xf32>
    %76 = arith.subf %12, %59 : vector<2x128xf32>
    %77 = arith.mulf %76, %76 : vector<2x128xf32>
    %cst_43 = arith.constant dense<0.000000e+00> : vector<128xf32>
    %78 = vector.multi_reduction <add>, %77, %cst_43 [0] : vector<2x128xf32> to vector<128xf32>
    %79 = vector.shape_cast %78 : vector<128xf32> to vector<1x128xf32>
    %80 = arith.addf %75, %79 : vector<1x128xf32>
    %81 = arith.subf %15, %59 : vector<2x128xf32>
    %82 = arith.mulf %81, %81 : vector<2x128xf32>
    %cst_44 = arith.constant dense<0.000000e+00> : vector<128xf32>
    %83 = vector.multi_reduction <add>, %82, %cst_44 [0] : vector<2x128xf32> to vector<128xf32>
    %84 = vector.shape_cast %83 : vector<128xf32> to vector<1x128xf32>
    %85 = arith.addf %80, %84 : vector<1x128xf32>
    %86 = arith.subf %18, %59 : vector<2x128xf32>
    %87 = arith.mulf %86, %86 : vector<2x128xf32>
    %cst_45 = arith.constant dense<0.000000e+00> : vector<128xf32>
    %88 = vector.multi_reduction <add>, %87, %cst_45 [0] : vector<2x128xf32> to vector<128xf32>
    %89 = vector.shape_cast %88 : vector<128xf32> to vector<1x128xf32>
    %90 = arith.addf %85, %89 : vector<1x128xf32>
    %91 = arith.subf %21, %59 : vector<2x128xf32>
    %92 = arith.mulf %91, %91 : vector<2x128xf32>
    %cst_46 = arith.constant dense<0.000000e+00> : vector<128xf32>
    %93 = vector.multi_reduction <add>, %92, %cst_46 [0] : vector<2x128xf32> to vector<128xf32>
    %94 = vector.shape_cast %93 : vector<128xf32> to vector<1x128xf32>
    %95 = arith.addf %90, %94 : vector<1x128xf32>
    %96 = arith.subf %24, %59 : vector<2x128xf32>
    %97 = arith.mulf %96, %96 : vector<2x128xf32>
    %cst_47 = arith.constant dense<0.000000e+00> : vector<128xf32>
    %98 = vector.multi_reduction <add>, %97, %cst_47 [0] : vector<2x128xf32> to vector<128xf32>
    %99 = vector.shape_cast %98 : vector<128xf32> to vector<1x128xf32>
    %100 = arith.addf %95, %99 : vector<1x128xf32>
    %101 = arith.subf %27, %59 : vector<2x128xf32>
    %102 = arith.mulf %101, %101 : vector<2x128xf32>
    %cst_48 = arith.constant dense<0.000000e+00> : vector<128xf32>
    %103 = vector.multi_reduction <add>, %102, %cst_48 [0] : vector<2x128xf32> to vector<128xf32>
    %104 = vector.shape_cast %103 : vector<128xf32> to vector<1x128xf32>
    %105 = arith.addf %100, %104 : vector<1x128xf32>
    %cst_49 = arith.constant 0.055555556 : f32
    %106 = vector.broadcast %cst_49 : f32 to vector<1x128xf32>
    %107 = arith.mulf %105, %106 : vector<1x128xf32>
    %cst_50 = arith.constant 9.99999974E-6 : f32
    %108 = vector.broadcast %cst_50 : f32 to vector<1x128xf32>
    %109 = arith.addf %107, %108 : vector<1x128xf32>
    %110 = math.rsqrt %109 : vector<1x128xf32>
    %c0_51 = arith.constant 0 : index
    %c0_52 = arith.constant 0 : index
    %111 = vector.load %arg2[%c0_51, %c0_52] : memref<1x128xf32, #tpu.memory_space<vmem>>, vector<1x128xf32>
    %112 = arith.mulf %110, %111 : vector<1x128xf32>
    %c0_53 = arith.constant 0 : index
    %c0_54 = arith.constant 0 : index
    %113 = vector.load %arg3[%c0_53, %c0_54] : memref<1x128xf32, #tpu.memory_space<vmem>>, vector<1x128xf32>
    %114 = arith.mulf %57, %112 : vector<1x128xf32>
    %115 = arith.subf %113, %114 : vector<1x128xf32>
    %116 = vector.shape_cast %112 : vector<1x128xf32> to vector<1x128xf32>
    %117 = vector.broadcast %116 : vector<1x128xf32> to vector<2x128xf32>
    %118 = vector.shape_cast %115 : vector<1x128xf32> to vector<1x128xf32>
    %119 = vector.broadcast %118 : vector<1x128xf32> to vector<2x128xf32>
    %120 = arith.mulf %3, %117 : vector<2x128xf32>
    %121 = arith.addf %120, %119 : vector<2x128xf32>
    %cst_55 = arith.constant 0.000000e+00 : f32
    %122 = vector.broadcast %cst_55 : f32 to vector<2x128xf32>
    %123 = arith.maximumf %121, %122 : vector<2x128xf32>
    %c0_56 = arith.constant 0 : index
    %c0_57 = arith.constant 0 : index
    %124 = vector.load %arg4[%c0_56, %c0_57] : memref<9x128xf32, #tpu.memory_space<vmem>>, vector<1x128xf32>
    %125 = vector.shape_cast %124 : vector<1x128xf32> to vector<128xf32>
    %126 = vector.shape_cast %125 : vector<128xf32> to vector<1x128xf32>
    %127 = vector.broadcast %126 : vector<1x128xf32> to vector<2x128xf32>
    %128 = arith.mulf %123, %127 : vector<2x128xf32>
    %cst_58 = arith.constant dense<0.000000e+00> : vector<2xf32>
    %129 = vector.multi_reduction <add>, %128, %cst_58 [1] : vector<2x128xf32> to vector<2xf32>
    %130 = vector.shape_cast %129 : vector<2xf32> to vector<2x1xf32>
    %131 = arith.mulf %6, %117 : vector<2x128xf32>
    %132 = arith.addf %131, %119 : vector<2x128xf32>
    %cst_59 = arith.constant 0.000000e+00 : f32
    %133 = vector.broadcast %cst_59 : f32 to vector<2x128xf32>
    %134 = arith.maximumf %132, %133 : vector<2x128xf32>
    %c1_60 = arith.constant 1 : index
    %c0_61 = arith.constant 0 : index
    %135 = vector.load %arg4[%c1_60, %c0_61] : memref<9x128xf32, #tpu.memory_space<vmem>>, vector<1x128xf32>
    %136 = vector.shape_cast %135 : vector<1x128xf32> to vector<128xf32>
    %137 = vector.shape_cast %136 : vector<128xf32> to vector<1x128xf32>
    %138 = vector.broadcast %137 : vector<1x128xf32> to vector<2x128xf32>
    %139 = arith.mulf %134, %138 : vector<2x128xf32>
    %cst_62 = arith.constant dense<0.000000e+00> : vector<2xf32>
    %140 = vector.multi_reduction <add>, %139, %cst_62 [1] : vector<2x128xf32> to vector<2xf32>
    %141 = vector.shape_cast %140 : vector<2xf32> to vector<2x1xf32>
    %142 = arith.addf %130, %141 : vector<2x1xf32>
    %143 = arith.mulf %9, %117 : vector<2x128xf32>
    %144 = arith.addf %143, %119 : vector<2x128xf32>
    %cst_63 = arith.constant 0.000000e+00 : f32
    %145 = vector.broadcast %cst_63 : f32 to vector<2x128xf32>
    %146 = arith.maximumf %144, %145 : vector<2x128xf32>
    %c2_64 = arith.constant 2 : index
    %c0_65 = arith.constant 0 : index
    %147 = vector.load %arg4[%c2_64, %c0_65] : memref<9x128xf32, #tpu.memory_space<vmem>>, vector<1x128xf32>
    %148 = vector.shape_cast %147 : vector<1x128xf32> to vector<128xf32>
    %149 = vector.shape_cast %148 : vector<128xf32> to vector<1x128xf32>
    %150 = vector.broadcast %149 : vector<1x128xf32> to vector<2x128xf32>
    %151 = arith.mulf %146, %150 : vector<2x128xf32>
    %cst_66 = arith.constant dense<0.000000e+00> : vector<2xf32>
    %152 = vector.multi_reduction <add>, %151, %cst_66 [1] : vector<2x128xf32> to vector<2xf32>
    %153 = vector.shape_cast %152 : vector<2xf32> to vector<2x1xf32>
    %154 = arith.addf %142, %153 : vector<2x1xf32>
    %155 = arith.mulf %12, %117 : vector<2x128xf32>
    %156 = arith.addf %155, %119 : vector<2x128xf32>
    %cst_67 = arith.constant 0.000000e+00 : f32
    %157 = vector.broadcast %cst_67 : f32 to vector<2x128xf32>
    %158 = arith.maximumf %156, %157 : vector<2x128xf32>
    %c3_68 = arith.constant 3 : index
    %c0_69 = arith.constant 0 : index
    %159 = vector.load %arg4[%c3_68, %c0_69] : memref<9x128xf32, #tpu.memory_space<vmem>>, vector<1x128xf32>
    %160 = vector.shape_cast %159 : vector<1x128xf32> to vector<128xf32>
    %161 = vector.shape_cast %160 : vector<128xf32> to vector<1x128xf32>
    %162 = vector.broadcast %161 : vector<1x128xf32> to vector<2x128xf32>
    %163 = arith.mulf %158, %162 : vector<2x128xf32>
    %cst_70 = arith.constant dense<0.000000e+00> : vector<2xf32>
    %164 = vector.multi_reduction <add>, %163, %cst_70 [1] : vector<2x128xf32> to vector<2xf32>
    %165 = vector.shape_cast %164 : vector<2xf32> to vector<2x1xf32>
    %166 = arith.addf %154, %165 : vector<2x1xf32>
    %167 = arith.mulf %15, %117 : vector<2x128xf32>
    %168 = arith.addf %167, %119 : vector<2x128xf32>
    %cst_71 = arith.constant 0.000000e+00 : f32
    %169 = vector.broadcast %cst_71 : f32 to vector<2x128xf32>
    %170 = arith.maximumf %168, %169 : vector<2x128xf32>
    %c4_72 = arith.constant 4 : index
    %c0_73 = arith.constant 0 : index
    %171 = vector.load %arg4[%c4_72, %c0_73] : memref<9x128xf32, #tpu.memory_space<vmem>>, vector<1x128xf32>
    %172 = vector.shape_cast %171 : vector<1x128xf32> to vector<128xf32>
    %173 = vector.shape_cast %172 : vector<128xf32> to vector<1x128xf32>
    %174 = vector.broadcast %173 : vector<1x128xf32> to vector<2x128xf32>
    %175 = arith.mulf %170, %174 : vector<2x128xf32>
    %cst_74 = arith.constant dense<0.000000e+00> : vector<2xf32>
    %176 = vector.multi_reduction <add>, %175, %cst_74 [1] : vector<2x128xf32> to vector<2xf32>
    %177 = vector.shape_cast %176 : vector<2xf32> to vector<2x1xf32>
    %178 = arith.addf %166, %177 : vector<2x1xf32>
    %179 = arith.mulf %18, %117 : vector<2x128xf32>
    %180 = arith.addf %179, %119 : vector<2x128xf32>
    %cst_75 = arith.constant 0.000000e+00 : f32
    %181 = vector.broadcast %cst_75 : f32 to vector<2x128xf32>
    %182 = arith.maximumf %180, %181 : vector<2x128xf32>
    %c5_76 = arith.constant 5 : index
    %c0_77 = arith.constant 0 : index
    %183 = vector.load %arg4[%c5_76, %c0_77] : memref<9x128xf32, #tpu.memory_space<vmem>>, vector<1x128xf32>
    %184 = vector.shape_cast %183 : vector<1x128xf32> to vector<128xf32>
    %185 = vector.shape_cast %184 : vector<128xf32> to vector<1x128xf32>
    %186 = vector.broadcast %185 : vector<1x128xf32> to vector<2x128xf32>
    %187 = arith.mulf %182, %186 : vector<2x128xf32>
    %cst_78 = arith.constant dense<0.000000e+00> : vector<2xf32>
    %188 = vector.multi_reduction <add>, %187, %cst_78 [1] : vector<2x128xf32> to vector<2xf32>
    %189 = vector.shape_cast %188 : vector<2xf32> to vector<2x1xf32>
    %190 = arith.addf %178, %189 : vector<2x1xf32>
    %191 = arith.mulf %21, %117 : vector<2x128xf32>
    %192 = arith.addf %191, %119 : vector<2x128xf32>
    %cst_79 = arith.constant 0.000000e+00 : f32
    %193 = vector.broadcast %cst_79 : f32 to vector<2x128xf32>
    %194 = arith.maximumf %192, %193 : vector<2x128xf32>
    %c6_80 = arith.constant 6 : index
    %c0_81 = arith.constant 0 : index
    %195 = vector.load %arg4[%c6_80, %c0_81] : memref<9x128xf32, #tpu.memory_space<vmem>>, vector<1x128xf32>
    %196 = vector.shape_cast %195 : vector<1x128xf32> to vector<128xf32>
    %197 = vector.shape_cast %196 : vector<128xf32> to vector<1x128xf32>
    %198 = vector.broadcast %197 : vector<1x128xf32> to vector<2x128xf32>
    %199 = arith.mulf %194, %198 : vector<2x128xf32>
    %cst_82 = arith.constant dense<0.000000e+00> : vector<2xf32>
    %200 = vector.multi_reduction <add>, %199, %cst_82 [1] : vector<2x128xf32> to vector<2xf32>
    %201 = vector.shape_cast %200 : vector<2xf32> to vector<2x1xf32>
    %202 = arith.addf %190, %201 : vector<2x1xf32>
    %203 = arith.mulf %24, %117 : vector<2x128xf32>
    %204 = arith.addf %203, %119 : vector<2x128xf32>
    %cst_83 = arith.constant 0.000000e+00 : f32
    %205 = vector.broadcast %cst_83 : f32 to vector<2x128xf32>
    %206 = arith.maximumf %204, %205 : vector<2x128xf32>
    %c7_84 = arith.constant 7 : index
    %c0_85 = arith.constant 0 : index
    %207 = vector.load %arg4[%c7_84, %c0_85] : memref<9x128xf32, #tpu.memory_space<vmem>>, vector<1x128xf32>
    %208 = vector.shape_cast %207 : vector<1x128xf32> to vector<128xf32>
    %209 = vector.shape_cast %208 : vector<128xf32> to vector<1x128xf32>
    %210 = vector.broadcast %209 : vector<1x128xf32> to vector<2x128xf32>
    %211 = arith.mulf %206, %210 : vector<2x128xf32>
    %cst_86 = arith.constant dense<0.000000e+00> : vector<2xf32>
    %212 = vector.multi_reduction <add>, %211, %cst_86 [1] : vector<2x128xf32> to vector<2xf32>
    %213 = vector.shape_cast %212 : vector<2xf32> to vector<2x1xf32>
    %214 = arith.addf %202, %213 : vector<2x1xf32>
    %215 = arith.mulf %27, %117 : vector<2x128xf32>
    %216 = arith.addf %215, %119 : vector<2x128xf32>
    %cst_87 = arith.constant 0.000000e+00 : f32
    %217 = vector.broadcast %cst_87 : f32 to vector<2x128xf32>
    %218 = arith.maximumf %216, %217 : vector<2x128xf32>
    %c8_88 = arith.constant 8 : index
    %c0_89 = arith.constant 0 : index
    %219 = vector.load %arg4[%c8_88, %c0_89] : memref<9x128xf32, #tpu.memory_space<vmem>>, vector<1x128xf32>
    %220 = vector.shape_cast %219 : vector<1x128xf32> to vector<128xf32>
    %221 = vector.shape_cast %220 : vector<128xf32> to vector<1x128xf32>
    %222 = vector.broadcast %221 : vector<1x128xf32> to vector<2x128xf32>
    %223 = arith.mulf %218, %222 : vector<2x128xf32>
    %cst_90 = arith.constant dense<0.000000e+00> : vector<2xf32>
    %224 = vector.multi_reduction <add>, %223, %cst_90 [1] : vector<2x128xf32> to vector<2xf32>
    %225 = vector.shape_cast %224 : vector<2xf32> to vector<2x1xf32>
    %226 = arith.addf %214, %225 : vector<2x1xf32>
    %c0_91 = arith.constant 0 : index
    %c0_92 = arith.constant 0 : index
    %227 = vector.load %arg5[%c0_91, %c0_92] : memref<1x1xf32, #tpu.memory_space<vmem>>, vector<1x1xf32>
    %228 = vector.broadcast %227 : vector<1x1xf32> to vector<2x1xf32>
    %229 = arith.addf %226, %228 : vector<2x1xf32>
    %cst_93 = arith.constant 0.000000e+00 : f32
    %230 = vector.broadcast %cst_93 : f32 to vector<2x1xf32>
    %231 = arith.maximumf %229, %230 : vector<2x1xf32>
    %c0_94 = arith.constant 0 : index
    %c0_95 = arith.constant 0 : index
    %232 = vector.load %arg6[%c0_94, %c0_95] : memref<1x1024xf32, #tpu.memory_space<vmem>>, vector<1x1024xf32>
    %233 = vector.broadcast %231 : vector<2x1xf32> to vector<2x1024xf32>
    %234 = vector.broadcast %232 : vector<1x1024xf32> to vector<2x1024xf32>
    %235 = arith.mulf %233, %234 : vector<2x1024xf32>
    %c0_96 = arith.constant 0 : index
    %c0_97 = arith.constant 0 : index
    %236 = vector.load %arg7[%c0_96, %c0_97] : memref<1x1024xf32, #tpu.memory_space<vmem>>, vector<1x1024xf32>
    %237 = vector.broadcast %236 : vector<1x1024xf32> to vector<2x1024xf32>
    %238 = arith.addf %235, %237 : vector<2x1024xf32>
    %cst_98 = arith.constant 0.000000e+00 : f32
    %239 = vector.broadcast %cst_98 : f32 to vector<2x1024xf32>
    %240 = arith.maximumf %238, %239 : vector<2x1024xf32>
    %241 = arith.truncf %240 : vector<2x1024xf32> to vector<2x1024xbf16>
    %c0_99 = arith.constant 0 : index
    %c0_100 = arith.constant 0 : index
    %242 = vector.load %arg8[%c0_99, %c0_100] : memref<1024x256xbf16, #tpu.memory_space<vmem>>, vector<1024x256xbf16>
    %cst_101 = arith.constant dense<0.000000e+00> : vector<2x256xf32>
    %243 = tpu.matmul %241, %242, %cst_101 {dimension_numbers = #tpu.dot_dimension_numbers<[1], [0], [0], [1], [0, 0, 1, 1], [], []>} : vector<2x1024xbf16>, vector<1024x256xbf16>, vector<2x256xf32> -> vector<2x256xf32>
    %c0_102 = arith.constant 0 : index
    %c0_103 = arith.constant 0 : index
    %244 = vector.load %arg9[%c0_102, %c0_103] : memref<1x256xf32, #tpu.memory_space<vmem>>, vector<1x256xf32>
    %245 = vector.broadcast %244 : vector<1x256xf32> to vector<2x256xf32>
    %246 = arith.addf %243, %245 : vector<2x256xf32>
    %247 = arith.negf %246 : vector<2x256xf32>
    %248 = math.exp %247 : vector<2x256xf32>
    %cst_104 = arith.constant 1.000000e+00 : f32
    %249 = vector.broadcast %cst_104 : f32 to vector<2x256xf32>
    %250 = arith.addf %249, %248 : vector<2x256xf32>
    %251 = arith.divf %249, %250 : vector<2x256xf32>
    %c0_105 = arith.constant 0 : index
    %c0_106 = arith.constant 0 : index
    %252 = vector.load %arg10[%c0_105, %c0_106] : memref<2x256xf32, #tpu.memory_space<vmem>>, vector<2x256xf32>
    tpu.vector_store %arg10[%c0_105, %c0_106], %251 {strides = array<i32>} : memref<2x256xf32, #tpu.memory_space<vmem>>, vector<2x256xf32>,
    return
  }
}

</mosaic_0001>

<bundles_post_ra>
// kernel: encoder_forward.2
= control target key start
LH: loop header
LB: loop body
LE: loop exit
PB: predicated region body
PF: predicated region fallthrough
CT: control target
= control target key end

     0   :  { %v1546_v0 = vmov 0.0   ;;  %vm1547_vm0 = vmmov 0   ;;  %vm72_vm1 = vcmask 130048   ;;  %vm650_vm2 = vcmask 523264   ;;  %s2467_s1 = inlined_call_operand.vmem [shape: bf16[16,64], index: 1, kind: input, shape index: {}]   ;;  %s2468_s0 = inlined_call_operand.vmem [shape: bf16[4,98,16], index: 0, kind: input, shape index: {}]   ;;  %s2469_s2 = inlined_call_operand.vmem [shape: f32[1,64], index: 2, kind: input, shape index: {}]   ;;  %s2470_s3 = inlined_call_operand.vmem [shape: f32[1,64], index: 3, kind: input, shape index: {}]   ;;  %s2471_s4 = inlined_call_operand.vmem [shape: bf16[98,64], index: 4, kind: output, shape index: {}]  }
   0x1   :  { %1392 = vmatprep.subr.bf16.mxu0 %v1546_v0  ;;  %1422 = vmatprep.subr.bf16.mxu1 %v1546_v0  ;;  %v1515_v1 = vld [vmem:[%s2467_s1] sm:$0xff]   ;;  %v1517_v3 = vld [vmem:[%s2468_s0 + $0x34] sm:$0xff]   ;;  %v1518_v4 = vld [vmem:[%s2468_s0 + $0x8] sm:$0xff]   ;;  %vm674_vm3 = vcmask 517120   ;;  %vm1219_vm6 = vcmask 519168   ;;  %vm1232_vm7 = vcmask 516096  }
   0x2   :  { %1394 = vmatprep.mubr.msk.bf16.mxu0 %vm1547_vm0, %v1546_v0  ;;  %1424 = vmatprep.mubr.msk.bf16.mxu1 %vm1547_vm0, %v1546_v0  ;;  %v1516_v2 = vld [vmem:[%s2468_s0] sm:$0xff]   ;;  %v1520_v6 = vld [vmem:[%s2468_s0 + $0x10] sm:$0xff]   ;;  %v1522_v8 = vld [vmem:[%s2468_s0 + $0x18] sm:$0xff]  }
   0x3   :  { %1393 = vmatpush3.bf16.msra.mxu0 %v1515_v1  ;;  %1423 = vmatpush3.bf16.msra.mxu1 %v1515_v1  ;;  %v1519_v5 = vld [vmem:[%s2468_s0 + $0x3c] sm:$0xff]   ;;  %v1521_v7 = vld [vmem:[%s2468_s0 + $0x44] sm:$0xff]   ;;  %v1523_v9 = vld [vmem:[%s2468_s0 + $0x4c] sm:$0xff]  }
   0x4   :  { %1452 = vmatprep.subr.bf16.mxu0 %v1546_v0  ;;  %1482 = vmatprep.subr.bf16.mxu1 %v1546_v0  ;;  %v1524_v10 = vld [vmem:[%s2468_s0 + $0x20] sm:$0xff]   ;;  %v1525_v11 = vld [vmem:[%s2468_s0 + $0x54] sm:$0xff]   ;;  %v1526_v12 = vld [vmem:[%s2468_s0 + $0x28] sm:$0xff]  }
   0x5   :  { %v1527_v13 = vld [vmem:[%s2468_s0 + $0x5c] sm:$0xff]   ;;  %v1528_v14 = vld [vmem:[%s2468_s0 + $0x30] ss:$0 sps:$4 sm:$0x11]   ;;  %v1530_v16 = vld [vmem:[%s2468_s0 + $0x68] sm:$0xff]  }
   0x6   :  { %1395 = vmatmul.mubr.msk.bf16.vlgmr.msra.gmra.mrb[0].mxu0 %vm72_vm1, %v1516_v2  ;;  %1425 = vmatmul.mubr.msk.bf16.vlgmr.msra.gmra.mrb[0].mxu1 %vm72_vm1, %v1517_v3  ;;  %v1529_v15 = vld [vmem:[%s2468_s0 + $0x64] ss:$0 sps:$4 sm:$0x11]   ;;  %v1531_v17 = vld [vmem:[%s2468_s0 + $0x9c] sm:$0xff]   ;;  %v1532_v18 = vld [vmem:[%s2468_s0 + $0x70] sm:$0xff]  }
   0x7   :  { %1453 = vmatpush3.bf16.msra.mxu0 %v1515_v1  ;;  %1483 = vmatpush3.bf16.msra.mxu1 %v1515_v1  ;;  %v1533_v19 = vld [vmem:[%s2468_s0 + $0xa4] sm:$0xff]   ;;  %v1534_v20 = vld [vmem:[%s2468_s0 + $0x78] sm:$0xff]   ;;  %v1535_v21 = vld [vmem:[%s2468_s0 + $0xac] sm:$0xff]  }
   0x8   :  { %1398 = vmatprep.mubr.msk.bf16.mxu0 %vm1547_vm0, %v1546_v0  ;;  %1428 = vmatprep.mubr.msk.bf16.mxu1 %vm1547_vm0, %v1546_v0  ;;  %v1536_v22 = vld [vmem:[%s2468_s0 + $0x80] sm:$0xff]   ;;  %v1537_v23 = vld [vmem:[%s2468_s0 + $0xb4] sm:$0xff]   ;;  %v1538_v24 = vld [vmem:[%s2468_s0 + $0x88] sm:$0xff]  }
   0x9   :  { %v1539_v25 = vld [vmem:[%s2468_s0 + $0xbc] sm:$0xff]   ;;  %v1540_v26 = vld [vmem:[%s2468_s0 + $0x90] sm:$0xff]   ;;  %v1541_v27 = vld [vmem:[%s2468_s0 + $0xc4] sm:$0xff]  }
   0xa   :  { %v1542_v28 = vld [vmem:[%s2468_s0 + $0x98] ss:$0 sps:$4 sm:$0x11]   ;;  %v1543_v29 = vld [vmem:[%s2468_s0 + $0xcc] ss:$0 sps:$4 sm:$0x11]  }
   0xe   :  { %1399 = vmatmul.mubr.msk.bf16.gmra.mrb[4].mxu0 %vm72_vm1, %v1518_v4  ;;  %1429 = vmatmul.mubr.msk.bf16.gmra.mrb[4].mxu1 %vm72_vm1, %v1519_v5 }
   0xf   :  { %1402 = vmatprep.mubr.msk.bf16.mxu0 %vm1547_vm0, %v1546_v0  ;;  %1432 = vmatprep.mubr.msk.bf16.mxu1 %vm1547_vm0, %v1546_v0 }
  0x16   :  { %1403 = vmatmul.mubr.msk.bf16.gmra.mrb[8].mxu0 %vm72_vm1, %v1520_v6  ;;  %1433 = vmatmul.mubr.msk.bf16.gmra.mrb[8].mxu1 %vm72_vm1, %v1521_v7 }
  0x17   :  { %1406 = vmatprep.mubr.msk.bf16.mxu0 %vm1547_vm0, %v1546_v0  ;;  %1436 = vmatprep.mubr.msk.bf16.mxu1 %vm1547_vm0, %v1546_v0 }
  0x1e   :  { %1407 = vmatmul.mubr.msk.bf16.gmra.mrb[12].mxu0 %vm72_vm1, %v1522_v8  ;;  %1437 = vmatmul.mubr.msk.bf16.gmra.mrb[12].mxu1 %vm72_vm1, %v1523_v9 }
  0x1f   :  { %1410 = vmatprep.mubr.msk.bf16.mxu0 %vm1547_vm0, %v1546_v0  ;;  %1440 = vmatprep.mubr.msk.bf16.mxu1 %vm1547_vm0, %v1546_v0 }
  0x26   :  { %1411 = vmatmul.mubr.msk.bf16.gmra.mrb[16].mxu0 %vm72_vm1, %v1524_v10  ;;  %1441 = vmatmul.mubr.msk.bf16.gmra.mrb[16].mxu1 %vm72_vm1, %v1525_v11 }
  0x27   :  { %1414 = vmatprep.mubr.msk.bf16.mxu0 %vm1547_vm0, %v1546_v0  ;;  %1444 = vmatprep.mubr.msk.bf16.mxu1 %vm1547_vm0, %v1546_v0 }
  0x2e   :  { %1415 = vmatmul.mubr.msk.bf16.gmra.mrb[20].mxu0 %vm72_vm1, %v1526_v12  ;;  %1445 = vmatmul.mubr.msk.bf16.gmra.mrb[20].mxu1 %vm72_vm1, %v1527_v13 }
  0x2f   :  { %1418 = vmatprep.mubr.msk.bf16.mxu0 %vm1547_vm0, %v1546_v0  ;;  %1448 = vmatprep.mubr.msk.bf16.mxu1 %vm1547_vm0, %v1546_v0 }
  0x36   :  { %1419 = vmatmul.mubr.msk.bf16.gmra.mrb[24].mxu0 %vm72_vm1, %v1528_v14  ;;  %1449 = vmatmul.mubr.msk.bf16.gmra.mrb[24].mxu1 %vm72_vm1, %v1529_v15 }
  0x37   :  { %1454 = vmatprep.mubr.msk.bf16.mxu0 %vm1547_vm0, %v1546_v0  ;;  %1484 = vmatprep.mubr.msk.bf16.mxu1 %vm1547_vm0, %v1546_v0 }
  0x3e   :  { %1455 = vmatmul.mubr.msk.bf16.vlgmr.msra.gmra.mrb[28].mxu0 %vm72_vm1, %v1530_v16  ;;  %1485 = vmatmul.mubr.msk.bf16.vlgmr.msra.gmra.mrb[28].mxu1 %vm72_vm1, %v1531_v17 }
  0x3f   :  { %1458 = vmatprep.mubr.msk.bf16.mxu0 %vm1547_vm0, %v1546_v0  ;;  %1488 = vmatprep.mubr.msk.bf16.mxu1 %vm1547_vm0, %v1546_v0 }
  0x46   :  { %1459 = vmatmul.mubr.msk.bf16.gmra.mrb[32].mxu0 %vm72_vm1, %v1532_v18  ;;  %1489 = vmatmul.mubr.msk.bf16.gmra.mrb[32].mxu1 %vm72_vm1, %v1533_v19 }
  0x47   :  { %1462 = vmatprep.mubr.msk.bf16.mxu0 %vm1547_vm0, %v1546_v0  ;;  %1492 = vmatprep.mubr.msk.bf16.mxu1 %vm1547_vm0, %v1546_v0 }
  0x4e   :  { %1463 = vmatmul.mubr.msk.bf16.gmra.mrb[36].mxu0 %vm72_vm1, %v1534_v20  ;;  %1493 = vmatmul.mubr.msk.bf16.gmra.mrb[36].mxu1 %vm72_vm1, %v1535_v21 }
  0x4f   :  { %1466 = vmatprep.mubr.msk.bf16.mxu0 %vm1547_vm0, %v1546_v0  ;;  %1496 = vmatprep.mubr.msk.bf16.mxu1 %vm1547_vm0, %v1546_v0 }
  0x56   :  { %1467 = vmatmul.mubr.msk.bf16.gmra.mrb[40].mxu0 %vm72_vm1, %v1536_v22  ;;  %1497 = vmatmul.mubr.msk.bf16.gmra.mrb[40].mxu1 %vm72_vm1, %v1537_v23 }
  0x57   :  { %1470 = vmatprep.mubr.msk.bf16.mxu0 %vm1547_vm0, %v1546_v0  ;;  %1500 = vmatprep.mubr.msk.bf16.mxu1 %vm1547_vm0, %v1546_v0 }
  0x5e   :  { %1471 = vmatmul.mubr.msk.bf16.gmra.mrb[44].mxu0 %vm72_vm1, %v1538_v24  ;;  %1501 = vmatmul.mubr.msk.bf16.gmra.mrb[44].mxu1 %vm72_vm1, %v1539_v25 }
  0x5f   :  { %1474 = vmatprep.mubr.msk.bf16.mxu0 %vm1547_vm0, %v1546_v0  ;;  %1504 = vmatprep.mubr.msk.bf16.mxu1 %vm1547_vm0, %v1546_v0 }
  0x66   :  { %1475 = vmatmul.mubr.msk.bf16.gmra.mrb[48].mxu0 %vm72_vm1, %v1540_v26  ;;  %1505 = vmatmul.mubr.msk.bf16.gmra.mrb[48].mxu1 %vm72_vm1, %v1541_v27 }
  0x67   :  { %1478 = vmatprep.mubr.msk.bf16.mxu0 %vm1547_vm0, %v1546_v0  ;;  %1508 = vmatprep.mubr.msk.bf16.mxu1 %vm1547_vm0, %v1546_v0 }
  0x6e   :  { %1479 = vmatmul.mubr.msk.bf16.gmra.mrb[52].mxu0 %vm72_vm1, %v1542_v28  ;;  %1509 = vmatmul.mubr.msk.bf16.gmra.mrb[52].mxu1 %vm72_vm1, %v1543_v29 }
  0xd9   :  { %v1749_v30 = vpop.f32.mrb[0].mxu0  ;;  %v1751_v31 = vpop.f32.mrb[0].mxu1 }
  0xda   :  { %v683_v32 = vsel %vm650_vm2, %v1751_v31, 0.0  ;;  %v1019_v33 = vmax.f32 %v1749_v30, %v1751_v31  ;;  %v1058_v34 = vmin.f32 %v1749_v30, %v1751_v31  ;;  %v1396_v35 = vpop.f32.mrb[1].mxu0  ;;  %v1426_v36 = vpop.f32.mrb[1].mxu1  ;;  %v651_v37 = vsel %vm650_vm2, %v1749_v30, 0.0 }
  0xdb   :  { %v1761_v38 = vpop.f32.mrb[2].mxu0  ;;  %v1763_v39 = vpop.f32.mrb[2].mxu1 }
  0xdc   :  { %v652_v40 = vsel %vm650_vm2, %v1761_v38, 0.0  ;;  %v684_v41 = vsel %vm650_vm2, %v1763_v39, 0.0  ;;  %v1020_v42 = vmax.f32 %v1761_v38, %v1763_v39  ;;  %v1059_v43 = vmin.f32 %v1761_v38, %v1763_v39  ;;  %v1397_v44 = vpop.f32.mrb[3].mxu0  ;;  %v1427_v45 = vpop.f32.mrb[3].mxu1 }
  0xdd   :  { %v653_v46 = vadd.f32 %v652_v40, %v651_v37  ;;  %v685_v47 = vadd.f32 %v684_v41, %v683_v32 }
  0xe1   :  { %v1773_v48 = vpop.f32.mrb[4].mxu0  ;;  %v1775_v49 = vpop.f32.mrb[4].mxu1 }
  0xe2   :  { %v654_v50 = vsel %vm650_vm2, %v1773_v48, 0.0  ;;  %v686_v51 = vsel %vm650_vm2, %v1775_v49, 0.0  ;;  %v1021_v52 = vmax.f32 %v1773_v48, %v1775_v49  ;;  %v1060_v53 = vmin.f32 %v1773_v48, %v1775_v49  ;;  %v1400_v54 = vpop.f32.mrb[5].mxu0  ;;  %v1430_v55 = vpop.f32.mrb[5].mxu1 }
  0xe3   :  { %v655_v56 = vadd.f32 %v654_v50, %v653_v46  ;;  %v687_v57 = vadd.f32 %v686_v51, %v685_v47  ;;  %v1785_v58 = vpop.f32.mrb[6].mxu0  ;;  %v1787_v59 = vpop.f32.mrb[6].mxu1 }
  0xe4   :  { %v656_v60 = vsel %vm650_vm2, %v1785_v58, 0.0  ;;  %v688_v61 = vsel %vm650_vm2, %v1787_v59, 0.0  ;;  %v1022_v62 = vmax.f32 %v1785_v58, %v1787_v59  ;;  %v1061_v63 = vmin.f32 %v1785_v58, %v1787_v59  ;;  %v1401_v0 = vpop.f32.mrb[7].mxu0  ;;  %v1431_v1 = vpop.f32.mrb[7].mxu1 }
  0xe5   :  { %v657_v2 = vadd.f32 %v656_v60, %v655_v56  ;;  %v689_v3 = vadd.f32 %v688_v61, %v687_v57 }
  0xe9   :  { %v1797_v4 = vpop.f32.mrb[8].mxu0  ;;  %v1799_v5 = vpop.f32.mrb[8].mxu1 }
  0xea   :  { %v658_v6 = vsel %vm650_vm2, %v1797_v4, 0.0  ;;  %v690_v7 = vsel %vm650_vm2, %v1799_v5, 0.0  ;;  %v1023_v8 = vmax.f32 %v1797_v4, %v1799_v5  ;;  %v1062_v9 = vmin.f32 %v1797_v4, %v1799_v5  ;;  %v1404_v10 = vpop.f32.mrb[9].mxu0  ;;  %v1434_v11 = vpop.f32.mrb[9].mxu1 }
  0xeb   :  { %v659_v12 = vadd.f32 %v658_v6, %v657_v2  ;;  %v691_v13 = vadd.f32 %v690_v7, %v689_v3  ;;  %v1809_v14 = vpop.f32.mrb[10].mxu0  ;;  %v1811_v15 = vpop.f32.mrb[10].mxu1 }
  0xec   :  { %v660_v16 = vsel %vm650_vm2, %v1809_v14, 0.0  ;;  %v692_v17 = vsel %vm650_vm2, %v1811_v15, 0.0  ;;  %v1024_v18 = vmax.f32 %v1809_v14, %v1811_v15  ;;  %v1063_v19 = vmin.f32 %v1809_v14, %v1811_v15  ;;  %v1405_v20 = vpop.f32.mrb[11].mxu0  ;;  %v1435_v21 = vpop.f32.mrb[11].mxu1 }
  0xed   :  { %v661_v22 = vadd.f32 %v660_v16, %v659_v12  ;;  %v693_v23 = vadd.f32 %v692_v17, %v691_v13 }
  0xf1   :  { %v1821_v24 = vpop.f32.mrb[12].mxu0  ;;  %v1823_v25 = vpop.f32.mrb[12].mxu1 }
  0xf2   :  { %v662_v26 = vsel %vm650_vm2, %v1821_v24, 0.0  ;;  %v694_v27 = vsel %vm650_vm2, %v1823_v25, 0.0  ;;  %v1408_v32 = vpop.f32.mrb[13].mxu0  ;;  %v1438_v35 = vpop.f32.mrb[13].mxu1 }
  0xf3   :  { %v663_v36 = vadd.f32 %v662_v26, %v661_v22  ;;  %v695_v37 = vadd.f32 %v694_v27, %v693_v23  ;;  %v1833_v40 = vpop.f32.mrb[14].mxu0  ;;  %v1835_v41 = vpop.f32.mrb[14].mxu1 }
  0xf4   :  { %v664_v44 = vsel %vm650_vm2, %v1833_v40, 0.0  ;;  %v696_v45 = vsel %vm650_vm2, %v1835_v41, 0.0  ;;  %v1409_v50 = vpop.f32.mrb[15].mxu0  ;;  %v1439_v51 = vpop.f32.mrb[15].mxu1 }
  0xf5   :  { %v665_v54 = vadd.f32 %v664_v44, %v663_v36  ;;  %v697_v55 = vadd.f32 %v696_v45, %v695_v37 }
  0xf9   :  { %v1845_v56 = vpop.f32.mrb[16].mxu0  ;;  %v1847_v57 = vpop.f32.mrb[16].mxu1 }
  0xfa   :  { %v666_v60 = vsel %vm650_vm2, %v1845_v56, 0.0  ;;  %v698_v61 = vsel %vm650_vm2, %v1847_v57, 0.0  ;;  %v1412_v2 = vpop.f32.mrb[17].mxu0  ;;  %v1442_v3 = vpop.f32.mrb[17].mxu1 }
  0xfb   :  { %v667_v6 = vadd.f32 %v666_v60, %v665_v54  ;;  %v699_v7 = vadd.f32 %v698_v61, %v697_v55  ;;  %v1857_v10 = vpop.f32.mrb[18].mxu0  ;;  %v1859_v11 = vpop.f32.mrb[18].mxu1 }
  0xfc   :  { %v668_v12 = vsel %vm650_vm2, %v1857_v10, 0.0  ;;  %v700_v13 = vsel %vm650_vm2, %v1859_v11, 0.0  ;;  %v1413_v20 = vpop.f32.mrb[19].mxu0  ;;  %v1443_v21 = vpop.f32.mrb[19].mxu1 }
  0xfd   :  { %v669_v22 = vadd.f32 %v668_v12, %v667_v6  ;;  %v701_v23 = vadd.f32 %v700_v13, %v699_v7 }
 0x101   :  { %v1869_v26 = vpop.f32.mrb[20].mxu0  ;;  %v1871_v27 = vpop.f32.mrb[20].mxu1 }
 0x102   :  { %v670_v32 = vsel %vm650_vm2, %v1869_v26, 0.0  ;;  %v702_v35 = vsel %vm650_vm2, %v1871_v27, 0.0  ;;  %v1416_v44 = vpop.f32.mrb[21].mxu0  ;;  %v1446_v45 = vpop.f32.mrb[21].mxu1 }
 0x103   :  { %v671_v50 = vadd.f32 %v670_v32, %v669_v22  ;;  %v703_v51 = vadd.f32 %v702_v35, %v701_v23  ;;  %v1881_v54 = vpop.f32.mrb[22].mxu0  ;;  %v1883_v55 = vpop.f32.mrb[22].mxu1 }
 0x104   :  { %v672_v60 = vsel %vm650_vm2, %v1881_v54, 0.0  ;;  %v704_v61 = vsel %vm650_vm2, %v1883_v55, 0.0  ;;  %v1417_v6 = vpop.f32.mrb[23].mxu0  ;;  %v1447_v7 = vpop.f32.mrb[23].mxu1 }
 0x105   :  { %v673_v12 = vadd.f32 %v672_v60, %v671_v50  ;;  %v705_v13 = vadd.f32 %v704_v61, %v703_v51 }
 0x109   :  { %v1893_v20 = vpop.f32.mrb[24].mxu0  ;;  %v1895_v21 = vpop.f32.mrb[24].mxu1 }
 0x10a   :  { %v675_v22 = vsel %vm674_vm3, %v1893_v20, 0.0  ;;  %v706_v23 = vsel %vm674_vm3, %v1895_v21, 0.0  ;;  %v1420_v44 = vpop.f32.mrb[25].mxu0  ;;  %v1450_v45 = vpop.f32.mrb[25].mxu1 }
 0x10b   :  { %v676_v50 = vadd.f32 %v675_v22, %v673_v12  ;;  %v707_v51 = vadd.f32 %v706_v23, %v705_v13  ;;  %v179_v60 = vpop.f32.mrb[26].mxu0  ;;  %v335_v61 = vpop.f32.mrb[26].mxu1 }
 0x10c   :  { %v1421_v6 = vpop.f32.mrb[27].mxu0  ;;  %v1451_v7 = vpop.f32.mrb[27].mxu1 }
 0x10d   :  { %v677_v3 = vrot.slane %v676_v50, 4  ;;  %v708_v2 = vrot.slane %v707_v51, 4 }
 0x10f   :  { %v678_v37 = vadd.f32 %v677_v3, %v676_v50  ;;  %v709_v36 = vadd.f32 %v708_v2, %v707_v51 }
 0x111   :  { %v679_v17 = vrot.slane %v678_v37, 2  ;;  %v710_v16 = vrot.slane %v709_v36, 2  ;;  %v1905_v1 = vpop.f32.mrb[28].mxu0  ;;  %v1907_v32 = vpop.f32.mrb[28].mxu1 }
 0x112   :  { %v747_v44 = vsel %vm650_vm2, %v1907_v32, 0.0  ;;  %v1032_v12 = vmax.f32 %v1905_v1, %v1907_v32  ;;  %v1071_v13 = vmin.f32 %v1905_v1, %v1907_v32  ;;  %v1456_v22 = vpop.f32.mrb[29].mxu0  ;;  %v1486_v23 = vpop.f32.mrb[29].mxu1  ;;  %v715_v2 = vsel %vm650_vm2, %v1905_v1, 0.0 }
 0x113   :  { %v680_v45 = vadd.f32 %v679_v17, %v678_v37  ;;  %v711_v3 = vadd.f32 %v710_v16, %v709_v36  ;;  %v1917_v50 = vpop.f32.mrb[30].mxu0  ;;  %v1919_v51 = vpop.f32.mrb[30].mxu1 }
 0x114   :  { %v1924_v60 = vmax.f32 %v1019_v33, %v1032_v12  ;;  %v1929_v61 = vmin.f32 %v1058_v34, %v1071_v13  ;;  %v716_v16 = vsel %vm650_vm2, %v1917_v50, 0.0  ;;  %v748_v17 = vsel %vm650_vm2, %v1919_v51, 0.0  ;;  %v1457_v36 = vpop.f32.mrb[31].mxu0  ;;  %v1487_v37 = vpop.f32.mrb[31].mxu1 }
 0x115   :  { %v681_v6 = vrot.slane %v680_v45, 1  ;;  %v712_v7 = vrot.slane %v711_v3, 1  ;;  %v717_v22 = vadd.f32 %v716_v16, %v715_v2  ;;  %v749_v23 = vadd.f32 %v748_v17, %v747_v44 }
 0x116   :  { %2483 = vst [vmem:[#allocation2_spill] sm:$0xff] %v1924_v60  ;;  %2484 = vst [vmem:[#allocation3_spill] sm:$0xff] %v1929_v61  ;;  %v1033_v33 = vmax.f32 %v1917_v50, %v1919_v51  ;;  %v1072_v12 = vmin.f32 %v1917_v50, %v1919_v51  ;;  %v2522_v61 = vmin.f32 %v1869_v26, %v1871_v27 }
 0x117   :  { %v682_v34 = vadd.f32 %v681_v6, %v680_v45  ;;  %v713_v13 = vadd.f32 %v712_v7, %v711_v3 }
 0x118   :  { %v1942_v35 = vmax.f32 %v1020_v42, %v1033_v33  ;;  %v1947_v36 = vmin.f32 %v1059_v43, %v1072_v12 }
 0x119   :  { %v1949_v2 = vadd.f32 %v713_v13, %v682_v34  ;;  %v1951_v44 = vpop.f32.mrb[32].mxu0  ;;  %v1953_v16 = vpop.f32.mrb[32].mxu1 }
 0x11a   :  { %2485 = vst [vmem:[#allocation4_spill] sm:$0xff] %v1942_v35  ;;  %2486 = vst [vmem:[#allocation5_spill] sm:$0xff] %v1947_v36  ;;  %v718_v45 = vsel %vm650_vm2, %v1951_v44, 0.0  ;;  %v750_v3 = vsel %vm650_vm2, %v1953_v16, 0.0  ;;  %v1034_v42 = vmax.f32 %v1951_v44, %v1953_v16  ;;  %v1073_v17 = vmin.f32 %v1951_v44, %v1953_v16  ;;  %v1460_v43 = vpop.f32.mrb[33].mxu0  ;;  %v1490_v37 = vpop.f32.mrb[33].mxu1 }
 0x11b   :  { %v719_v6 = vadd.f32 %v718_v45, %v717_v22  ;;  %v751_v7 = vadd.f32 %v750_v3, %v749_v23  ;;  %v1963_v33 = vpop.f32.mrb[34].mxu0  ;;  %v1965_v12 = vpop.f32.mrb[34].mxu1 }
 0x11c   :  { %2487 = vst [vmem:[#allocation6_spill] sm:$0xff] %v1965_v12  ;;  %v1970_v34 = vmax.f32 %v1021_v52, %v1034_v42  ;;  %v1975_v13 = vmin.f32 %v1060_v53, %v1073_v17  ;;  %v720_v43 = vsel %vm650_vm2, %v1963_v33, 0.0  ;;  %v752_v22 = vsel %vm650_vm2, %v1965_v12, 0.0  ;;  %v1461_v23 = vpop.f32.mrb[35].mxu0  ;;  %v1491_v45 = vpop.f32.mrb[35].mxu1 }
 0x11d   :  { %v721_v3 = vadd.f32 %v720_v43, %v719_v6  ;;  %v753_v37 = vadd.f32 %v752_v22, %v751_v7  ;;  %v1035_v0 = vmax.f32 %v1963_v33, %v1965_v12  ;;  %v1074_v52 = vmin.f32 %v1963_v33, %v1965_v12 }
 0x11e   :  { %2488 = vst [vmem:[#allocation7_spill] sm:$0xff] %v1970_v34  ;;  %2489 = vst [vmem:[#allocation8_spill] sm:$0xff] %v1975_v13  ;;  %v2512_v13 = vmin.f32 %v1845_v56, %v1847_v57 }
 0x11f   :  { %v1988_v53 = vmax.f32 %v1022_v62, %v1035_v0  ;;  %v1993_v42 = vmin.f32 %v1061_v63, %v1074_v52 }
 0x121   :  { %2490 = vst [vmem:[#allocation9_spill] sm:$0xff] %v1988_v53  ;;  %2491 = vst [vmem:[#allocation10_spill] sm:$0xff] %v1993_v42  ;;  %v1995_v17 = vpop.f32.mrb[36].mxu0  ;;  %v1997_v6 = vpop.f32.mrb[36].mxu1 }
 0x122   :  { %2492 = vst [vmem:[#allocation11_spill] sm:$0xff] %v1997_v6  ;;  %v722_v7 = vsel %vm650_vm2, %v1995_v17, 0.0  ;;  %v754_v43 = vsel %vm650_vm2, %v1997_v6, 0.0  ;;  %v1036_v22 = vmax.f32 %v1995_v17, %v1997_v6  ;;  %v1075_v62 = vmin.f32 %v1995_v17, %v1997_v6  ;;  %v1464_v0 = vpop.f32.mrb[37].mxu0  ;;  %v1494_v23 = vpop.f32.mrb[37].mxu1 }
 0x123   :  { %v723_v63 = vadd.f32 %v722_v7, %v721_v3  ;;  %v755_v45 = vadd.f32 %v754_v43, %v753_v37  ;;  %v2007_v52 = vpop.f32.mrb[38].mxu0  ;;  %v2009_v47 = vpop.f32.mrb[38].mxu1 }
 0x124   :  { %2493 = vst [vmem:[#allocation12_spill] sm:$0xff] %v2009_v47  ;;  %v2014_v46 = vmax.f32 %v1023_v8, %v1036_v22  ;;  %v2019_v29 = vmin.f32 %v1062_v9, %v1075_v62  ;;  %v724_v0 = vsel %vm650_vm2, %v2007_v52, 0.0  ;;  %v756_v3 = vsel %vm650_vm2, %v2009_v47, 0.0  ;;  %v1465_v37 = vpop.f32.mrb[39].mxu0  ;;  %v1495_v7 = vpop.f32.mrb[39].mxu1 }
 0x125   :  { %v725_v43 = vadd.f32 %v724_v0, %v723_v63  ;;  %v757_v23 = vadd.f32 %v756_v3, %v755_v45  ;;  %v1037_v28 = vmax.f32 %v2007_v52, %v2009_v47  ;;  %v1076_v8 = vmin.f32 %v2007_v52, %v2009_v47 }
 0x126   :  { %2494 = vst [vmem:[#allocation13_spill] sm:$0xff] %v2014_v46  ;;  %2495 = vst [vmem:[#allocation14_spill] sm:$0xff] %v2019_v29  ;;  %v2502_v29 = vmin.f32 %v1821_v24, %v1823_v25 }
 0x127   :  { %v2032_v9 = vmax.f32 %v1024_v18, %v1037_v28  ;;  %v2037_v22 = vmin.f32 %v1063_v19, %v1076_v8 }
 0x129   :  { %2496 = vst [vmem:[#allocation15_spill] sm:$0xff] %v2032_v9  ;;  %2497 = vst [vmem:[#allocation16_spill] sm:$0xff] %v2037_v22  ;;  %v2039_v62 = vpop.f32.mrb[40].mxu0  ;;  %v2041_v63 = vpop.f32.mrb[40].mxu1  ;;  %v2500_v22 = vmax.f32 %v1821_v24, %v1823_v25 }
 0x12a   :  { %2498 = vst [vmem:[#allocation17_spill] sm:$0xff] %v2041_v63  ;;  %v726_v45 = vsel %vm650_vm2, %v2039_v62, 0.0  ;;  %v758_v0 = vsel %vm650_vm2, %v2041_v63, 0.0  ;;  %v1038_v3 = vmax.f32 %v2039_v62, %v2041_v63  ;;  %v1077_v18 = vmin.f32 %v2039_v62, %v2041_v63  ;;  %v1468_v28 = vpop.f32.mrb[41].mxu0  ;;  %v1498_v37 = vpop.f32.mrb[41].mxu1 }
 0x12b   :  { %v727_v19 = vadd.f32 %v726_v45, %v725_v43  ;;  %v759_v7 = vadd.f32 %v758_v0, %v757_v23  ;;  %v2051_v8 = vpop.f32.mrb[42].mxu0  ;;  %v2053_v9 = vpop.f32.mrb[42].mxu1 }
 0x12c   :  { %2499 = vst [vmem:[#allocation18_spill] sm:$0xff] %v2053_v9  ;;  %v2058_v46 = vmax.f32 %v2500_v22, %v1038_v3  ;;  %v2063_v53 = vmin.f32 %v2502_v29, %v1077_v18  ;;  %v728_v28 = vsel %vm650_vm2, %v2051_v8, 0.0  ;;  %v760_v43 = vsel %vm650_vm2, %v2053_v9, 0.0  ;;  %v1469_v23 = vpop.f32.mrb[43].mxu0  ;;  %v1499_v45 = vpop.f32.mrb[43].mxu1 }
 0x12d   :  { %v729_v0 = vadd.f32 %v728_v28, %v727_v19  ;;  %v761_v37 = vadd.f32 %v760_v43, %v759_v7  ;;  %v1039_v42 = vmax.f32 %v2051_v8, %v2053_v9  ;;  %v1078_v22 = vmin.f32 %v2051_v8, %v2053_v9 }
 0x12e   :  { %2501 = vst [vmem:[#allocation19_spill] sm:$0xff] %v2058_v46  ;;  %2503 = vst [vmem:[#allocation20_spill] sm:$0xff] %v2063_v53  ;;  %v2504_v29 = vmax.f32 %v1833_v40, %v1835_v41  ;;  %v2506_v18 = vmin.f32 %v1833_v40, %v1835_v41  ;;  %v2510_v53 = vmax.f32 %v1845_v56, %v1847_v57 }
 0x130   :  { %v2076_v3 = vmax.f32 %v2504_v29, %v1039_v42  ;;  %v2081_v46 = vmin.f32 %v2506_v18, %v1078_v22 }
 0x131   :  { %v2083_v23 = vpop.f32.mrb[44].mxu0  ;;  %v2085_v19 = vpop.f32.mrb[44].mxu1 }
 0x132   :  { %2505 = vst [vmem:[#allocation21_spill] sm:$0xff] %v2076_v3  ;;  %2507 = vst [vmem:[#allocation22_spill] sm:$0xff] %v2081_v46  ;;  %v730_v7 = vsel %vm650_vm2, %v2083_v23, 0.0  ;;  %v762_v28 = vsel %vm650_vm2, %v2085_v19, 0.0  ;;  %v1040_v43 = vmax.f32 %v2083_v23, %v2085_v19  ;;  %v1079_v42 = vmin.f32 %v2083_v23, %v2085_v19  ;;  %v1472_v45 = vpop.f32.mrb[45].mxu0  ;;  %v1502_v29 = vpop.f32.mrb[45].mxu1 }
 0x133   :  { %2508 = vst [vmem:[#allocation23_spill] sm:$0xff] %v2085_v19  ;;  %v731_v22 = vadd.f32 %v730_v7, %v729_v0  ;;  %v763_v18 = vadd.f32 %v762_v28, %v761_v37  ;;  %v2095_v3 = vpop.f32.mrb[46].mxu0  ;;  %v2097_v46 = vpop.f32.mrb[46].mxu1  ;;  %v2532_v19 = vmin.f32 %v1893_v20, %v1895_v21 }
 0x134   :  { %2509 = vst [vmem:[#allocation24_spill] sm:$0xff] %v2097_v46  ;;  %v2102_v34 = vmax.f32 %v2510_v53, %v1040_v43  ;;  %v2107_v35 = vmin.f32 %v2512_v13, %v1079_v42  ;;  %v732_v45 = vsel %vm650_vm2, %v2095_v3, 0.0  ;;  %v764_v0 = vsel %vm650_vm2, %v2097_v46, 0.0  ;;  %v1473_v37 = vpop.f32.mrb[47].mxu0  ;;  %v1503_v7 = vpop.f32.mrb[47].mxu1 }
 0x135   :  { %v733_v28 = vadd.f32 %v732_v45, %v731_v22  ;;  %v765_v29 = vadd.f32 %v764_v0, %v763_v18  ;;  %v1041_v36 = vmax.f32 %v2095_v3, %v2097_v46  ;;  %v1080_v53 = vmin.f32 %v2095_v3, %v2097_v46 }
 0x136   :  { %2511 = vst [vmem:[#allocation25_spill] sm:$0xff] %v2102_v34  ;;  %2513 = vst [vmem:[#allocation26_spill] sm:$0xff] %v2107_v35  ;;  %v2514_v13 = vmax.f32 %v1857_v10, %v1859_v11  ;;  %v2516_v42 = vmin.f32 %v1857_v10, %v1859_v11  ;;  %v2520_v35 = vmax.f32 %v1869_v26, %v1871_v27 }
 0x138   :  { %v2120_v43 = vmax.f32 %v2514_v13, %v1041_v36  ;;  %v2125_v34 = vmin.f32 %v2516_v42, %v1080_v53 }
 0x139   :  { %v2127_v37 = vpop.f32.mrb[48].mxu0  ;;  %v2129_v22 = vpop.f32.mrb[48].mxu1 }
 0x13a   :  { %2515 = vst [vmem:[#allocation27_spill] sm:$0xff] %v2120_v43  ;;  %2517 = vst [vmem:[#allocation28_spill] sm:$0xff] %v2125_v34  ;;  %v734_v18 = vsel %vm650_vm2, %v2127_v37, 0.0  ;;  %v766_v45 = vsel %vm650_vm2, %v2129_v22, 0.0  ;;  %v1042_v0 = vmax.f32 %v2127_v37, %v2129_v22  ;;  %v1081_v36 = vmin.f32 %v2127_v37, %v2129_v22  ;;  %v1476_v7 = vpop.f32.mrb[49].mxu0  ;;  %v1506_v13 = vpop.f32.mrb[49].mxu1 }
 0x13b   :  { %2518 = vst [vmem:[#allocation29_spill] sm:$0xff] %v2129_v22  ;;  %v735_v53 = vadd.f32 %v734_v18, %v733_v28  ;;  %v767_v42 = vadd.f32 %v766_v45, %v765_v29  ;;  %v2139_v43 = vpop.f32.mrb[50].mxu0  ;;  %v2141_v34 = vpop.f32.mrb[50].mxu1 }
 0x13c   :  { %2519 = vst [vmem:[#allocation30_spill] sm:$0xff] %v2141_v34  ;;  %v2146_v60 = vmax.f32 %v2520_v35, %v1042_v0  ;;  %v2151_v46 = vmin.f32 %v2522_v61, %v1081_v36  ;;  %v736_v7 = vsel %vm650_vm2, %v2139_v43, 0.0  ;;  %v768_v28 = vsel %vm650_vm2, %v2141_v34, 0.0  ;;  %v1477_v29 = vpop.f32.mrb[51].mxu0  ;;  %v1507_v18 = vpop.f32.mrb[51].mxu1 }
 0x13d   :  { %v737_v45 = vadd.f32 %v736_v7, %v735_v53  ;;  %v769_v13 = vadd.f32 %v768_v28, %v767_v42  ;;  %v1043_v22 = vmax.f32 %v2139_v43, %v2141_v34  ;;  %v1082_v35 = vmin.f32 %v2139_v43, %v2141_v34 }
 0x13e   :  { %2521 = vst [vmem:[#allocation31_spill] sm:$0xff] %v2146_v60  ;;  %2523 = vst [vmem:[#allocation32_spill] sm:$0xff] %v2151_v46  ;;  %v2524_v61 = vmax.f32 %v1881_v54, %v1883_v55  ;;  %v2526_v36 = vmin.f32 %v1881_v54, %v1883_v55  ;;  %v2530_v46 = vmax.f32 %v1893_v20, %v1895_v21 }
 0x140   :  { %v2164_v0 = vmax.f32 %v2524_v61, %v1043_v22  ;;  %v2169_v60 = vmin.f32 %v2526_v36, %v1082_v35 }
 0x141   :  { %v2171_v29 = vpop.f32.mrb[52].mxu0  ;;  %v2173_v53 = vpop.f32.mrb[52].mxu1 }
 0x142   :  { %2525 = vst [vmem:[#allocation33_spill] sm:$0xff] %v2164_v0  ;;  %2527 = vst [vmem:[#allocation34_spill] sm:$0xff] %v2169_v60  ;;  %v738_v42 = vsel %vm674_vm3, %v2171_v29, 0.0  ;;  %v770_v7 = vsel %vm674_vm3, %v2173_v53, 0.0  ;;  %v1044_v28 = vmax.f32 %v2171_v29, %v2173_v53  ;;  %v1083_v22 = vmin.f32 %v2171_v29, %v2173_v53  ;;  %v1480_v18 = vpop.f32.mrb[53].mxu0  ;;  %v1510_v61 = vpop.f32.mrb[53].mxu1 }
 0x143   :  { %2528 = vst [vmem:[#allocation35_spill] sm:$0xff] %v2171_v29  ;;  %2529 = vst [vmem:[#allocation36_spill] sm:$0xff] %v2173_v53  ;;  %v739_v35 = vadd.f32 %v738_v42, %v737_v45  ;;  %v771_v36 = vadd.f32 %v770_v7, %v769_v13  ;;  %v491_v0 = vpop.f32.mrb[54].mxu0  ;;  %v647_v60 = vpop.f32.mrb[54].mxu1 }
 0x144   :  { %v2186_v34 = vmax.f32 %v2530_v46, %v1044_v28  ;;  %v2191_v9 = vmin.f32 %v2532_v19, %v1083_v22  ;;  %v1481_v63 = vpop.f32.mrb[55].mxu0  ;;  %v1511_v47 = vpop.f32.mrb[55].mxu1 }
 0x145   :  { %v740_v6 = vrot.slane %v739_v35, 4  ;;  %v772_v53 = vrot.slane %v771_v36, 4 }
 0x146   :  { %2531 = vst [vmem:[#allocation37_spill] sm:$0xff] %v2186_v34 }
 0x147   :  { %v741_v18 = vadd.f32 %v740_v6, %v739_v35  ;;  %v773_v61 = vadd.f32 %v772_v53, %v771_v36 }
 0x149   :  { %v742_v45 = vrot.slane %v741_v18, 2  ;;  %v774_v13 = vrot.slane %v773_v61, 2 }
 0x14b   :  { %v743_v0 = vadd.f32 %v742_v45, %v741_v18  ;;  %v775_v60 = vadd.f32 %v774_v13, %v773_v61 }
 0x14d   :  { %v744_v42 = vrot.slane %v743_v0, 1  ;;  %v776_v7 = vrot.slane %v775_v60, 1 }
 0x14f   :  { %v745_v12 = vadd.f32 %v744_v42, %v743_v0  ;;  %v777_v28 = vadd.f32 %v776_v7, %v775_v60 }
 0x151   :  { %v746_v46 = vadd.f32 %v745_v12, %v1949_v2 }
 0x153   :  { %v778_v34 = vadd.f32 %v777_v28, %v746_v46 }
 0x155   :  { %v2194_v29 = vmul.f32 0.0025510204, %v778_v34 }
 0x157   :  { %v780_v47 = vsub.f32 %v1749_v30, %v2194_v29  ;;  %v781_v6 = vsub.f32 %v1761_v38, %v2194_v29  ;;  %v782_v63 = vsub.f32 %v1773_v48, %v2194_v29  ;;  %v783_v19 = vsub.f32 %v1785_v58, %v2194_v29 }
 0x158   :  { %v784_v2 = vsub.f32 %v1797_v4, %v2194_v29  ;;  %v785_v34 = vsub.f32 %v1809_v14, %v2194_v29  ;;  %v786_v48 = vsub.f32 %v1821_v24, %v2194_v29  ;;  %v787_v61 = vsub.f32 %v1833_v40, %v2194_v29 }
 0x159   :  { %v793_v53 = vmul.f32 %v780_v47, %v780_v47  ;;  %v794_v22 = vmul.f32 %v781_v6, %v781_v6  ;;  %v795_v12 = vmul.f32 %v782_v63, %v782_v63  ;;  %v796_v35 = vmul.f32 %v783_v19, %v783_v19 }
 0x15a   :  { %v797_v18 = vmul.f32 %v784_v2, %v784_v2  ;;  %v788_v4 = vsub.f32 %v1845_v56, %v2194_v29  ;;  %v798_v14 = vmul.f32 %v785_v34, %v785_v34  ;;  %v837_v0 = vsub.f32 %v1751_v31, %v2194_v29 }
 0x15b   :  { %v806_v30 = vsel %vm650_vm2, %v793_v53, 0.0  ;;  %v807_v38 = vsel %vm650_vm2, %v794_v22, 0.0  ;;  %v809_v58 = vsel %vm650_vm2, %v795_v12, 0.0  ;;  %v811_v13 = vsel %vm650_vm2, %v796_v35, 0.0 }
 0x15c   :  { %v808_v36 = vadd.f32 %v807_v38, %v806_v30  ;;  %v838_v60 = vsub.f32 %v1763_v39, %v2194_v29  ;;  %v789_v24 = vsub.f32 %v1857_v10, %v2194_v29  ;;  %v790_v42 = vsub.f32 %v1869_v26, %v2194_v29 }
 0x15d   :  { %v791_v56 = vsub.f32 %v1881_v54, %v2194_v29  ;;  %v799_v7 = vmul.f32 %v786_v48, %v786_v48  ;;  %v813_v46 = vsel %vm650_vm2, %v797_v18, 0.0  ;;  %v839_v28 = vsub.f32 %v1775_v49, %v2194_v29 }
 0x15e   :  { %v810_v45 = vadd.f32 %v809_v58, %v808_v36  ;;  %v792_v31 = vsub.f32 %v1893_v20, %v2194_v29  ;;  %v800_v39 = vmul.f32 %v787_v61, %v787_v61  ;;  %v801_v47 = vmul.f32 %v788_v4, %v788_v4 }
 0x15f   :  { %v815_v10 = vsel %vm650_vm2, %v798_v14, 0.0  ;;  %v840_v26 = vsub.f32 %v1787_v59, %v2194_v29  ;;  %v850_v63 = vmul.f32 %v837_v0, %v837_v0  ;;  %v851_v19 = vmul.f32 %v838_v60, %v838_v60 }
 0x160   :  { %v812_v40 = vadd.f32 %v811_v13, %v810_v45  ;;  %v802_v54 = vmul.f32 %v789_v24, %v789_v24  ;;  %v803_v53 = vmul.f32 %v790_v42, %v790_v42  ;;  %v804_v2 = vmul.f32 %v791_v56, %v791_v56 }
 0x161   :  { %v817_v12 = vsel %vm650_vm2, %v799_v7, 0.0  ;;  %v841_v49 = vsub.f32 %v1799_v5, %v2194_v29  ;;  %v852_v20 = vmul.f32 %v839_v28, %v839_v28  ;;  %v805_v34 = vmul.f32 %v792_v31, %v792_v31 }
 0x162   :  { %v814_v6 = vadd.f32 %v813_v46, %v812_v40  ;;  %v819_v30 = vsel %vm650_vm2, %v800_v39, 0.0  ;;  %v863_v38 = vsel %vm650_vm2, %v850_v63, 0.0  ;;  %v821_v59 = vsel %vm650_vm2, %v801_v47, 0.0 }
 0x163   :  { %v842_v36 = vsub.f32 %v1811_v15, %v2194_v29  ;;  %v853_v48 = vmul.f32 %v840_v26, %v840_v26  ;;  %v864_v18 = vsel %vm650_vm2, %v851_v19, 0.0  ;;  %v823_v61 = vsel %vm650_vm2, %v802_v54, 0.0 }
 0x164   :  { %v816_v22 = vadd.f32 %v815_v10, %v814_v6  ;;  %v825_v5 = vsel %vm650_vm2, %v803_v53, 0.0  ;;  %v865_v4 = vadd.f32 %v864_v18, %v863_v38  ;;  %v827_v45 = vsel %vm650_vm2, %v804_v2, 0.0 }
 0x165   :  { %v843_v14 = vsub.f32 %v1823_v25, %v2194_v29  ;;  %v854_v13 = vmul.f32 %v841_v49, %v841_v49  ;;  %v866_v0 = vsel %vm650_vm2, %v852_v20, 0.0  ;;  %v829_v15 = vsel %vm674_vm3, %v805_v34, 0.0 }
 0x166   :  { %v818_v35 = vadd.f32 %v817_v12, %v816_v22  ;;  %v844_v24 = vsub.f32 %v1835_v41, %v2194_v29  ;;  %v867_v42 = vadd.f32 %v866_v0, %v865_v4  ;;  %v855_v40 = vmul.f32 %v842_v36, %v842_v36 }
 0x167   :  { %v868_v56 = vsel %vm650_vm2, %v853_v48, 0.0  ;;  %v895_v7 = vsub.f32 %v1905_v1, %v2194_v29  ;;  %v896_v46 = vsub.f32 %v1917_v50, %v2194_v29  ;;  %v845_v28 = vsub.f32 %v1847_v57, %v2194_v29 }
 0x168   :  { %v820_v58 = vadd.f32 %v819_v30, %v818_v35  ;;  %v846_v31 = vsub.f32 %v1859_v11, %v2194_v29  ;;  %v869_v39 = vadd.f32 %v868_v56, %v867_v42  ;;  %v847_v41 = vsub.f32 %v1871_v27, %v2194_v29 }
 0x169   :  { %v856_v47 = vmul.f32 %v843_v14, %v843_v14  ;;  %v870_v6 = vsel %vm650_vm2, %v854_v13, 0.0  ;;  %v897_v1 = vsub.f32 %v1951_v44, %v2194_v29  ;;  %v848_v50 = vsub.f32 %v1883_v55, %v2194_v29 }
 0x16a   :  { %v822_v60 = vadd.f32 %v821_v59, %v820_v58  ;;  %v857_v26 = vmul.f32 %v844_v24, %v844_v24  ;;  %v871_v63 = vadd.f32 %v870_v6, %v869_v39  ;;  %v872_v57 = vsel %vm650_vm2, %v855_v40, 0.0 }
 0x16b   :  { %v898_v11 = vsub.f32 %v1963_v33, %v2194_v29  ;;  %v908_v19 = vmul.f32 %v895_v7, %v895_v7  ;;  %v909_v54 = vmul.f32 %v896_v46, %v896_v46  ;;  %v849_v53 = vsub.f32 %v1895_v21, %v2194_v29 }
 0x16c   :  { %v824_v25 = vadd.f32 %v823_v61, %v822_v60  ;;  %v858_v22 = vmul.f32 %v845_v28, %v845_v28  ;;  %v873_v2 = vadd.f32 %v872_v57, %v871_v63  ;;  %v859_v44 = vmul.f32 %v846_v31, %v846_v31 }
 0x16d   :  { %v874_v12 = vsel %vm650_vm2, %v856_v47, 0.0  ;;  %v899_v55 = vsub.f32 %v1995_v17, %v2194_v29  ;;  %v910_v49 = vmul.f32 %v897_v1, %v897_v1  ;;  %v860_v34 = vmul.f32 %v847_v41, %v847_v41 }
 0x16e   :  { %v826_v10 = vadd.f32 %v825_v5, %v824_v25  ;;  %v875_v35 = vadd.f32 %v874_v12, %v873_v2  ;;  %v876_v33 = vsel %vm650_vm2, %v857_v26, 0.0  ;;  %v900_v30 = vsub.f32 %v2007_v52, %v2194_v29 }
 0x16f   :  { %v911_v38 = vmul.f32 %v898_v11, %v898_v11  ;;  %v921_v21 = vsel %vm650_vm2, %v908_v19, 0.0  ;;  %v922_v59 = vsel %vm650_vm2, %v909_v54, 0.0  ;;  %v861_v48 = vmul.f32 %v848_v50, %v848_v50  ;;  %v2533_v19 = vld [vmem:[#allocation35_spill] sm:$0xff] }
 0x170   :  { %v828_v27 = vadd.f32 %v827_v45, %v826_v10  ;;  %v877_v18 = vadd.f32 %v876_v33, %v875_v35  ;;  %v923_v58 = vadd.f32 %v922_v59, %v921_v21  ;;  %v878_v17 = vsel %vm650_vm2, %v858_v22, 0.0 }
 0x171   :  { %v901_v61 = vsub.f32 %v2039_v62, %v2194_v29  ;;  %v912_v5 = vmul.f32 %v899_v55, %v899_v55  ;;  %v924_v4 = vsel %vm650_vm2, %v910_v49, 0.0  ;;  %v862_v45 = vmul.f32 %v849_v53, %v849_v53 }
 0x172   :  { %v830_v20 = vadd.f32 %v829_v15, %v828_v27  ;;  %v879_v14 = vadd.f32 %v878_v17, %v877_v18  ;;  %v925_v52 = vadd.f32 %v924_v4, %v923_v58  ;;  %v880_v13 = vsel %vm650_vm2, %v859_v44, 0.0 }
 0x173   :  { %v902_v0 = vsub.f32 %v2051_v8, %v2194_v29  ;;  %v913_v60 = vmul.f32 %v900_v30, %v900_v30  ;;  %v926_v15 = vsel %vm650_vm2, %v911_v38, 0.0  ;;  %v882_v40 = vsel %vm650_vm2, %v860_v34, 0.0  ;;  %v2535_v34 = vld [vmem:[#allocation11_spill] sm:$0xff] }
 0x174   :  { %v831_v36 = vrot.slane %v830_v20, 4  ;;  %v881_v42 = vadd.f32 %v880_v13, %v879_v14  ;;  %v927_v56 = vadd.f32 %v926_v15, %v925_v52  ;;  %v884_v62 = vsel %vm650_vm2, %v861_v48, 0.0  ;;  %v2536_v48 = vld [vmem:[#allocation12_spill] sm:$0xff]  ;;  %v2537_v52 = vld [vmem:[#allocation17_spill] sm:$0xff] }
 0x175   :  { %v903_v7 = vsub.f32 %v2083_v23, %v2194_v29  ;;  %v914_v46 = vmul.f32 %v901_v61, %v901_v61  ;;  %v928_v25 = vsel %vm650_vm2, %v912_v5, 0.0  ;;  %v886_v31 = vsel %vm674_vm3, %v862_v45, 0.0 }
 0x176   :  { %v832_v24 = vadd.f32 %v831_v36, %v830_v20  ;;  %v883_v28 = vadd.f32 %v882_v40, %v881_v42  ;;  %v929_v8 = vadd.f32 %v928_v25, %v927_v56  ;;  %v953_v39 = vsub.f32 %v1907_v32, %v2194_v29  ;;  %v2538_v56 = vld [vmem:[#allocation18_spill] sm:$0xff] }
 0x177   :  { %v904_v41 = vsub.f32 %v2095_v3, %v2194_v29  ;;  %v915_v47 = vmul.f32 %v902_v0, %v902_v0  ;;  %v930_v6 = vsel %vm650_vm2, %v913_v60, 0.0  ;;  %v954_v1 = vsub.f32 %v1919_v51, %v2194_v29 }
 0x178   :  { %v833_v23 = vrot.slane %v832_v24, 2  ;;  %v885_v10 = vadd.f32 %v884_v62, %v883_v28  ;;  %v905_v50 = vsub.f32 %v2127_v37, %v2194_v29  ;;  %v931_v26 = vadd.f32 %v930_v6, %v929_v8  ;;  %v2534_v37 = vld [vmem:[#allocation6_spill] sm:$0xff] }
 0x179   :  { %v906_v63 = vsub.f32 %v2139_v43, %v2194_v29  ;;  %v916_v57 = vmul.f32 %v903_v7, %v903_v7  ;;  %v932_v32 = vsel %vm650_vm2, %v914_v46, 0.0  ;;  %v955_v3 = vsub.f32 %v1953_v16, %v2194_v29 }
 0x17a   :  { %v887_v11 = vadd.f32 %v886_v31, %v885_v10  ;;  %v907_v54 = vsub.f32 %v2533_v19, %v2194_v29  ;;  %v933_v51 = vadd.f32 %v932_v32, %v931_v26  ;;  %v966_v27 = vmul.f32 %v953_v39, %v953_v39  ;;  %v2540_v26 = vld [vmem:[#allocation24_spill] sm:$0xff] }
 0x17b   :  { %v917_v53 = vmul.f32 %v904_v41, %v904_v41  ;;  %v934_v22 = vsel %vm650_vm2, %v915_v47, 0.0  ;;  %v956_v2 = vsub.f32 %v2534_v37, %v2194_v29  ;;  %v967_v44 = vmul.f32 %v954_v1, %v954_v1  ;;  %v2539_v41 = vld [vmem:[#allocation23_spill] sm:$0xff] }
 0x17c   :  { %v834_v43 = vadd.f32 %v833_v23, %v832_v24  ;;  %v888_v12 = vrot.slane %v887_v11, 4  ;;  %v918_v55 = vmul.f32 %v905_v50, %v905_v50  ;;  %v935_v49 = vadd.f32 %v934_v22, %v933_v51 }
 0x17d   :  { %v919_v20 = vmul.f32 %v906_v63, %v906_v63  ;;  %v936_v16 = vsel %vm650_vm2, %v916_v57, 0.0  ;;  %v957_v35 = vsub.f32 %v2535_v34, %v2194_v29  ;;  %v968_v33 = vmul.f32 %v955_v3, %v955_v3 }
 0x17e   :  { %v889_v30 = vadd.f32 %v888_v12, %v887_v11  ;;  %v920_v38 = vmul.f32 %v907_v54, %v907_v54  ;;  %v937_v21 = vadd.f32 %v936_v16, %v935_v49  ;;  %v979_v59 = vsel %vm650_vm2, %v966_v27, 0.0  ;;  %v2541_v54 = vld [vmem:[#allocation29_spill] sm:$0xff] }
 0x17f   :  { %v938_v36 = vsel %vm650_vm2, %v917_v53, 0.0  ;;  %v958_v18 = vsub.f32 %v2536_v48, %v2194_v29  ;;  %v969_v58 = vmul.f32 %v956_v2, %v956_v2  ;;  %v980_v17 = vsel %vm650_vm2, %v967_v44, 0.0  ;;  %v2542_v2 = vld [vmem:[#allocation30_spill] sm:$0xff] }
 0x180   :  { %v835_v61 = vrot.slane %v834_v43, 1  ;;  %v890_v5 = vrot.slane %v889_v30, 2  ;;  %v939_v4 = vadd.f32 %v938_v36, %v937_v21  ;;  %v981_v45 = vadd.f32 %v980_v17, %v979_v59 }
 0x181   :  { %v940_v14 = vsel %vm650_vm2, %v918_v55, 0.0  ;;  %v959_v13 = vsub.f32 %v2537_v52, %v2194_v29  ;;  %v970_v0 = vmul.f32 %v957_v35, %v957_v35  ;;  %v982_v60 = vsel %vm650_vm2, %v968_v33, 0.0 }
 0x182   :  { %v891_v15 = vadd.f32 %v890_v5, %v889_v30  ;;  %v941_v24 = vadd.f32 %v940_v14, %v939_v4  ;;  %v983_v42 = vadd.f32 %v982_v60, %v981_v45  ;;  %v942_v40 = vsel %vm650_vm2, %v919_v20, 0.0  ;;  %v2543_v20 = vld [vmem:[#allocation36_spill] sm:$0xff] }
 0x183   :  { %v960_v62 = vsub.f32 %v2538_v56, %v2194_v29  ;;  %v971_v7 = vmul.f32 %v958_v18, %v958_v18  ;;  %v984_v46 = vsel %vm650_vm2, %v969_v58, 0.0  ;;  %v836_v25 = vadd.f32 %v835_v61, %v834_v43 }
 0x184   :  { %v892_v28 = vrot.slane %v891_v15, 1  ;;  %v943_v31 = vadd.f32 %v942_v40, %v941_v24  ;;  %v985_v8 = vadd.f32 %v984_v46, %v983_v42  ;;  %v944_v39 = vsel %vm674_vm3, %v920_v38, 0.0 }
 0x185   :  { %v961_v47 = vsub.f32 %v2539_v41, %v2194_v29  ;;  %v972_v6 = vmul.f32 %v959_v13, %v959_v13  ;;  %v986_v1 = vsel %vm650_vm2, %v970_v0, 0.0  ;;  %v962_v63 = vsub.f32 %v2540_v26, %v2194_v29  ;;  %v2546_v26 = vld [vmem:[#allocation3_spill] sm:$0xff] }
 0x186   :  { %v893_v23 = vadd.f32 %v892_v28, %v891_v15  ;;  %v945_v10 = vadd.f32 %v944_v39, %v943_v31  ;;  %v987_v50 = vadd.f32 %v986_v1, %v985_v8  ;;  %v973_v57 = vmul.f32 %v960_v62, %v960_v62  ;;  %v1016_v31 = vld [vmem:[%s2470_s3] sm:$0x1] }
 0x187   :  { %v988_v32 = vsel %vm650_vm2, %v971_v7, 0.0  ;;  %v963_v51 = vsub.f32 %v2541_v54, %v2194_v29  ;;  %v974_v27 = vmul.f32 %v961_v47, %v961_v47  ;;  %v990_v53 = vsel %vm650_vm2, %v972_v6, 0.0  ;;  %v1014_v7 = vld [vmem:[%s2469_s2] sm:$0x1] }
 0x188   :  { %v894_v3 = vadd.f32 %v893_v23, %v836_v25  ;;  %v946_v11 = vrot.slane %v945_v10, 4  ;;  %v989_v19 = vadd.f32 %v988_v32, %v987_v50  ;;  %v964_v44 = vsub.f32 %v2542_v2, %v2194_v29  ;;  %v2548_v32 = vld [vmem:[#allocation5_spill] sm:$0xff] }
 0x189   :  { %v975_v43 = vmul.f32 %v962_v63, %v962_v63  ;;  %v992_v12 = vsel %vm650_vm2, %v973_v57, 0.0  ;;  %v965_v16 = vsub.f32 %v2543_v20, %v2194_v29  ;;  %v976_v34 = vmul.f32 %v963_v51, %v963_v51  ;;  %v2547_v63 = vld [vmem:[#allocation2_spill] sm:$0xff] }
 0x18a   :  { %v947_v22 = vadd.f32 %v946_v11, %v945_v10  ;;  %v991_v37 = vadd.f32 %v990_v53, %v989_v19  ;;  %v994_v35 = vsel %vm650_vm2, %v974_v27, 0.0  ;;  %v977_v38 = vmul.f32 %v964_v44, %v964_v44  ;;  %v2550_v11 = vld [vmem:[#allocation8_spill] sm:$0xff]  ;;  %v2551_v19 = vld [vmem:[#allocation7_spill] sm:$0xff]  ;;  %v2552_v51 = vld [vmem:[#allocation10_spill] sm:$0xff] }
 0x18b   :  { %v996_v21 = vsel %vm650_vm2, %v975_v43, 0.0  ;;  %v978_v48 = vmul.f32 %v965_v16, %v965_v16  ;;  %v998_v18 = vsel %vm650_vm2, %v976_v34, 0.0  ;;  %v1099_v62 = vlaneseq  ;;  %v2553_v27 = vld [vmem:[#allocation9_spill] sm:$0xff]  ;;  %v2556_v44 = vld [vmem:[#allocation16_spill] sm:$0xff]  ;;  %v2557_v43 = vld [vmem:[#allocation15_spill] sm:$0xff] }
 0x18c   :  { %v948_v55 = vrot.slane %v947_v22, 2  ;;  %v993_v49 = vadd.f32 %v992_v12, %v991_v37  ;;  %v1000_v61 = vsel %vm650_vm2, %v977_v38, 0.0  ;;  %v1548_v41 = vmov 0   ;;  %v2555_v37 = vld [vmem:[#allocation13_spill] sm:$0xff]  ;;  %v2560_v16 = vld [vmem:[#allocation22_spill] sm:$0xff] }
 0x18d   :  { %v1002_v45 = vsel %vm674_vm3, %v978_v48, 0.0  ;;  %v1100_v46 = vshrl.u32 %v1099_v62, 7  ;;  %v2561_v34 = vld [vmem:[#allocation21_spill] sm:$0xff]  ;;  %v2566_v48 = vld [vmem:[#allocation32_spill] sm:$0xff] }
 0x18e   :  { %v949_v33 = vadd.f32 %v948_v55, %v947_v22  ;;  %v995_v30 = vadd.f32 %v994_v35, %v993_v49  ;;  %v2554_v22 = vld [vmem:[#allocation14_spill] sm:$0xff]  ;;  %v2558_v55 = vld [vmem:[#allocation20_spill] sm:$0xff]  ;;  %v2559_v49 = vld [vmem:[#allocation19_spill] sm:$0xff] }
 0x18f   :  { %v1101_v39 = vsub.s32 0, %v1100_v46 }
 0x190   :  { %v950_v59 = vrot.slane %v949_v33, 1  ;;  %v997_v36 = vadd.f32 %v996_v21, %v995_v30  ;;  %v2563_v30 = vld [vmem:[#allocation25_spill] sm:$0xff]  ;;  %v2564_v21 = vld [vmem:[#allocation28_spill] sm:$0xff] }
 0x192   :  { %v951_v58 = vadd.f32 %v950_v59, %v949_v33  ;;  %v999_v17 = vadd.f32 %v998_v18, %v997_v36  ;;  %v2562_v33 = vld [vmem:[#allocation26_spill] sm:$0xff]  ;;  %v2565_v59 = vld [vmem:[#allocation27_spill] sm:$0xff] }
 0x193   :  { %v2567_v18 = vld [vmem:[#allocation31_spill] sm:$0xff] }
 0x194   :  { %v952_v5 = vadd.f32 %v951_v58, %v894_v3  ;;  %v1001_v4 = vadd.f32 %v1000_v61, %v999_v17  ;;  %v2549_v3 = vld [vmem:[#allocation4_spill] sm:$0xff]  ;;  %v2568_v17 = vld [vmem:[#allocation34_spill] sm:$0xff]  ;;  %v2569_v61 = vld [vmem:[#allocation33_spill] sm:$0xff] }
 0x196   :  { %v1003_v14 = vadd.f32 %v1002_v45, %v1001_v4  ;;  %v2570_v4 = vld [vmem:[#allocation37_spill] sm:$0xff] }
 0x198   :  { %v1004_v52 = vrot.slane %v1003_v14, 4 }
 0x19a   :  { %v1005_v13 = vadd.f32 %v1004_v52, %v1003_v14 }
 0x19c   :  { %v1006_v0 = vrot.slane %v1005_v13, 2 }
 0x19e   :  { %v1007_v60 = vadd.f32 %v1006_v0, %v1005_v13 }
 0x1a0   :  { %v1008_v15 = vrot.slane %v1007_v60, 1 }
 0x1a2   :  { %v1009_v24 = vadd.f32 %v1008_v15, %v1007_v60 }
 0x1a4   :  { %v1010_v42 = vadd.f32 %v1009_v24, %v952_v5 }
 0x1a6   :  { %v1011_v40 = vmul.f32 0.0025510204, %v1010_v42 }
 0x1a8   :  { %v1012_v56 = vadd.f32 1e-05, %v1011_v40 }
 0x1aa   :  { %1544 = vrsqrt.f32 %v1012_v56 }
 0x1b4   :  { %v1545_v25 = vpop.eup %1544 }
 0x1b5   :  { %v1015_v28 = vmul.f32 %v1545_v25, %v1014_v7 }
 0x1b7   :  { %v1017_v8 = vmul.f32 %v1015_v28, %v2194_v29  ;;  %vm1097_vm4 = vcmp.ge.f32.partialorder %v1015_v28, 0.0  ;;  %v1120_v10 = vrot.slane %v1015_v28, %v1101_v39 }
 0x1b8   :  { %v1098_v47 = vsel %vm1097_vm4, 1, %v1548_v41 }
 0x1b9   :  { %v1018_v6 = vsub.f32 %v1016_v31, %v1017_v8  ;;  %v1102_v1 = vrot.slane %v1098_v47, %v1101_v39 }
 0x1bb   :  { %vm2359_vm5 = vcmp.eq.s32.totalorder %v1102_v1, 1  ;;  %v1138_v50 = vrot.slane %v1018_v6, %v1101_v39 }
 0x1bc   :  { %v1104_v57 = vsel %vm2359_vm5, %v2547_v63, %v2546_v26  ;;  %v1105_v29 = vsel %vm2359_vm5, %v2549_v3, %v2548_v32  ;;  %v1106_v54 = vsel %vm2359_vm5, %v2551_v19, %v2550_v11  ;;  %v1107_v53 = vsel %vm2359_vm5, %v2553_v27, %v2552_v51 }
 0x1bd   :  { %v1108_v2 = vsel %vm2359_vm5, %v2555_v37, %v2554_v22  ;;  %v1109_v12 = vsel %vm2359_vm5, %v2557_v43, %v2556_v44  ;;  %v1110_v20 = vsel %vm2359_vm5, %v2559_v49, %v2558_v55  ;;  %v1111_v35 = vsel %vm2359_vm5, %v2561_v34, %v2560_v16 }
 0x1be   :  { %v1112_v38 = vsel %vm2359_vm5, %v2563_v30, %v2562_v33  ;;  %v1113_v36 = vsel %vm2359_vm5, %v2565_v59, %v2564_v21  ;;  %v1114_v58 = vsel %vm2359_vm5, %v2567_v18, %v2566_v48  ;;  %v1115_v5 = vsel %vm2359_vm5, %v2569_v61, %v2568_v17 }
 0x1bf   :  { %v1116_v45 = vsel %vm2359_vm5, %v2570_v4, %v2191_v9  ;;  %v1121_v14 = vmul.f32 %v1120_v10, %v1104_v57  ;;  %v1122_v52 = vmul.f32 %v1120_v10, %v1105_v29  ;;  %v1123_v13 = vmul.f32 %v1120_v10, %v1106_v54 }
 0x1c0   :  { %v1124_v0 = vmul.f32 %v1120_v10, %v1107_v53  ;;  %v1125_v60 = vmul.f32 %v1120_v10, %v1108_v2  ;;  %v1126_v15 = vmul.f32 %v1120_v10, %v1109_v12  ;;  %v1127_v24 = vmul.f32 %v1120_v10, %v1110_v20 }
 0x1c1   :  { %v1128_v42 = vmul.f32 %v1120_v10, %v1111_v35  ;;  %v1129_v40 = vmul.f32 %v1120_v10, %v1112_v38  ;;  %v1130_v56 = vmul.f32 %v1120_v10, %v1113_v36  ;;  %v1131_v62 = vmul.f32 %v1120_v10, %v1114_v58 }
 0x1c2   :  { %v1132_v7 = vmul.f32 %v1120_v10, %v1115_v5  ;;  %v1133_v46 = vmul.f32 %v1120_v10, %v1116_v45  ;;  %v1140_v25 = vadd.f32 %v1138_v50, %v1121_v14  ;;  %v1141_v28 = vadd.f32 %v1138_v50, %v1122_v52 }
 0x1c3   :  { %v1142_v31 = vadd.f32 %v1138_v50, %v1123_v13  ;;  %v1143_v8 = vadd.f32 %v1138_v50, %v1124_v0  ;;  %v1144_v39 = vadd.f32 %v1138_v50, %v1125_v60  ;;  %v1145_v9 = vadd.f32 %v1138_v50, %v1126_v15 }
 0x1c4   :  { %v1146_v41 = vadd.f32 %v1138_v50, %v1127_v24  ;;  %v1147_v47 = vadd.f32 %v1138_v50, %v1128_v42  ;;  %v1148_v6 = vadd.f32 %v1138_v50, %v1129_v40  ;;  %v1149_v1 = vadd.f32 %v1138_v50, %v1130_v56 }
 0x1c5   :  { %v1150_v23 = vadd.f32 %v1138_v50, %v1131_v62  ;;  %v1151_v26 = vadd.f32 %v1138_v50, %v1132_v7  ;;  %v1152_v63 = vadd.f32 %v1138_v50, %v1133_v46  ;;  %v1153_v57 = vmax.f32 %v1140_v25, 0.0 }
 0x1c6   :  { %v1154_v32 = vmax.f32 %v1141_v28, 0.0  ;;  %v1155_v3 = vmax.f32 %v1142_v31, 0.0  ;;  %v1156_v29 = vmax.f32 %v1143_v8, 0.0  ;;  %v1157_v11 = vmax.f32 %v1144_v39, 0.0 }
 0x1c7   :  { %v1158_v10 = vmax.f32 %v1145_v9, 0.0  ;;  %v1159_v19 = vmax.f32 %v1146_v41, 0.0  ;;  %v1160_v54 = vmax.f32 %v1147_v47, 0.0  ;;  %v1161_v51 = vmax.f32 %v1148_v6, 0.0 }
 0x1c8   :  { %v1162_v27 = vmax.f32 %v1149_v1, 0.0  ;;  %v1163_v53 = vmax.f32 %v1150_v23, 0.0  ;;  %v1164_v22 = vmax.f32 %v1151_v26, 0.0  ;;  %v1165_v37 = vmax.f32 %v1152_v63, 0.0 }
 0x1c9   :  { %v1347_v2 = vpack.c.bf16 %v1153_v57, %v1153_v57  ;;  %v1348_v44 = vpack.c.bf16 %v1154_v32, %v1154_v32  ;;  %v1349_v43 = vpack.c.bf16 %v1155_v3, %v1155_v3  ;;  %v1350_v12 = vpack.c.bf16 %v1156_v29, %v1156_v29 }
 0x1ca   :  { %v1351_v55 = vpack.c.bf16 %v1157_v11, %v1157_v11  ;;  %v1352_v49 = vpack.c.bf16 %v1158_v10, %v1158_v10  ;;  %v1353_v50 = vpack.c.bf16 %v1159_v19, %v1159_v19  ;;  %v1354_v20 = vpack.c.bf16 %v1160_v54, %v1160_v54 }
 0x1cb   :  { %v1355_v16 = vpack.c.bf16 %v1161_v51, %v1161_v51  ;;  %v1356_v34 = vpack.c.bf16 %v1162_v27, %v1162_v27  ;;  %v1357_v35 = vpack.c.bf16 %v1163_v53, %v1163_v53  ;;  %v1358_v33 = vpack.c.bf16 %v1164_v22, %v1164_v22  ;;  %1220 = vst.msk [vmem:[%s2471_s4] sm:$0xf] %vm1219_vm6, %v1347_v2 }
 0x1cc   :  { %1221 = vst.msk [vmem:[%s2471_s4 + $0x4] sm:$0xf] %vm1219_vm6, %v1348_v44  ;;  %1222 = vst.msk [vmem:[%s2471_s4 + $0x8] sm:$0xf] %vm1219_vm6, %v1349_v43  ;;  %v1359_v30 = vpack.c.bf16 %v1165_v37, %v1165_v37 }
 0x1cd   :  { %1223 = vst.msk [vmem:[%s2471_s4 + $0xc] sm:$0xf] %vm1219_vm6, %v1350_v12  ;;  %1224 = vst.msk [vmem:[%s2471_s4 + $0x10] sm:$0xf] %vm1219_vm6, %v1351_v55 }
 0x1ce   :  { %1225 = vst.msk [vmem:[%s2471_s4 + $0x14] sm:$0xf] %vm1219_vm6, %v1352_v49  ;;  %1226 = vst.msk [vmem:[%s2471_s4 + $0x18] sm:$0xf] %vm1219_vm6, %v1353_v50 }
 0x1cf   :  { %1227 = vst.msk [vmem:[%s2471_s4 + $0x1c] sm:$0xf] %vm1219_vm6, %v1354_v20  ;;  %1228 = vst.msk [vmem:[%s2471_s4 + $0x20] sm:$0xf] %vm1219_vm6, %v1355_v16 }
 0x1d0   :  { %1229 = vst.msk [vmem:[%s2471_s4 + $0x24] sm:$0xf] %vm1219_vm6, %v1356_v34  ;;  %1230 = vst.msk [vmem:[%s2471_s4 + $0x28] sm:$0xf] %vm1219_vm6, %v1357_v35 }
 0x1d1   :  { %1231 = vst.msk [vmem:[%s2471_s4 + $0x2c] sm:$0xf] %vm1219_vm6, %v1358_v33 }
 0x1d2   :  { %1233 = vst.msk [vmem:[%s2471_s4 + $0x30] sm:$0x1] %vm1232_vm7, %v1359_v30 }

// kernel: encoder_forward.3
= control target key start
LH: loop header
LB: loop body
LE: loop exit
PB: predicated region body
PF: predicated region fallthrough
CT: control target
= control target key end

     0   :  { %v5289_v22 = vmov 1966171168   ;;  %v172_v24 = vlaneseq  ;;  %vm2529_vm0 = vcmask 1041408   ;;  %s7268_s1 = inlined_call_operand.vmem [shape: bf16[1024,128], index: 1, kind: input, shape index: {}]   ;;  %s7269_s0 = inlined_call_operand.vmem [shape: bf16[9,2,1024], index: 0, kind: input, shape index: {}]   ;;  %s7270_s2 = inlined_call_operand.vmem [shape: f32[1,128], index: 2, kind: input, shape index: {}]   ;;  %s7271_s3 = inlined_call_operand.vmem [shape: f32[1,128], index: 3, kind: input, shape index: {}]   ;;  %s7272_s4 = inlined_call_operand.vmem [shape: f32[9,128], index: 4, kind: input, shape index: {}]   ;;  %s7273_s5 = inlined_call_operand.<no memory space> [shape: f32[1,1], index: 5, kind: input, shape index: {}]   ;;  %s7274_s8 = inlined_call_operand.vmem [shape: bf16[1024,256], index: 8, kind: input, shape index: {}]   ;;  %s7275_s6 = inlined_call_operand.vmem [shape: f32[1,1024], index: 6, kind: input, shape index: {}]   ;;  %s7276_s7 = inlined_call_operand.vmem [shape: f32[1,1024], index: 7, kind: input, shape index: {}]   ;;  %s7277_s9 = inlined_call_operand.vmem [shape: f32[1,256], index: 9, kind: input, shape index: {}]   ;;  %s7278_s10 = inlined_call_operand.vmem [shape: f32[2,256], index: 10, kind: output, shape index: {}]  }
   0x1   :  { %v5349_v0 = vld [vmem:[%s7268_s1 + $0x40] sm:$0xff]   ;;  %v5372_v4 = vld [vmem:[%s7268_s1 + $0x48] sm:$0xff]   ;;  %v5396_v8 = vld [vmem:[%s7268_s1 + $0x50] sm:$0xff]   ;;  %v170_v23 = vunpack.c.l.s4 %v5289_v22 }
   0x2   :  { %v5354_v1 = vld [vmem:[%s7268_s1 + $0xc0] sm:$0xff]   ;;  %4142 = vmatprep.subr.bf16.mxu0 %v5349_v0  ;;  %v5378_v5 = vld [vmem:[%s7268_s1 + $0xc8] sm:$0xff]   ;;  %v5402_v9 = vld [vmem:[%s7268_s1 + $0xd0] sm:$0xff]   ;;  %v5500_v30 = vshrl.u32 %v172_v24, 7 }
   0x3   :  { %v5360_v2 = vld [vmem:[%s7268_s1] sm:$0xff]   ;;  %4164 = vmatprep.subr.bf16.mxu1 %v5354_v1  ;;  %v5384_v6 = vld [vmem:[%s7268_s1 + $0x8] sm:$0xff]   ;;  %v5408_v10 = vld [vmem:[%s7268_s1 + $0x10] sm:$0xff]   ;;  %v171_v29 = vunpack.c.0.s8 %v170_v23 }
   0x4   :  { %v5366_v3 = vld [vmem:[%s7268_s1 + $0x80] sm:$0xff]   ;;  %4143 = vmatpush3.bf16.msra.mxu0 %v5360_v2  ;;  %v5390_v7 = vld [vmem:[%s7268_s1 + $0x88] sm:$0xff]   ;;  %v5414_v11 = vld [vmem:[%s7268_s1 + $0x90] sm:$0xff]   ;;  %7382 = vst [vmem:[#allocation3_spill] sm:$0xff] %v5500_v30 }
   0x5   :  { %4165 = vmatpush3.bf16.msra.mxu1 %v5366_v3  ;;  %4144 = vmatprep.subr.bf16.mxu0 %v5372_v4  ;;  %v5420_v12 = vld [vmem:[%s7268_s1 + $0x58] sm:$0xff]   ;;  %v5444_v16 = vld [vmem:[%s7268_s1 + $0x60] sm:$0xff]   ;;  %v5468_v20 = vld [vmem:[%s7268_s1 + $0x68] sm:$0xff]   ;;  %v5527_v35 = vsub.s32 %v171_v29, %v5500_v30 }
   0x6   :  { %4166 = vmatprep.subr.bf16.mxu1 %v5378_v5  ;;  %v5426_v13 = vld [vmem:[%s7268_s1 + $0xd8] sm:$0xff]   ;;  %v5450_v17 = vld [vmem:[%s7268_s1 + $0xe0] sm:$0xff]   ;;  %v5474_v21 = vld [vmem:[%s7268_s1 + $0xe8] sm:$0xff]  }
   0x7   :  { %v5432_v14 = vld [vmem:[%s7268_s1 + $0x18] sm:$0xff]   ;;  %v5456_v18 = vld [vmem:[%s7268_s1 + $0x20] sm:$0xff]   ;;  %v5480_v25 = vld [vmem:[%s7268_s1 + $0x28] sm:$0xff]  }
   0x8   :  { %4145 = vmatpush3.bf16.msra.mxu0 %v5384_v6  ;;  %v5438_v15 = vld [vmem:[%s7268_s1 + $0x98] sm:$0xff]   ;;  %v5462_v19 = vld [vmem:[%s7268_s1 + $0xa0] sm:$0xff]   ;;  %v5486_v26 = vld [vmem:[%s7268_s1 + $0xa8] sm:$0xff]  }
   0x9   :  { %4167 = vmatpush3.bf16.msra.mxu1 %v5390_v7  ;;  %4146 = vmatprep.subr.bf16.mxu0 %v5396_v8  ;;  %v5492_v27 = vld [vmem:[%s7268_s1 + $0x70] sm:$0xff]   ;;  %v5518_v33 = vld [vmem:[%s7268_s1 + $0x78] sm:$0xff]   ;;  %v166_v38 = vld [vmem:[%s7269_s0] sm:$0xff] }
   0xa   :  { %4168 = vmatprep.subr.bf16.mxu1 %v5402_v9  ;;  %v5498_v28 = vld [vmem:[%s7268_s1 + $0xf0] sm:$0xff]   ;;  %v5524_v34 = vld [vmem:[%s7268_s1 + $0xf8] sm:$0xff]   ;;  %v168_v39 = vcombine.high %v166_v38, %v166_v38  ;;  %v175_v40 = vrot.slane %v166_v38, %v5527_v35  ;;  %v5550_v41 = vld [vmem:[%s7268_s1 + $0x140] sm:$0xff]  }
   0xb   :  { %v5506_v31 = vld [vmem:[%s7268_s1 + $0x30] sm:$0xff]   ;;  %v5533_v36 = vld [vmem:[%s7268_s1 + $0x38] sm:$0xff]   ;;  %v5555_v42 = vld [vmem:[%s7268_s1 + $0x1c0] sm:$0xff]  }
   0xc   :  { %4147 = vmatpush3.bf16.msra.mxu0 %v5408_v10  ;;  %v5512_v32 = vld [vmem:[%s7268_s1 + $0xb0] sm:$0xff]   ;;  %v5539_v37 = vld [vmem:[%s7268_s1 + $0xb8] sm:$0xff]   ;;  %v183_v43 = vcombine.high %v175_v40, %v175_v40  ;;  %v191_v44 = vrot.slane %v175_v40, %v5527_v35  ;;  %v5560_v45 = vrot.slane %v168_v39, %v5527_v35  ;;  %v5567_v47 = vld [vmem:[%s7268_s1 + $0x100] sm:$0xff]  }
   0xd   :  { %4169 = vmatpush3.bf16.msra.mxu1 %v5414_v11  ;;  %4148 = vmatprep.subr.bf16.mxu0 %v5420_v12  ;;  %v5574_v50 = vld [vmem:[%s7268_s1 + $0x148] sm:$0xff]   ;;  %v5579_v52 = vld [vmem:[%s7268_s1 + $0x180] sm:$0xff]   ;;  %v5597_v57 = vld [vmem:[%s7268_s1 + $0x150] sm:$0xff]  }
   0xe   :  { %4170 = vmatprep.subr.bf16.mxu1 %v5426_v13  ;;  %v205_v46 = vrot.slane %v183_v43, %v5527_v35  ;;  %v184_v48 = vcombine.high %v5560_v45, %v5560_v45  ;;  %v213_v49 = vcombine.high %v191_v44, %v191_v44  ;;  %v5585_v54 = vld [vmem:[%s7268_s1 + $0x1c8] sm:$0xff]   ;;  %v5609_v59 = vld [vmem:[%s7268_s1 + $0x1d0] sm:$0xff]   ;;  %v5621_v61 = vld [vmem:[%s7268_s1 + $0x158] sm:$0xff]  }
   0xf   :  { %v5591_v55 = vld [vmem:[%s7268_s1 + $0x108] sm:$0xff]   ;;  %v5615_v60 = vld [vmem:[%s7268_s1 + $0x110] sm:$0xff]   ;;  %7383 = vst [vmem:[#allocation4_spill] sm:$0xff] %v5621_v61  ;;  %v5633_v63 = vld [vmem:[%s7268_s1 + $0x1d8] sm:$0xff]  }
  0x10   :  { %4149 = vmatpush3.bf16.msra.mxu0 %v5432_v14  ;;  %641 = vmatprep.mubr.bf16.mxu0 %v205_v46  ;;  %v215_v51 = vcombine.high %v205_v46, %v205_v46  ;;  %v212_v53 = vrot.slane %v184_v48, %v5527_v35  ;;  %v5603_v58 = vld [vmem:[%s7268_s1 + $0x188] sm:$0xff]   ;;  %v5627_v62 = vld [vmem:[%s7268_s1 + $0x190] sm:$0xff]   ;;  %7384 = vst [vmem:[#allocation5_spill] sm:$0xff] %v5633_v63  ;;  %v5639_v22 = vld [vmem:[%s7268_s1 + $0x118] sm:$0xff]  }
  0x11   :  { %4171 = vmatpush3.bf16.msra.mxu1 %v5438_v15  ;;  %4150 = vmatprep.subr.bf16.mxu0 %v5444_v16  ;;  %7385 = vst [vmem:[#allocation6_spill] sm:$0xff] %v5639_v22  ;;  %v5645_v23 = vld [vmem:[%s7268_s1 + $0x160] sm:$0xff]   ;;  %v5651_v24 = vld [vmem:[%s7268_s1 + $0x198] sm:$0xff]   ;;  %v5669_v39 = vld [vmem:[%s7268_s1 + $0x168] sm:$0xff]  }
  0x12   :  { %4172 = vmatprep.subr.bf16.mxu1 %v5450_v17  ;;  %681 = vmatprep.mubr.bf16.mxu1 %v215_v51  ;;  %v216_v56 = vcombine.high %v212_v53, %v212_v53  ;;  %7386 = vst [vmem:[#allocation7_spill] sm:$0xff] %v5645_v23  ;;  %7387 = vst [vmem:[#allocation8_spill] sm:$0xff] %v5651_v24  ;;  %v5657_v29 = vld [vmem:[%s7268_s1 + $0x1e0] sm:$0xff]   ;;  %v5681_v43 = vld [vmem:[%s7268_s1 + $0x1e8] sm:$0xff]  }
  0x13   :  { %7388 = vst [vmem:[#allocation9_spill] sm:$0xff] %v5657_v29  ;;  %v5663_v38 = vld [vmem:[%s7268_s1 + $0x120] sm:$0xff]   ;;  %7389 = vst [vmem:[#allocation10_spill] sm:$0xff] %v5669_v39  ;;  %v5693_v46 = vld [vmem:[%s7268_s1 + $0x170] sm:$0xff]  }
  0x14   :  { %4151 = vmatpush3.bf16.msra.mxu0 %v5456_v18  ;;  %v5675_v40 = vld [vmem:[%s7268_s1 + $0x1a0] sm:$0xff]   ;;  %7391 = vst [vmem:[#allocation12_spill] sm:$0xff] %v5681_v43  ;;  %7393 = vst [vmem:[#allocation14_spill] sm:$0xff] %v5693_v46  ;;  %v5699_v48 = vld [vmem:[%s7268_s1 + $0x1a8] sm:$0xff]  }
  0x15   :  { %4173 = vmatpush3.bf16.msra.mxu1 %v5462_v19  ;;  %4152 = vmatprep.subr.bf16.mxu0 %v5468_v20  ;;  %7390 = vst [vmem:[#allocation11_spill] sm:$0xff] %v5675_v40  ;;  %7394 = vst [vmem:[#allocation15_spill] sm:$0xff] %v5699_v48  ;;  %v5711_v51 = vld [vmem:[%s7268_s1 + $0x130] sm:$0xff]   ;;  %v5729_v30 = vld [vmem:[%s7268_s1 + $0x1f8] sm:$0xff]  }
  0x16   :  { %4174 = vmatprep.subr.bf16.mxu1 %v5474_v21  ;;  %7396 = vst [vmem:[#allocation17_spill] sm:$0xff] %v5711_v51 }
  0x18   :  { %4153 = vmatpush3.bf16.msra.mxu0 %v5480_v25 }
  0x19   :  { %4175 = vmatpush3.bf16.msra.mxu1 %v5486_v26  ;;  %4154 = vmatprep.subr.bf16.mxu0 %v5492_v27 }
  0x1a   :  { %4176 = vmatprep.subr.bf16.mxu1 %v5498_v28 }
  0x1c   :  { %4155 = vmatpush3.bf16.msra.mxu0 %v5506_v31 }
  0x1d   :  { %4177 = vmatpush3.bf16.msra.mxu1 %v5512_v32  ;;  %4156 = vmatprep.subr.bf16.mxu0 %v5518_v33 }
  0x1e   :  { %4178 = vmatprep.subr.bf16.mxu1 %v5524_v34 }
  0x20   :  { %4157 = vmatpush3.bf16.msra.mxu0 %v5533_v36 }
  0x21   :  { %4179 = vmatpush3.bf16.msra.mxu1 %v5539_v37  ;;  %4186 = vmatprep.subr.bf16.mxu0 %v5550_v41 }
  0x22   :  { %4208 = vmatprep.subr.bf16.mxu1 %v5555_v42 }
  0x23   :  { %642 = vmatmul.mubr.bf16.vlgmr.msra.gmra.mrb[0].mxu0 %v191_v44  ;;  %v5687_v44 = vld [vmem:[%s7268_s1 + $0x128] sm:$0xff]  }
  0x24   :  { %4187 = vmatpush3.bf16.msra.mxu0 %v5567_v47  ;;  %682 = vmatmul.mubr.bf16.vlgmr.msra.gmra.mrb[0].mxu1 %v213_v49  ;;  %7392 = vst [vmem:[#allocation13_spill] sm:$0xff] %v5687_v44  ;;  %v5705_v49 = vld [vmem:[%s7268_s1 + $0x1f0] sm:$0xff]  }
  0x25   :  { %4188 = vmatprep.subr.bf16.mxu0 %v5574_v50  ;;  %4209 = vmatpush3.bf16.msra.mxu1 %v5579_v52  ;;  %7395 = vst [vmem:[#allocation16_spill] sm:$0xff] %v5705_v49 }
  0x26   :  { %721 = vmatprep.mubr.bf16.mxu0 %v212_v53  ;;  %4210 = vmatprep.subr.bf16.mxu1 %v5585_v54  ;;  %v5717_v53 = vld [vmem:[%s7268_s1 + $0x178] sm:$0xff]  }
  0x27   :  { %761 = vmatprep.mubr.bf16.mxu1 %v216_v56  ;;  %v5723_v56 = vld [vmem:[%s7268_s1 + $0x1b0] sm:$0xff]  }
  0x28   :  { %4189 = vmatpush3.bf16.msra.mxu0 %v5591_v55 }
  0x29   :  { %4190 = vmatprep.subr.bf16.mxu0 %v5597_v57  ;;  %4211 = vmatpush3.bf16.msra.mxu1 %v5603_v58 }
  0x2a   :  { %4212 = vmatprep.subr.bf16.mxu1 %v5609_v59 }
  0x2c   :  { %4191 = vmatpush3.bf16.msra.mxu0 %v5615_v60 }
  0x2d   :  { %4192 = vmatprep.subr.bf16.mxu0 %v5621_v61  ;;  %4213 = vmatpush3.bf16.msra.mxu1 %v5627_v62 }
  0x2e   :  { %4214 = vmatprep.subr.bf16.mxu1 %v5633_v63 }
  0x30   :  { %4193 = vmatpush3.bf16.msra.mxu0 %v5639_v22 }
  0x31   :  { %4194 = vmatprep.subr.bf16.mxu0 %v5645_v23  ;;  %4215 = vmatpush3.bf16.msra.mxu1 %v5651_v24 }
  0x32   :  { %4216 = vmatprep.subr.bf16.mxu1 %v5657_v29 }
  0x34   :  { %4195 = vmatpush3.bf16.msra.mxu0 %v5663_v38 }
  0x35   :  { %4196 = vmatprep.subr.bf16.mxu0 %v5669_v39  ;;  %4217 = vmatpush3.bf16.msra.mxu1 %v5675_v40 }
  0x36   :  { %4218 = vmatprep.subr.bf16.mxu1 %v5681_v43  ;;  %v5748_v43 = vld [vmem:[%s7268_s1 + $0x1b8] sm:$0xff]  }
  0x38   :  { %4197 = vmatpush3.bf16.msra.mxu0 %v5687_v44 }
  0x39   :  { %4198 = vmatprep.subr.bf16.mxu0 %v5693_v46  ;;  %4219 = vmatpush3.bf16.msra.mxu1 %v5699_v48  ;;  %v3993_v46 = vld [vmem:[%s7269_s0 + $0x8] sm:$0xff]  ;;  %v5738_v48 = vld [vmem:[%s7268_s1 + $0x138] sm:$0xff]  }
  0x3a   :  { %4220 = vmatprep.subr.bf16.mxu1 %v5705_v49  ;;  %v779_v44 = vrot.slane %v3993_v46, %v5527_v35  ;;  %v198_v49 = vrot.slane %v5560_v45, %v5527_v35 }
  0x3c   :  { %4199 = vmatpush3.bf16.msra.mxu0 %v5711_v51  ;;  %v787_v51 = vcombine.high %v779_v44, %v779_v44  ;;  %v214_v39 = vcombine.high %v198_v49, %v198_v49 }
  0x3d   :  { %4200 = vmatprep.subr.bf16.mxu0 %v5717_v53  ;;  %4221 = vmatpush3.bf16.msra.mxu1 %v5723_v56 }
  0x3e   :  { %4222 = vmatprep.subr.bf16.mxu1 %v5729_v30  ;;  %v809_v40 = vrot.slane %v787_v51, %v5527_v35 }
  0x40   :  { %4201 = vmatpush3.bf16.msra.mxu0 %v5738_v48  ;;  %v819_v45 = vcombine.high %v809_v40, %v809_v40 }
  0x41   :  { %4230 = vmatprep.subr.bf16.mxu0 %v5349_v0  ;;  %4223 = vmatpush3.bf16.msra.mxu1 %v5748_v43 }
  0x42   :  { %4252 = vmatprep.subr.bf16.mxu1 %v5354_v1 }
  0x43   :  { %722 = vmatmul.mubr.bf16.vlgmr.msra.gmra.mrb[4].mxu0 %v198_v49 }
  0x44   :  { %4231 = vmatpush3.bf16.msra.mxu0 %v5360_v2  ;;  %861 = vmatprep.mubr.bf16.mxu0 %v809_v40 }
  0x45   :  { %762 = vmatmul.mubr.bf16.vlgmr.msra.gmra.mrb[4].mxu1 %v214_v39  ;;  %4232 = vmatprep.subr.bf16.mxu0 %v5372_v4  ;;  %v772_v39 = vcombine.high %v3993_v46, %v3993_v46  ;;  %v795_v46 = vrot.slane %v779_v44, %v5527_v35  ;;  %v3994_v44 = vld [vmem:[%s7269_s0 + $0x10] sm:$0xff] }
  0x46   :  { %4253 = vmatpush3.bf16.msra.mxu1 %v5366_v3  ;;  %901 = vmatprep.mubr.bf16.mxu1 %v819_v45 }
  0x47   :  { %4254 = vmatprep.subr.bf16.mxu1 %v5378_v5  ;;  %v786_v40 = vrot.slane %v772_v39, %v5527_v35  ;;  %v817_v45 = vcombine.high %v795_v46, %v795_v46 }
  0x48   :  { %4233 = vmatpush3.bf16.msra.mxu0 %v5384_v6 }
  0x49   :  { %4234 = vmatprep.subr.bf16.mxu0 %v5396_v8  ;;  %v788_v49 = vcombine.high %v786_v40, %v786_v40 }
  0x4a   :  { %4255 = vmatpush3.bf16.msra.mxu1 %v5390_v7 }
  0x4b   :  { %4256 = vmatprep.subr.bf16.mxu1 %v5402_v9  ;;  %v816_v51 = vrot.slane %v788_v49, %v5527_v35  ;;  %v7397_v49 = vld [vmem:[#allocation10_spill] sm:$0xff] }
  0x4c   :  { %4235 = vmatpush3.bf16.msra.mxu0 %v5408_v10 }
  0x4d   :  { %4236 = vmatprep.subr.bf16.mxu0 %v5420_v12  ;;  %v820_v39 = vcombine.high %v816_v51, %v816_v51 }
  0x4e   :  { %4257 = vmatpush3.bf16.msra.mxu1 %v5414_v11 }
  0x4f   :  { %4258 = vmatprep.subr.bf16.mxu1 %v5426_v13 }
  0x50   :  { %4237 = vmatpush3.bf16.msra.mxu0 %v5432_v14 }
  0x51   :  { %4238 = vmatprep.subr.bf16.mxu0 %v5444_v16 }
  0x52   :  { %4259 = vmatpush3.bf16.msra.mxu1 %v5438_v15 }
  0x53   :  { %4260 = vmatprep.subr.bf16.mxu1 %v5450_v17 }
  0x54   :  { %4239 = vmatpush3.bf16.msra.mxu0 %v5456_v18 }
  0x55   :  { %4240 = vmatprep.subr.bf16.mxu0 %v5468_v20 }
  0x56   :  { %4261 = vmatpush3.bf16.msra.mxu1 %v5462_v19 }
  0x57   :  { %4262 = vmatprep.subr.bf16.mxu1 %v5474_v21 }
  0x58   :  { %4241 = vmatpush3.bf16.msra.mxu0 %v5480_v25 }
  0x59   :  { %4242 = vmatprep.subr.bf16.mxu0 %v5492_v27 }
  0x5a   :  { %4263 = vmatpush3.bf16.msra.mxu1 %v5486_v26 }
  0x5b   :  { %4264 = vmatprep.subr.bf16.mxu1 %v5498_v28 }
  0x5c   :  { %4243 = vmatpush3.bf16.msra.mxu0 %v5506_v31 }
  0x5d   :  { %4244 = vmatprep.subr.bf16.mxu0 %v5518_v33 }
  0x5e   :  { %4265 = vmatpush3.bf16.msra.mxu1 %v5512_v32 }
  0x5f   :  { %4266 = vmatprep.subr.bf16.mxu1 %v5524_v34 }
  0x60   :  { %4245 = vmatpush3.bf16.msra.mxu0 %v5533_v36 }
  0x61   :  { %4274 = vmatprep.subr.bf16.mxu0 %v5550_v41 }
  0x62   :  { %4267 = vmatpush3.bf16.msra.mxu1 %v5539_v37 }
  0x63   :  { %862 = vmatmul.mubr.bf16.vlgmr.msra.gmra.mrb[8].mxu0 %v795_v46  ;;  %4296 = vmatprep.subr.bf16.mxu1 %v5555_v42  ;;  %v7398_v46 = vld [vmem:[#allocation11_spill] sm:$0xff] }
  0x64   :  { %4275 = vmatpush3.bf16.msra.mxu0 %v5567_v47  ;;  %941 = vmatprep.mubr.bf16.mxu0 %v816_v51  ;;  %v999_v51 = vrot.slane %v3994_v44, %v5527_v35 }
  0x65   :  { %902 = vmatmul.mubr.bf16.vlgmr.msra.gmra.mrb[8].mxu1 %v817_v45  ;;  %4276 = vmatprep.subr.bf16.mxu0 %v5574_v50  ;;  %v7399_v45 = vld [vmem:[#allocation12_spill] sm:$0xff] }
  0x66   :  { %4297 = vmatpush3.bf16.msra.mxu1 %v5579_v52  ;;  %981 = vmatprep.mubr.bf16.mxu1 %v820_v39  ;;  %v7400_v39 = vld [vmem:[#allocation13_spill] sm:$0xff] }
  0x67   :  { %4298 = vmatprep.subr.bf16.mxu1 %v5585_v54 }
  0x68   :  { %4277 = vmatpush3.bf16.msra.mxu0 %v5591_v55 }
  0x69   :  { %4278 = vmatprep.subr.bf16.mxu0 %v5597_v57 }
  0x6a   :  { %4299 = vmatpush3.bf16.msra.mxu1 %v5603_v58 }
  0x6b   :  { %4300 = vmatprep.subr.bf16.mxu1 %v5609_v59 }
  0x6c   :  { %4279 = vmatpush3.bf16.msra.mxu0 %v5615_v60 }
  0x6d   :  { %4280 = vmatprep.subr.bf16.mxu0 %v5621_v61 }
  0x6e   :  { %4301 = vmatpush3.bf16.msra.mxu1 %v5627_v62 }
  0x6f   :  { %4302 = vmatprep.subr.bf16.mxu1 %v5633_v63  ;;  %v7404_v63 = vld [vmem:[#allocation17_spill] sm:$0xff] }
  0x70   :  { %4281 = vmatpush3.bf16.msra.mxu0 %v5639_v22  ;;  %v7403_v22 = vld [vmem:[#allocation16_spill] sm:$0xff] }
  0x71   :  { %4282 = vmatprep.subr.bf16.mxu0 %v5645_v23  ;;  %v7401_v23 = vld [vmem:[#allocation14_spill] sm:$0xff] }
  0x72   :  { %4303 = vmatpush3.bf16.msra.mxu1 %v5651_v24  ;;  %v7402_v24 = vld [vmem:[#allocation15_spill] sm:$0xff] }
  0x73   :  { %4304 = vmatprep.subr.bf16.mxu1 %v5657_v29  ;;  %v1007_v29 = vcombine.high %v999_v51, %v999_v51 }
  0x74   :  { %4283 = vmatpush3.bf16.msra.mxu0 %v5663_v38 }
  0x75   :  { %4284 = vmatprep.subr.bf16.mxu0 %v7397_v49  ;;  %v802_v49 = vrot.slane %v786_v40, %v5527_v35  ;;  %v1015_v40 = vrot.slane %v999_v51, %v5527_v35  ;;  %v7405_v51 = vld [vmem:[#allocation5_spill] sm:$0xff] }
  0x76   :  { %4305 = vmatpush3.bf16.msra.mxu1 %v7398_v46  ;;  %v1029_v46 = vrot.slane %v1007_v29, %v5527_v35 }
  0x77   :  { %4306 = vmatprep.subr.bf16.mxu1 %v7399_v45 }
  0x78   :  { %4285 = vmatpush3.bf16.msra.mxu0 %v7400_v39 }
  0x79   :  { %4286 = vmatprep.subr.bf16.mxu0 %v7401_v23  ;;  %v818_v23 = vcombine.high %v802_v49, %v802_v49 }
  0x7a   :  { %4307 = vmatpush3.bf16.msra.mxu1 %v7402_v24 }
  0x7b   :  { %4308 = vmatprep.subr.bf16.mxu1 %v7403_v22  ;;  %v1039_v22 = vcombine.high %v1029_v46, %v1029_v46 }
  0x7c   :  { %4287 = vmatpush3.bf16.msra.mxu0 %v7404_v63 }
  0x7d   :  { %4288 = vmatprep.subr.bf16.mxu0 %v5717_v53 }
  0x7e   :  { %4309 = vmatpush3.bf16.msra.mxu1 %v5723_v56 }
  0x7f   :  { %4310 = vmatprep.subr.bf16.mxu1 %v5729_v30 }
  0x80   :  { %4289 = vmatpush3.bf16.msra.mxu0 %v5738_v48 }
  0x81   :  { %4318 = vmatprep.subr.bf16.mxu0 %v5349_v0 }
  0x82   :  { %4311 = vmatpush3.bf16.msra.mxu1 %v5748_v43 }
  0x83   :  { %942 = vmatmul.mubr.bf16.vlgmr.msra.gmra.mrb[12].mxu0 %v802_v49  ;;  %4340 = vmatprep.subr.bf16.mxu1 %v5354_v1  ;;  %v1037_v49 = vcombine.high %v1015_v40, %v1015_v40 }
  0x84   :  { %4319 = vmatpush3.bf16.msra.mxu0 %v5360_v2  ;;  %1081 = vmatprep.mubr.bf16.mxu0 %v1029_v46 }
  0x85   :  { %982 = vmatmul.mubr.bf16.vlgmr.msra.gmra.mrb[12].mxu1 %v818_v23  ;;  %4320 = vmatprep.subr.bf16.mxu0 %v5372_v4 }
  0x86   :  { %4341 = vmatpush3.bf16.msra.mxu1 %v5366_v3  ;;  %1121 = vmatprep.mubr.bf16.mxu1 %v1039_v22  ;;  %v992_v22 = vcombine.high %v3994_v44, %v3994_v44 }
  0x87   :  { %4342 = vmatprep.subr.bf16.mxu1 %v5378_v5 }
  0x88   :  { %4321 = vmatpush3.bf16.msra.mxu0 %v5384_v6  ;;  %v1006_v23 = vrot.slane %v992_v22, %v5527_v35  ;;  %v7406_v22 = vld [vmem:[#allocation6_spill] sm:$0xff] }
  0x89   :  { %4322 = vmatprep.subr.bf16.mxu0 %v5396_v8 }
  0x8a   :  { %4343 = vmatpush3.bf16.msra.mxu1 %v5390_v7  ;;  %v1008_v29 = vcombine.high %v1006_v23, %v1006_v23 }
  0x8b   :  { %4344 = vmatprep.subr.bf16.mxu1 %v5402_v9 }
  0x8c   :  { %4323 = vmatpush3.bf16.msra.mxu0 %v5408_v10  ;;  %v1036_v44 = vrot.slane %v1008_v29, %v5527_v35  ;;  %v7407_v29 = vld [vmem:[#allocation7_spill] sm:$0xff] }
  0x8d   :  { %4324 = vmatprep.subr.bf16.mxu0 %v5420_v12 }
  0x8e   :  { %4345 = vmatpush3.bf16.msra.mxu1 %v5414_v11  ;;  %v1040_v46 = vcombine.high %v1036_v44, %v1036_v44 }
  0x8f   :  { %4346 = vmatprep.subr.bf16.mxu1 %v5426_v13 }
  0x90   :  { %4325 = vmatpush3.bf16.msra.mxu0 %v5432_v14 }
  0x91   :  { %4326 = vmatprep.subr.bf16.mxu0 %v5444_v16 }
  0x92   :  { %4347 = vmatpush3.bf16.msra.mxu1 %v5438_v15 }
  0x93   :  { %4348 = vmatprep.subr.bf16.mxu1 %v5450_v17 }
  0x94   :  { %4327 = vmatpush3.bf16.msra.mxu0 %v5456_v18 }
  0x95   :  { %4328 = vmatprep.subr.bf16.mxu0 %v5468_v20 }
  0x96   :  { %4349 = vmatpush3.bf16.msra.mxu1 %v5462_v19 }
  0x97   :  { %4350 = vmatprep.subr.bf16.mxu1 %v5474_v21 }
  0x98   :  { %4329 = vmatpush3.bf16.msra.mxu0 %v5480_v25 }
  0x99   :  { %4330 = vmatprep.subr.bf16.mxu0 %v5492_v27 }
  0x9a   :  { %4351 = vmatpush3.bf16.msra.mxu1 %v5486_v26 }
  0x9b   :  { %4352 = vmatprep.subr.bf16.mxu1 %v5498_v28 }
  0x9c   :  { %4331 = vmatpush3.bf16.msra.mxu0 %v5506_v31 }
  0x9d   :  { %4332 = vmatprep.subr.bf16.mxu0 %v5518_v33 }
  0x9e   :  { %4353 = vmatpush3.bf16.msra.mxu1 %v5512_v32 }
  0x9f   :  { %4354 = vmatprep.subr.bf16.mxu1 %v5524_v34 }
  0xa0   :  { %4333 = vmatpush3.bf16.msra.mxu0 %v5533_v36 }
  0xa1   :  { %4362 = vmatprep.subr.bf16.mxu0 %v5550_v41 }
  0xa2   :  { %4355 = vmatpush3.bf16.msra.mxu1 %v5539_v37 }
  0xa3   :  { %1082 = vmatmul.mubr.bf16.vlgmr.msra.gmra.mrb[16].mxu0 %v1015_v40  ;;  %4384 = vmatprep.subr.bf16.mxu1 %v5555_v42  ;;  %v7408_v40 = vld [vmem:[#allocation8_spill] sm:$0xff] }
  0xa4   :  { %4363 = vmatpush3.bf16.msra.mxu0 %v5567_v47  ;;  %1161 = vmatprep.mubr.bf16.mxu0 %v1036_v44  ;;  %v7409_v44 = vld [vmem:[#allocation9_spill] sm:$0xff] }
  0xa5   :  { %1122 = vmatmul.mubr.bf16.vlgmr.msra.gmra.mrb[16].mxu1 %v1037_v49  ;;  %4364 = vmatprep.subr.bf16.mxu0 %v5574_v50  ;;  %v3995_v49 = vld [vmem:[%s7269_s0 + $0x18] sm:$0xff] }
  0xa6   :  { %4385 = vmatpush3.bf16.msra.mxu1 %v5579_v52  ;;  %1201 = vmatprep.mubr.bf16.mxu1 %v1040_v46  ;;  %v7410_v46 = vld [vmem:[#allocation10_spill] sm:$0xff] }
  0xa7   :  { %4386 = vmatprep.subr.bf16.mxu1 %v5585_v54 }
  0xa8   :  { %4365 = vmatpush3.bf16.msra.mxu0 %v5591_v55 }
  0xa9   :  { %4366 = vmatprep.subr.bf16.mxu0 %v5597_v57 }
  0xaa   :  { %4387 = vmatpush3.bf16.msra.mxu1 %v5603_v58 }
  0xab   :  { %4388 = vmatprep.subr.bf16.mxu1 %v5609_v59 }
  0xac   :  { %4367 = vmatpush3.bf16.msra.mxu0 %v5615_v60 }
  0xad   :  { %4368 = vmatprep.subr.bf16.mxu0 %v5621_v61  ;;  %v7411_v61 = vld [vmem:[#allocation11_spill] sm:$0xff] }
  0xae   :  { %4389 = vmatpush3.bf16.msra.mxu1 %v5627_v62 }
  0xaf   :  { %4390 = vmatprep.subr.bf16.mxu1 %v7405_v51  ;;  %v1219_v51 = vrot.slane %v3995_v49, %v5527_v35 }
  0xb0   :  { %4369 = vmatpush3.bf16.msra.mxu0 %v7406_v22 }
  0xb1   :  { %4370 = vmatprep.subr.bf16.mxu0 %v7407_v29  ;;  %v7412_v29 = vld [vmem:[#allocation14_spill] sm:$0xff] }
  0xb2   :  { %4391 = vmatpush3.bf16.msra.mxu1 %v7408_v40  ;;  %v7413_v40 = vld [vmem:[#allocation16_spill] sm:$0xff] }
  0xb3   :  { %4392 = vmatprep.subr.bf16.mxu1 %v7409_v44  ;;  %v1227_v44 = vcombine.high %v1219_v51, %v1219_v51 }
  0xb4   :  { %4371 = vmatpush3.bf16.msra.mxu0 %v5663_v38 }
  0xb5   :  { %4372 = vmatprep.subr.bf16.mxu0 %v7410_v46  ;;  %v1022_v46 = vrot.slane %v1006_v23, %v5527_v35 }
  0xb6   :  { %4393 = vmatpush3.bf16.msra.mxu1 %v7411_v61  ;;  %v1249_v61 = vrot.slane %v1227_v44, %v5527_v35 }
  0xb7   :  { %4394 = vmatprep.subr.bf16.mxu1 %v7399_v45 }
  0xb8   :  { %4373 = vmatpush3.bf16.msra.mxu0 %v7400_v39 }
  0xb9   :  { %4374 = vmatprep.subr.bf16.mxu0 %v7412_v29  ;;  %v1038_v29 = vcombine.high %v1022_v46, %v1022_v46 }
  0xba   :  { %4395 = vmatpush3.bf16.msra.mxu1 %v7402_v24 }
  0xbb   :  { %4396 = vmatprep.subr.bf16.mxu1 %v7413_v40  ;;  %v1259_v40 = vcombine.high %v1249_v61, %v1249_v61 }
  0xbc   :  { %4375 = vmatpush3.bf16.msra.mxu0 %v7404_v63 }
  0xbd   :  { %4376 = vmatprep.subr.bf16.mxu0 %v5717_v53 }
  0xbe   :  { %4397 = vmatpush3.bf16.msra.mxu1 %v5723_v56 }
  0xbf   :  { %4398 = vmatprep.subr.bf16.mxu1 %v5729_v30 }
  0xc0   :  { %4377 = vmatpush3.bf16.msra.mxu0 %v5738_v48 }
  0xc1   :  { %4406 = vmatprep.subr.bf16.mxu0 %v5349_v0  ;;  %v1212_v0 = vcombine.high %v3995_v49, %v3995_v49 }
  0xc2   :  { %4399 = vmatpush3.bf16.msra.mxu1 %v5748_v43 }
  0xc3   :  { %1162 = vmatmul.mubr.bf16.vlgmr.msra.gmra.mrb[20].mxu0 %v1022_v46  ;;  %4428 = vmatprep.subr.bf16.mxu1 %v5354_v1  ;;  %v5922_v1 = vrot.slane %v1212_v0, %v5527_v35  ;;  %v7421_v46 = vld [vmem:[#allocation14_spill] sm:$0xff] }
  0xc4   :  { %4407 = vmatpush3.bf16.msra.mxu0 %v5360_v2  ;;  %1301 = vmatprep.mubr.bf16.mxu0 %v1249_v61 }
  0xc5   :  { %1202 = vmatmul.mubr.bf16.vlgmr.msra.gmra.mrb[20].mxu1 %v1038_v29  ;;  %4408 = vmatprep.subr.bf16.mxu0 %v5372_v4  ;;  %v1228_v2 = vcombine.high %v5922_v1, %v5922_v1 }
  0xc6   :  { %4429 = vmatpush3.bf16.msra.mxu1 %v5366_v3  ;;  %1341 = vmatprep.mubr.bf16.mxu1 %v1259_v40  ;;  %v1235_v3 = vrot.slane %v1219_v51, %v5527_v35 }
  0xc7   :  { %4430 = vmatprep.subr.bf16.mxu1 %v5378_v5  ;;  %v1256_v4 = vrot.slane %v1228_v2, %v5527_v35 }
  0xc8   :  { %4409 = vmatpush3.bf16.msra.mxu0 %v5384_v6  ;;  %v1257_v5 = vcombine.high %v1235_v3, %v1235_v3 }
  0xc9   :  { %4410 = vmatprep.subr.bf16.mxu0 %v5396_v8  ;;  %v1260_v6 = vcombine.high %v1256_v4, %v1256_v4  ;;  %v7415_v8 = vld [vmem:[#allocation5_spill] sm:$0xff] }
  0xca   :  { %4431 = vmatpush3.bf16.msra.mxu1 %v5390_v7  ;;  %v7414_v7 = vld [vmem:[#allocation4_spill] sm:$0xff] }
  0xcb   :  { %4432 = vmatprep.subr.bf16.mxu1 %v5402_v9  ;;  %v7416_v9 = vld [vmem:[#allocation7_spill] sm:$0xff] }
  0xcc   :  { %4411 = vmatpush3.bf16.msra.mxu0 %v5408_v10  ;;  %v7417_v10 = vld [vmem:[#allocation8_spill] sm:$0xff] }
  0xcd   :  { %4412 = vmatprep.subr.bf16.mxu0 %v5420_v12  ;;  %v5960_v12 = vld [vmem:[%s7269_s0 + $0x20] sm:$0xff] }
  0xce   :  { %4433 = vmatpush3.bf16.msra.mxu1 %v5414_v11  ;;  %v7418_v11 = vld [vmem:[#allocation9_spill] sm:$0xff]  ;;  %v5967_v61 = vrot.slane %v5960_v12, %v5527_v35 }
  0xcf   :  { %4434 = vmatprep.subr.bf16.mxu1 %v5426_v13  ;;  %v7419_v13 = vld [vmem:[#allocation10_spill] sm:$0xff] }
  0xd0   :  { %4413 = vmatpush3.bf16.msra.mxu0 %v5432_v14  ;;  %v7420_v14 = vld [vmem:[#allocation11_spill] sm:$0xff] }
  0xd1   :  { %4414 = vmatprep.subr.bf16.mxu0 %v5444_v16 }
  0xd2   :  { %4435 = vmatpush3.bf16.msra.mxu1 %v5438_v15 }
  0xd3   :  { %4436 = vmatprep.subr.bf16.mxu1 %v5450_v17 }
  0xd4   :  { %4415 = vmatpush3.bf16.msra.mxu0 %v5456_v18 }
  0xd5   :  { %4416 = vmatprep.subr.bf16.mxu0 %v5468_v20 }
  0xd6   :  { %4437 = vmatpush3.bf16.msra.mxu1 %v5462_v19 }
  0xd7   :  { %4438 = vmatprep.subr.bf16.mxu1 %v5474_v21 }
  0xd8   :  { %4417 = vmatpush3.bf16.msra.mxu0 %v5480_v25 }
  0xd9   :  { %4418 = vmatprep.subr.bf16.mxu0 %v5492_v27 }
  0xda   :  { %4439 = vmatpush3.bf16.msra.mxu1 %v5486_v26 }
  0xdb   :  { %4440 = vmatprep.subr.bf16.mxu1 %v5498_v28 }
  0xdc   :  { %4419 = vmatpush3.bf16.msra.mxu0 %v5506_v31 }
  0xdd   :  { %4420 = vmatprep.subr.bf16.mxu0 %v5518_v33 }
  0xde   :  { %4441 = vmatpush3.bf16.msra.mxu1 %v5512_v32 }
  0xdf   :  { %4442 = vmatprep.subr.bf16.mxu1 %v5524_v34 }
  0xe0   :  { %4421 = vmatpush3.bf16.msra.mxu0 %v5533_v36 }
  0xe1   :  { %4450 = vmatprep.subr.bf16.mxu0 %v5550_v41 }
  0xe2   :  { %4443 = vmatpush3.bf16.msra.mxu1 %v5539_v37 }
  0xe3   :  { %1302 = vmatmul.mubr.bf16.vlgmr.msra.gmra.mrb[24].mxu0 %v1235_v3  ;;  %4472 = vmatprep.subr.bf16.mxu1 %v5555_v42  ;;  %v1447_v3 = vcombine.high %v5967_v61, %v5967_v61 }
  0xe4   :  { %4451 = vmatpush3.bf16.msra.mxu0 %v5567_v47  ;;  %1381 = vmatprep.mubr.bf16.mxu0 %v1256_v4 }
  0xe5   :  { %1342 = vmatmul.mubr.bf16.vlgmr.msra.gmra.mrb[24].mxu1 %v1257_v5  ;;  %4452 = vmatprep.subr.bf16.mxu0 %v5574_v50  ;;  %v7422_v5 = vld [vmem:[#allocation16_spill] sm:$0xff] }
  0xe6   :  { %4473 = vmatpush3.bf16.msra.mxu1 %v5579_v52  ;;  %1421 = vmatprep.mubr.bf16.mxu1 %v1260_v6 }
  0xe7   :  { %4474 = vmatprep.subr.bf16.mxu1 %v5585_v54 }
  0xe8   :  { %4453 = vmatpush3.bf16.msra.mxu0 %v5591_v55 }
  0xe9   :  { %4454 = vmatprep.subr.bf16.mxu0 %v5597_v57 }
  0xea   :  { %4475 = vmatpush3.bf16.msra.mxu1 %v5603_v58 }
  0xeb   :  { %4476 = vmatprep.subr.bf16.mxu1 %v5609_v59 }
  0xec   :  { %4455 = vmatpush3.bf16.msra.mxu0 %v5615_v60 }
  0xed   :  { %4456 = vmatprep.subr.bf16.mxu0 %v7414_v7 }
  0xee   :  { %4477 = vmatpush3.bf16.msra.mxu1 %v5627_v62 }
  0xef   :  { %4478 = vmatprep.subr.bf16.mxu1 %v7415_v8 }
  0xf0   :  { %4457 = vmatpush3.bf16.msra.mxu0 %v7406_v22 }
  0xf1   :  { %4458 = vmatprep.subr.bf16.mxu0 %v7416_v9 }
  0xf2   :  { %4479 = vmatpush3.bf16.msra.mxu1 %v7417_v10 }
  0xf3   :  { %4480 = vmatprep.subr.bf16.mxu1 %v7418_v11 }
  0xf4   :  { %4459 = vmatpush3.bf16.msra.mxu0 %v5663_v38 }
  0xf5   :  { %4460 = vmatprep.subr.bf16.mxu0 %v7419_v13 }
  0xf6   :  { %4481 = vmatpush3.bf16.msra.mxu1 %v7420_v14  ;;  %v4158_v15 = vpop.f32.mrb[0].mxu0 }
  0xf7   :  { %v4159_v23 = vpop.f32.mrb[1].mxu0  ;;  %4482 = vmatprep.subr.bf16.mxu1 %v7399_v45  ;;  %v4180_v51 = vpop.f32.mrb[0].mxu1 }
  0xf8   :  { %v4160_v29 = vadd.f32 %v4159_v23, %v4158_v15  ;;  %v4161_v40 = vpop.f32.mrb[2].mxu0  ;;  %4461 = vmatpush3.bf16.msra.mxu0 %v7400_v39  ;;  %v4181_v44 = vpop.f32.mrb[1].mxu1  ;;  %v1242_v15 = vrot.slane %v5922_v1, %v5527_v35  ;;  %v1469_v23 = vrot.slane %v1447_v3, %v5527_v35  ;;  %v5996_v1 = vld [vmem:[%s7268_s1 + $0xc0] sm:$0xff]   ;;  %v6026_v3 = vld [vmem:[%s7268_s1 + $0x8] sm:$0xff]  }
  0xf9   :  { %v4162_v49 = vpop.f32.mrb[3].mxu0  ;;  %4462 = vmatprep.subr.bf16.mxu0 %v7421_v46  ;;  %v4182_v0 = vadd.f32 %v4181_v44, %v4180_v51  ;;  %v4183_v2 = vpop.f32.mrb[2].mxu1  ;;  %v6002_v44 = vld [vmem:[%s7268_s1] sm:$0xff]   ;;  %7424 = vst [vmem:[#allocation13_spill] sm:$0xff] %v6026_v3 }
  0xfa   :  { %4483 = vmatpush3.bf16.msra.mxu1 %v7402_v24  ;;  %v4184_v4 = vpop.f32.mrb[3].mxu1  ;;  %v1258_v51 = vcombine.high %v1242_v15, %v1242_v15  ;;  %v1479_v40 = vcombine.high %v1469_v23, %v1469_v23  ;;  %v6008_v49 = vld [vmem:[%s7268_s1 + $0x48] sm:$0xff]  }
  0xfb   :  { %4484 = vmatprep.subr.bf16.mxu1 %v7422_v5  ;;  %v5976_v6 = vadd.f32 %v4182_v0, %v4160_v29  ;;  %v5989_v29 = vld [vmem:[%s7268_s1 + $0x40] sm:$0xff]   ;;  %v6020_v2 = vld [vmem:[%s7268_s1 + $0xc8] sm:$0xff]   ;;  %v6032_v4 = vld [vmem:[%s7268_s1 + $0x50] sm:$0xff]  }
  0xfc   :  { %4463 = vmatpush3.bf16.msra.mxu0 %v7404_v63  ;;  %v6014_v0 = vld [vmem:[%s7268_s1 + $0x80] sm:$0xff]   ;;  %7423 = vst [vmem:[#allocation12_spill] sm:$0xff] %v6020_v2  ;;  %7425 = vst [vmem:[#allocation15_spill] sm:$0xff] %v6032_v4 }
  0xfd   :  { %4464 = vmatprep.subr.bf16.mxu0 %v5717_v53 }
  0xfe   :  { %4485 = vmatpush3.bf16.msra.mxu1 %v5723_v56 }
  0xff   :  { %4486 = vmatprep.subr.bf16.mxu1 %v5729_v30 }
 0x100   :  { %4465 = vmatpush3.bf16.msra.mxu0 %v5738_v48 }
 0x101   :  { %4494 = vmatprep.subr.bf16.mxu0 %v5989_v29 }
 0x102   :  { %4487 = vmatpush3.bf16.msra.mxu1 %v5748_v43 }
 0x103   :  { %1382 = vmatmul.mubr.bf16.vlgmr.msra.gmra.mrb[28].mxu0 %v1242_v15  ;;  %4516 = vmatprep.subr.bf16.mxu1 %v5996_v1  ;;  %v6038_v15 = vld [vmem:[%s7268_s1 + $0x88] sm:$0xff]  }
 0x104   :  { %4495 = vmatpush3.bf16.msra.mxu0 %v6002_v44  ;;  %1521 = vmatprep.mubr.bf16.mxu0 %v1469_v23  ;;  %7426 = vst [vmem:[#allocation17_spill] sm:$0xff] %v6038_v15  ;;  %v6044_v23 = vld [vmem:[%s7268_s1 + $0xd0] sm:$0xff]  }
 0x105   :  { %1422 = vmatmul.mubr.bf16.vlgmr.msra.gmra.mrb[28].mxu1 %v1258_v51  ;;  %4496 = vmatprep.subr.bf16.mxu0 %v6008_v49  ;;  %7427 = vst [vmem:[#allocation6_spill] sm:$0xff] %v6044_v23  ;;  %v6050_v51 = vld [vmem:[%s7268_s1 + $0x10] sm:$0xff]  }
 0x106   :  { %4517 = vmatpush3.bf16.msra.mxu1 %v6014_v0  ;;  %1561 = vmatprep.mubr.bf16.mxu1 %v1479_v40  ;;  %7428 = vst [vmem:[#allocation4_spill] sm:$0xff] %v6050_v51  ;;  %v6056_v40 = vld [vmem:[%s7268_s1 + $0x58] sm:$0xff]  }
 0x107   :  { %4518 = vmatprep.subr.bf16.mxu1 %v6020_v2  ;;  %7429 = vst [vmem:[#allocation5_spill] sm:$0xff] %v6056_v40 }
 0x108   :  { %4497 = vmatpush3.bf16.msra.mxu0 %v6026_v3 }
 0x109   :  { %4498 = vmatprep.subr.bf16.mxu0 %v6032_v4 }
 0x10a   :  { %4519 = vmatpush3.bf16.msra.mxu1 %v6038_v15  ;;  %v6062_v15 = vld [vmem:[%s7268_s1 + $0x90] sm:$0xff]  }
 0x10b   :  { %4520 = vmatprep.subr.bf16.mxu1 %v6044_v23  ;;  %7430 = vst [vmem:[#allocation7_spill] sm:$0xff] %v6062_v15  ;;  %v6068_v23 = vld [vmem:[%s7268_s1 + $0xd8] sm:$0xff]  }
 0x10c   :  { %4499 = vmatpush3.bf16.msra.mxu0 %v6050_v51  ;;  %7431 = vst [vmem:[#allocation8_spill] sm:$0xff] %v6068_v23  ;;  %v6074_v51 = vld [vmem:[%s7268_s1 + $0x18] sm:$0xff]  }
 0x10d   :  { %4500 = vmatprep.subr.bf16.mxu0 %v6056_v40  ;;  %7432 = vst [vmem:[#allocation9_spill] sm:$0xff] %v6074_v51  ;;  %v1432_v40 = vcombine.high %v5960_v12, %v5960_v12 }
 0x10e   :  { %4521 = vmatpush3.bf16.msra.mxu1 %v6062_v15  ;;  %v6081_v15 = vld [vmem:[%s7268_s1 + $0x98] sm:$0xff]  }
 0x10f   :  { %4522 = vmatprep.subr.bf16.mxu1 %v6068_v23  ;;  %7433 = vst [vmem:[#allocation10_spill] sm:$0xff] %v6081_v15 }
 0x110   :  { %4501 = vmatpush3.bf16.msra.mxu0 %v6074_v51 }
 0x111   :  { %4502 = vmatprep.subr.bf16.mxu0 %v5444_v16  ;;  %v6091_v16 = vrot.slane %v1432_v40, %v5527_v35 }
 0x112   :  { %4523 = vmatpush3.bf16.msra.mxu1 %v6081_v15 }
 0x113   :  { %4524 = vmatprep.subr.bf16.mxu1 %v5450_v17  ;;  %v1448_v40 = vcombine.high %v6091_v16, %v6091_v16 }
 0x114   :  { %4503 = vmatpush3.bf16.msra.mxu0 %v5456_v18 }
 0x115   :  { %4504 = vmatprep.subr.bf16.mxu0 %v5468_v20 }
 0x116   :  { %4525 = vmatpush3.bf16.msra.mxu1 %v5462_v19  ;;  %v4202_v51 = vpop.f32.mrb[4].mxu0 }
 0x117   :  { %v4203_v23 = vpop.f32.mrb[5].mxu0  ;;  %4526 = vmatprep.subr.bf16.mxu1 %v5474_v21 }
 0x118   :  { %v4224_v4 = vpop.f32.mrb[4].mxu1  ;;  %v4204_v15 = vadd.f32 %v4203_v23, %v4202_v51  ;;  %v4205_v3 = vpop.f32.mrb[6].mxu0  ;;  %4505 = vmatpush3.bf16.msra.mxu0 %v5480_v25  ;;  %v1455_v25 = vrot.slane %v5967_v61, %v5527_v35  ;;  %v7443_v61 = vld [vmem:[#allocation8_spill] sm:$0xff]  ;;  %v6191_v23 = vld [vmem:[%s7268_s1 + $0x20] sm:$0xff]  }
 0x119   :  { %v4225_v12 = vpop.f32.mrb[5].mxu1  ;;  %v4206_v17 = vpop.f32.mrb[7].mxu0  ;;  %4506 = vmatprep.subr.bf16.mxu0 %v5492_v27  ;;  %v1476_v27 = vrot.slane %v1448_v40, %v5527_v35  ;;  %v7446_v3 = vld [vmem:[#allocation10_spill] sm:$0xff]  ;;  %v6197_v51 = vld [vmem:[%s7268_s1 + $0x68] sm:$0xff]  }
 0x11a   :  { %v724_v18 = vadd.f32 %v4204_v15, %v5976_v6  ;;  %v4226_v20 = vadd.f32 %v4225_v12, %v4224_v4  ;;  %v4227_v19 = vpop.f32.mrb[6].mxu1  ;;  %4527 = vmatpush3.bf16.msra.mxu1 %v5486_v26  ;;  %v1477_v26 = vcombine.high %v1455_v25, %v1455_v25  ;;  %v7444_v6 = vld [vmem:[#allocation9_spill] sm:$0xff]  ;;  %v6185_v15 = vld [vmem:[%s7268_s1 + $0xe0] sm:$0xff]  }
 0x11b   :  { %v4228_v2 = vpop.f32.mrb[7].mxu1  ;;  %4528 = vmatprep.subr.bf16.mxu1 %v5498_v28  ;;  %v1480_v28 = vcombine.high %v1476_v27, %v1476_v27  ;;  %7447 = vst [vmem:[#allocation16_spill] sm:$0xff] %v6185_v15 }
 0x11c   :  { %v6101_v21 = vadd.f32 %v4226_v20, %v724_v18  ;;  %4507 = vmatpush3.bf16.msra.mxu0 %v5506_v31  ;;  %v6133_v31 = vld [vmem:[%s7269_s0 + $0x28] sm:$0xff]  ;;  %v6176_v2 = vld [vmem:[%s7268_s1 + $0x60] sm:$0xff]  }
 0x11d   :  { %4508 = vmatprep.subr.bf16.mxu0 %v5518_v33  ;;  %v6140_v33 = vrot.slane %v6133_v31, %v5527_v35  ;;  %7445 = vst [vmem:[#allocation14_spill] sm:$0xff] %v6176_v2  ;;  %v1652_v4 = vcombine.high %v6133_v31, %v6133_v31  ;;  %v6212_v20 = vld [vmem:[%s7268_s1 + $0xe8] sm:$0xff]   ;;  %v6224_v31 = vld [vmem:[%s7268_s1 + $0x70] sm:$0xff]  }
 0x11e   :  { %7434 = vst [vmem:[#allocation11_spill] sm:$0xff] %v6101_v21  ;;  %4529 = vmatpush3.bf16.msra.mxu1 %v5512_v32  ;;  %v6381_v21 = vld [vmem:[%s7268_s1 + $0x198] sm:$0xff]  }
 0x11f   :  { %4530 = vmatprep.subr.bf16.mxu1 %v5524_v34  ;;  %v6207_v17 = vrot.slane %v1652_v4, %v5527_v35  ;;  %v6285_v4 = vld [vmem:[%s7268_s1 + $0xb8] sm:$0xff]   ;;  %7463 = vst [vmem:[#allocation25_spill] sm:$0xff] %v6381_v21 }
 0x120   :  { %4509 = vmatpush3.bf16.msra.mxu0 %v5533_v36 }
 0x121   :  { %4538 = vmatprep.subr.bf16.mxu0 %v5550_v41 }
 0x122   :  { %4531 = vmatpush3.bf16.msra.mxu1 %v5539_v37 }
 0x123   :  { %1522 = vmatmul.mubr.bf16.vlgmr.msra.gmra.mrb[32].mxu0 %v1455_v25  ;;  %4560 = vmatprep.subr.bf16.mxu1 %v5555_v42 }
 0x124   :  { %4539 = vmatpush3.bf16.msra.mxu0 %v5567_v47  ;;  %1601 = vmatprep.mubr.bf16.mxu0 %v1476_v27  ;;  %v6218_v27 = vld [vmem:[%s7268_s1 + $0x28] sm:$0xff]  }
 0x125   :  { %1562 = vmatmul.mubr.bf16.vlgmr.msra.gmra.mrb[32].mxu1 %v1477_v26  ;;  %4540 = vmatprep.subr.bf16.mxu0 %v5574_v50 }
 0x126   :  { %4561 = vmatpush3.bf16.msra.mxu1 %v5579_v52  ;;  %1641 = vmatprep.mubr.bf16.mxu1 %v1480_v28 }
 0x127   :  { %4562 = vmatprep.subr.bf16.mxu1 %v5585_v54  ;;  %v1667_v54 = vcombine.high %v6140_v33, %v6140_v33 }
 0x128   :  { %4541 = vmatpush3.bf16.msra.mxu0 %v5591_v55 }
 0x129   :  { %4542 = vmatprep.subr.bf16.mxu0 %v5597_v57 }
 0x12a   :  { %4563 = vmatpush3.bf16.msra.mxu1 %v5603_v58  ;;  %v1462_v58 = vrot.slane %v6091_v16, %v5527_v35  ;;  %v6203_v16 = vld [vmem:[%s7268_s1 + $0xa0] sm:$0xff]  }
 0x12b   :  { %4564 = vmatprep.subr.bf16.mxu1 %v5609_v59  ;;  %v1689_v59 = vrot.slane %v1667_v54, %v5527_v35  ;;  %v6252_v54 = vld [vmem:[%s7268_s1 + $0x78] sm:$0xff]  }
 0x12c   :  { %4543 = vmatpush3.bf16.msra.mxu0 %v5615_v60  ;;  %v1478_v60 = vcombine.high %v1462_v58, %v1462_v58 }
 0x12d   :  { %4544 = vmatprep.subr.bf16.mxu0 %v7414_v7  ;;  %v7437_v7 = vld [vmem:[#allocation15_spill] sm:$0xff] }
 0x12e   :  { %4565 = vmatpush3.bf16.msra.mxu1 %v5627_v62  ;;  %v1699_v62 = vcombine.high %v1689_v59, %v1689_v59  ;;  %7450 = vst [vmem:[#allocation15_spill] sm:$0xff] %v6203_v16 }
 0x12f   :  { %4566 = vmatprep.subr.bf16.mxu1 %v7415_v8  ;;  %v7438_v8 = vld [vmem:[#allocation17_spill] sm:$0xff] }
 0x130   :  { %4545 = vmatpush3.bf16.msra.mxu0 %v7406_v22  ;;  %v7436_v22 = vld [vmem:[#allocation13_spill] sm:$0xff]  ;;  %7451 = vst [vmem:[#allocation17_spill] sm:$0xff] %v6212_v20 }
 0x131   :  { %4546 = vmatprep.subr.bf16.mxu0 %v7416_v9  ;;  %v7439_v9 = vld [vmem:[#allocation6_spill] sm:$0xff]  ;;  %7449 = vst [vmem:[#allocation13_spill] sm:$0xff] %v6197_v51 }
 0x132   :  { %4567 = vmatpush3.bf16.msra.mxu1 %v7417_v10  ;;  %v7440_v10 = vld [vmem:[#allocation4_spill] sm:$0xff] }
 0x133   :  { %4568 = vmatprep.subr.bf16.mxu1 %v7418_v11  ;;  %v7441_v11 = vld [vmem:[#allocation5_spill] sm:$0xff] }
 0x134   :  { %4547 = vmatpush3.bf16.msra.mxu0 %v5663_v38  ;;  %v7435_v38 = vld [vmem:[#allocation12_spill] sm:$0xff] }
 0x135   :  { %4548 = vmatprep.subr.bf16.mxu0 %v7419_v13  ;;  %v7442_v13 = vld [vmem:[#allocation7_spill] sm:$0xff]  ;;  %7448 = vst [vmem:[#allocation12_spill] sm:$0xff] %v6191_v23 }
 0x136   :  { %4569 = vmatpush3.bf16.msra.mxu1 %v7420_v14  ;;  %v4246_v32 = vpop.f32.mrb[8].mxu0 }
 0x137   :  { %v4247_v34 = vpop.f32.mrb[9].mxu0  ;;  %4570 = vmatprep.subr.bf16.mxu1 %v7399_v45 }
 0x138   :  { %v4268_v36 = vpop.f32.mrb[8].mxu1  ;;  %v4248_v37 = vadd.f32 %v4247_v34, %v4246_v32  ;;  %v4249_v41 = vpop.f32.mrb[10].mxu0  ;;  %4549 = vmatpush3.bf16.msra.mxu0 %v7400_v39 }
 0x139   :  { %v4269_v42 = vpop.f32.mrb[9].mxu1  ;;  %v4250_v47 = vpop.f32.mrb[11].mxu0  ;;  %4550 = vmatprep.subr.bf16.mxu0 %v7421_v46  ;;  %v1668_v41 = vcombine.high %v6207_v17, %v6207_v17 }
 0x13a   :  { %v4270_v50 = vadd.f32 %v4269_v42, %v4268_v36  ;;  %v4271_v52 = vpop.f32.mrb[10].mxu1  ;;  %4571 = vmatpush3.bf16.msra.mxu1 %v7402_v24  ;;  %v6238_v47 = vld [vmem:[%s7268_s1 + $0xf0] sm:$0xff]  }
 0x13b   :  { %v4272_v55 = vpop.f32.mrb[11].mxu1  ;;  %4572 = vmatprep.subr.bf16.mxu1 %v7422_v5  ;;  %v6246_v52 = vld [vmem:[%s7268_s1 + $0x30] sm:$0xff]  }
 0x13c   :  { %v904_v57 = vadd.f32 %v4270_v50, %v4248_v37  ;;  %4551 = vmatpush3.bf16.msra.mxu0 %v7404_v63  ;;  %v6230_v37 = vld [vmem:[%s7268_s1 + $0xa8] sm:$0xff]   ;;  %v1675_v55 = vrot.slane %v6140_v33, %v5527_v35  ;;  %v6273_v33 = vld [vmem:[%s7268_s1 + $0x38] sm:$0xff]  }
 0x13d   :  { %4552 = vmatprep.subr.bf16.mxu0 %v5717_v53 }
 0x13e   :  { %4573 = vmatpush3.bf16.msra.mxu1 %v5723_v56 }
 0x13f   :  { %4574 = vmatprep.subr.bf16.mxu1 %v5729_v30 }
 0x140   :  { %4553 = vmatpush3.bf16.msra.mxu0 %v5738_v48 }
 0x141   :  { %4582 = vmatprep.subr.bf16.mxu0 %v5989_v29 }
 0x142   :  { %4575 = vmatpush3.bf16.msra.mxu1 %v5748_v43 }
 0x143   :  { %1602 = vmatmul.mubr.bf16.vlgmr.msra.gmra.mrb[36].mxu0 %v1462_v58  ;;  %4604 = vmatprep.subr.bf16.mxu1 %v5996_v1  ;;  %v1696_v58 = vrot.slane %v1668_v41, %v5527_v35  ;;  %v6345_v41 = vld [vmem:[%s7268_s1 + $0x110] sm:$0xff]  }
 0x144   :  { %4583 = vmatpush3.bf16.msra.mxu0 %v6002_v44  ;;  %1741 = vmatprep.mubr.bf16.mxu0 %v1689_v59  ;;  %v6267_v59 = vld [vmem:[%s7268_s1 + $0xf8] sm:$0xff]   ;;  %7457 = vst [vmem:[#allocation19_spill] sm:$0xff] %v6345_v41 }
 0x145   :  { %1642 = vmatmul.mubr.bf16.vlgmr.msra.gmra.mrb[36].mxu1 %v1478_v60  ;;  %4584 = vmatprep.subr.bf16.mxu0 %v6008_v49  ;;  %v1697_v60 = vcombine.high %v1675_v55, %v1675_v55 }
 0x146   :  { %4605 = vmatpush3.bf16.msra.mxu1 %v6014_v0  ;;  %1781 = vmatprep.mubr.bf16.mxu1 %v1699_v62  ;;  %v6279_v62 = vld [vmem:[%s7268_s1 + $0x140] sm:$0xff]  }
 0x147   :  { %4606 = vmatprep.subr.bf16.mxu1 %v7435_v38 }
 0x148   :  { %4585 = vmatpush3.bf16.msra.mxu0 %v7436_v22 }
 0x149   :  { %4586 = vmatprep.subr.bf16.mxu0 %v7437_v7 }
 0x14a   :  { %4607 = vmatpush3.bf16.msra.mxu1 %v7438_v8 }
 0x14b   :  { %4608 = vmatprep.subr.bf16.mxu1 %v7439_v9 }
 0x14c   :  { %4587 = vmatpush3.bf16.msra.mxu0 %v7440_v10 }
 0x14d   :  { %4588 = vmatprep.subr.bf16.mxu0 %v7441_v11 }
 0x14e   :  { %4609 = vmatpush3.bf16.msra.mxu1 %v7442_v13 }
 0x14f   :  { %4610 = vmatprep.subr.bf16.mxu1 %v7443_v61 }
 0x150   :  { %4589 = vmatpush3.bf16.msra.mxu0 %v7444_v6 }
 0x151   :  { %4590 = vmatprep.subr.bf16.mxu0 %v6176_v2 }
 0x152   :  { %4611 = vmatpush3.bf16.msra.mxu1 %v7446_v3 }
 0x153   :  { %4612 = vmatprep.subr.bf16.mxu1 %v6185_v15 }
 0x154   :  { %4591 = vmatpush3.bf16.msra.mxu0 %v6191_v23 }
 0x155   :  { %4592 = vmatprep.subr.bf16.mxu0 %v6197_v51 }
 0x156   :  { %4613 = vmatpush3.bf16.msra.mxu1 %v6203_v16  ;;  %v4290_v12 = vpop.f32.mrb[12].mxu0 }
 0x157   :  { %v4291_v18 = vpop.f32.mrb[13].mxu0  ;;  %4614 = vmatprep.subr.bf16.mxu1 %v6212_v20 }
 0x158   :  { %v4312_v19 = vpop.f32.mrb[12].mxu1  ;;  %v4292_v40 = vadd.f32 %v4291_v18, %v4290_v12  ;;  %v4293_v25 = vpop.f32.mrb[14].mxu0  ;;  %4593 = vmatpush3.bf16.msra.mxu0 %v6218_v27  ;;  %v1700_v12 = vcombine.high %v1696_v58, %v1696_v58  ;;  %v6291_v18 = vld [vmem:[%s7268_s1 + $0x1c0] sm:$0xff]  }
 0x159   :  { %v4313_v26 = vpop.f32.mrb[13].mxu1  ;;  %v4294_v28 = vpop.f32.mrb[15].mxu0  ;;  %4594 = vmatprep.subr.bf16.mxu0 %v6224_v31  ;;  %v6309_v25 = vld [vmem:[%s7268_s1 + $0x180] sm:$0xff]  }
 0x15a   :  { %v944_v32 = vadd.f32 %v4292_v40, %v904_v57  ;;  %v4314_v34 = vadd.f32 %v4313_v26, %v4312_v19  ;;  %v4315_v36 = vpop.f32.mrb[14].mxu1  ;;  %4615 = vmatpush3.bf16.msra.mxu1 %v6230_v37  ;;  %v6260_v57 = vld [vmem:[%s7268_s1 + $0xb0] sm:$0xff]   ;;  %v6297_v19 = vld [vmem:[%s7268_s1 + $0x100] sm:$0xff]   ;;  %v6303_v40 = vld [vmem:[%s7268_s1 + $0x148] sm:$0xff]  }
 0x15b   :  { %v4316_v42 = vpop.f32.mrb[15].mxu1  ;;  %4616 = vmatprep.subr.bf16.mxu1 %v6238_v47  ;;  %v6315_v26 = vld [vmem:[%s7268_s1 + $0x1c8] sm:$0xff]   ;;  %v6339_v36 = vld [vmem:[%s7268_s1 + $0x1d0] sm:$0xff]  }
 0x15c   :  { %v6241_v50 = vadd.f32 %v4314_v34, %v944_v32  ;;  %4595 = vmatpush3.bf16.msra.mxu0 %v6246_v52  ;;  %v6321_v28 = vld [vmem:[%s7268_s1 + $0x108] sm:$0xff]   ;;  %v6327_v32 = vld [vmem:[%s7268_s1 + $0x150] sm:$0xff]   ;;  %7456 = vst [vmem:[#allocation18_spill] sm:$0xff] %v6339_v36  ;;  %v6351_v42 = vld [vmem:[%s7268_s1 + $0x158] sm:$0xff]  }
 0x15d   :  { %4596 = vmatprep.subr.bf16.mxu0 %v6252_v54  ;;  %7453 = vst [vmem:[#allocation4_spill] sm:$0xff] %v6321_v28  ;;  %7454 = vst [vmem:[#allocation5_spill] sm:$0xff] %v6327_v32  ;;  %v6333_v34 = vld [vmem:[%s7268_s1 + $0x188] sm:$0xff]  }
 0x15e   :  { %7452 = vst [vmem:[#allocation6_spill] sm:$0xff] %v6241_v50  ;;  %4617 = vmatpush3.bf16.msra.mxu1 %v6260_v57  ;;  %7455 = vst [vmem:[#allocation7_spill] sm:$0xff] %v6333_v34  ;;  %v6387_v50 = vld [vmem:[%s7268_s1 + $0x1e0] sm:$0xff]  }
 0x15f   :  { %4618 = vmatprep.subr.bf16.mxu1 %v6267_v59  ;;  %7458 = vst [vmem:[#allocation20_spill] sm:$0xff] %v6351_v42  ;;  %7464 = vst [vmem:[#allocation26_spill] sm:$0xff] %v6387_v50 }
 0x160   :  { %4597 = vmatpush3.bf16.msra.mxu0 %v6273_v33 }
 0x161   :  { %4626 = vmatprep.subr.bf16.mxu0 %v6279_v62 }
 0x162   :  { %4619 = vmatpush3.bf16.msra.mxu1 %v6285_v4 }
 0x163   :  { %1742 = vmatmul.mubr.bf16.vlgmr.msra.gmra.mrb[40].mxu0 %v1675_v55  ;;  %4648 = vmatprep.subr.bf16.mxu1 %v6291_v18  ;;  %v6357_v55 = vld [vmem:[%s7268_s1 + $0x190] sm:$0xff]  }
 0x164   :  { %4627 = vmatpush3.bf16.msra.mxu0 %v6297_v19  ;;  %1821 = vmatprep.mubr.bf16.mxu0 %v1696_v58  ;;  %7459 = vst [vmem:[#allocation21_spill] sm:$0xff] %v6357_v55  ;;  %v6363_v58 = vld [vmem:[%s7268_s1 + $0x1d8] sm:$0xff]  }
 0x165   :  { %1782 = vmatmul.mubr.bf16.vlgmr.msra.gmra.mrb[40].mxu1 %v1697_v60  ;;  %4628 = vmatprep.subr.bf16.mxu0 %v6303_v40  ;;  %7460 = vst [vmem:[#allocation22_spill] sm:$0xff] %v6363_v58  ;;  %v6369_v60 = vld [vmem:[%s7268_s1 + $0x118] sm:$0xff]  }
 0x166   :  { %4649 = vmatpush3.bf16.msra.mxu1 %v6309_v25  ;;  %1861 = vmatprep.mubr.bf16.mxu1 %v1700_v12  ;;  %7461 = vst [vmem:[#allocation23_spill] sm:$0xff] %v6369_v60  ;;  %v6375_v12 = vld [vmem:[%s7268_s1 + $0x160] sm:$0xff]  }
 0x167   :  { %4650 = vmatprep.subr.bf16.mxu1 %v6315_v26  ;;  %7462 = vst [vmem:[#allocation24_spill] sm:$0xff] %v6375_v12 }
 0x168   :  { %4629 = vmatpush3.bf16.msra.mxu0 %v6321_v28 }
 0x169   :  { %4630 = vmatprep.subr.bf16.mxu0 %v6327_v32 }
 0x16a   :  { %4651 = vmatpush3.bf16.msra.mxu1 %v6333_v34 }
 0x16b   :  { %4652 = vmatprep.subr.bf16.mxu1 %v6339_v36 }
 0x16c   :  { %4631 = vmatpush3.bf16.msra.mxu0 %v6345_v41 }
 0x16d   :  { %4632 = vmatprep.subr.bf16.mxu0 %v6351_v42 }
 0x16e   :  { %4653 = vmatpush3.bf16.msra.mxu1 %v6357_v55 }
 0x16f   :  { %4654 = vmatprep.subr.bf16.mxu1 %v6363_v58 }
 0x170   :  { %4633 = vmatpush3.bf16.msra.mxu0 %v6369_v60  ;;  %v3998_v60 = vld [vmem:[%s7269_s0 + $0x30] sm:$0xff] }
 0x171   :  { %4634 = vmatprep.subr.bf16.mxu0 %v6375_v12  ;;  %v6396_v12 = vld [vmem:[%s7268_s1 + $0x120] sm:$0xff]   ;;  %v6407_v58 = vrot.slane %v3998_v60, %v5527_v35 }
 0x172   :  { %4655 = vmatpush3.bf16.msra.mxu1 %v6381_v21  ;;  %7465 = vst [vmem:[#allocation27_spill] sm:$0xff] %v6396_v12  ;;  %v6402_v21 = vld [vmem:[%s7268_s1 + $0x168] sm:$0xff]  }
 0x173   :  { %4656 = vmatprep.subr.bf16.mxu1 %v6387_v50  ;;  %7466 = vst [vmem:[#allocation28_spill] sm:$0xff] %v6402_v21 }
 0x174   :  { %4635 = vmatpush3.bf16.msra.mxu0 %v6396_v12 }
 0x175   :  { %4636 = vmatprep.subr.bf16.mxu0 %v6402_v21 }
 0x176   :  { %4657 = vmatpush3.bf16.msra.mxu1 %v7420_v14  ;;  %v4334_v50 = vpop.f32.mrb[16].mxu0  ;;  %v1887_v14 = vcombine.high %v6407_v58, %v6407_v58 }
 0x177   :  { %v4335_v55 = vpop.f32.mrb[17].mxu0  ;;  %4658 = vmatprep.subr.bf16.mxu1 %v7399_v45 }
 0x178   :  { %v4356_v42 = vpop.f32.mrb[16].mxu1  ;;  %v4336_v41 = vadd.f32 %v4335_v55, %v4334_v50  ;;  %v4337_v36 = vpop.f32.mrb[18].mxu0  ;;  %4637 = vmatpush3.bf16.msra.mxu0 %v7400_v39  ;;  %v1682_v39 = vrot.slane %v6207_v17, %v5527_v35  ;;  %v1895_v55 = vrot.slane %v6407_v58, %v5527_v35  ;;  %v7468_v58 = vld [vmem:[#allocation4_spill] sm:$0xff] }
 0x179   :  { %v4357_v12 = vpop.f32.mrb[17].mxu1  ;;  %v4338_v34 = vpop.f32.mrb[19].mxu0  ;;  %4638 = vmatprep.subr.bf16.mxu0 %v7421_v46  ;;  %v1909_v46 = vrot.slane %v1887_v14, %v5527_v35 }
 0x17a   :  { %v4358_v32 = vadd.f32 %v4357_v12, %v4356_v42  ;;  %v4359_v21 = vpop.f32.mrb[18].mxu1  ;;  %4659 = vmatpush3.bf16.msra.mxu1 %v7402_v24  ;;  %v1698_v24 = vcombine.high %v1682_v39, %v1682_v39  ;;  %v1917_v12 = vcombine.high %v1895_v55, %v1895_v55 }
 0x17b   :  { %v4360_v28 = vpop.f32.mrb[19].mxu1  ;;  %4660 = vmatprep.subr.bf16.mxu1 %v7422_v5  ;;  %v1919_v5 = vcombine.high %v1909_v46, %v1909_v46 }
 0x17c   :  { %v1124_v45 = vadd.f32 %v4358_v32, %v4336_v41  ;;  %4639 = vmatpush3.bf16.msra.mxu0 %v7404_v63 }
 0x17d   :  { %4640 = vmatprep.subr.bf16.mxu0 %v5717_v53 }
 0x17e   :  { %4661 = vmatpush3.bf16.msra.mxu1 %v5723_v56 }
 0x17f   :  { %4662 = vmatprep.subr.bf16.mxu1 %v5729_v30  ;;  %v1872_v30 = vcombine.high %v3998_v60, %v3998_v60 }
 0x180   :  { %4641 = vmatpush3.bf16.msra.mxu0 %v5738_v48 }
 0x181   :  { %4670 = vmatprep.subr.bf16.mxu0 %v5989_v29 }
 0x182   :  { %4663 = vmatpush3.bf16.msra.mxu1 %v5748_v43  ;;  %v6447_v43 = vrot.slane %v1872_v30, %v5527_v35  ;;  %v7474_v30 = vld [vmem:[#allocation21_spill] sm:$0xff] }
 0x183   :  { %1822 = vmatmul.mubr.bf16.vlgmr.msra.gmra.mrb[44].mxu0 %v1682_v39  ;;  %4692 = vmatprep.subr.bf16.mxu1 %v5996_v1  ;;  %v7470_v39 = vld [vmem:[#allocation7_spill] sm:$0xff] }
 0x184   :  { %4671 = vmatpush3.bf16.msra.mxu0 %v6002_v44  ;;  %1961 = vmatprep.mubr.bf16.mxu0 %v1909_v46  ;;  %v1888_v36 = vcombine.high %v6447_v43, %v6447_v43  ;;  %v7471_v46 = vld [vmem:[#allocation18_spill] sm:$0xff] }
 0x185   :  { %1862 = vmatmul.mubr.bf16.vlgmr.msra.gmra.mrb[44].mxu1 %v1698_v24  ;;  %4672 = vmatprep.subr.bf16.mxu0 %v6008_v49  ;;  %v7472_v24 = vld [vmem:[#allocation19_spill] sm:$0xff] }
 0x186   :  { %4693 = vmatpush3.bf16.msra.mxu1 %v6014_v0  ;;  %2001 = vmatprep.mubr.bf16.mxu1 %v1919_v5  ;;  %v1916_v60 = vrot.slane %v1888_v36, %v5527_v35  ;;  %v7473_v5 = vld [vmem:[#allocation20_spill] sm:$0xff] }
 0x187   :  { %4694 = vmatprep.subr.bf16.mxu1 %v7435_v38 }
 0x188   :  { %4673 = vmatpush3.bf16.msra.mxu0 %v7436_v22  ;;  %v1920_v14 = vcombine.high %v1916_v60, %v1916_v60 }
 0x189   :  { %4674 = vmatprep.subr.bf16.mxu0 %v7437_v7 }
 0x18a   :  { %4695 = vmatpush3.bf16.msra.mxu1 %v7438_v8 }
 0x18b   :  { %4696 = vmatprep.subr.bf16.mxu1 %v7439_v9 }
 0x18c   :  { %4675 = vmatpush3.bf16.msra.mxu0 %v7440_v10 }
 0x18d   :  { %4676 = vmatprep.subr.bf16.mxu0 %v7441_v11 }
 0x18e   :  { %4697 = vmatpush3.bf16.msra.mxu1 %v7442_v13 }
 0x18f   :  { %4698 = vmatprep.subr.bf16.mxu1 %v7443_v61 }
 0x190   :  { %4677 = vmatpush3.bf16.msra.mxu0 %v7444_v6 }
 0x191   :  { %4678 = vmatprep.subr.bf16.mxu0 %v6176_v2 }
 0x192   :  { %4699 = vmatpush3.bf16.msra.mxu1 %v7446_v3 }
 0x193   :  { %4700 = vmatprep.subr.bf16.mxu1 %v6185_v15 }
 0x194   :  { %4679 = vmatpush3.bf16.msra.mxu0 %v6191_v23 }
 0x195   :  { %4680 = vmatprep.subr.bf16.mxu0 %v6197_v51 }
 0x196   :  { %4701 = vmatpush3.bf16.msra.mxu1 %v6203_v16  ;;  %v4378_v63 = vpop.f32.mrb[20].mxu0 }
 0x197   :  { %v4379_v48 = vpop.f32.mrb[21].mxu0  ;;  %4702 = vmatprep.subr.bf16.mxu1 %v6212_v20 }
 0x198   :  { %v4400_v53 = vpop.f32.mrb[20].mxu1  ;;  %v4380_v56 = vadd.f32 %v4379_v48, %v4378_v63  ;;  %v4381_v21 = vpop.f32.mrb[22].mxu0  ;;  %4681 = vmatpush3.bf16.msra.mxu0 %v6218_v27  ;;  %v7475_v63 = vld [vmem:[#allocation22_spill] sm:$0xff]  ;;  %v7476_v48 = vld [vmem:[#allocation23_spill] sm:$0xff] }
 0x199   :  { %v4401_v17 = vpop.f32.mrb[21].mxu1  ;;  %v4382_v50 = vpop.f32.mrb[23].mxu0  ;;  %4682 = vmatprep.subr.bf16.mxu0 %v6224_v31  ;;  %v7479_v21 = vld [vmem:[#allocation26_spill] sm:$0xff] }
 0x19a   :  { %v1164_v28 = vadd.f32 %v4380_v56, %v1124_v45  ;;  %v4402_v32 = vadd.f32 %v4401_v17, %v4400_v53  ;;  %v4403_v34 = vpop.f32.mrb[22].mxu1  ;;  %4703 = vmatpush3.bf16.msra.mxu1 %v6230_v37  ;;  %v7469_v45 = vld [vmem:[#allocation5_spill] sm:$0xff]  ;;  %v7477_v53 = vld [vmem:[#allocation24_spill] sm:$0xff]  ;;  %v7480_v50 = vld [vmem:[#allocation27_spill] sm:$0xff] }
 0x19b   :  { %v4404_v41 = vpop.f32.mrb[23].mxu1  ;;  %4704 = vmatprep.subr.bf16.mxu1 %v6238_v47  ;;  %v7478_v56 = vld [vmem:[#allocation25_spill] sm:$0xff] }
 0x19c   :  { %v6456_v42 = vadd.f32 %v4402_v32, %v1164_v28  ;;  %4683 = vmatpush3.bf16.msra.mxu0 %v6246_v52  ;;  %v6488_v17 = vld [vmem:[%s7269_s0 + $0x38] sm:$0xff]  ;;  %v7481_v28 = vld [vmem:[#allocation28_spill] sm:$0xff]  ;;  %v6495_v32 = vld [vmem:[%s7268_s1 + $0x1a0] sm:$0xff]  }
 0x19d   :  { %4684 = vmatprep.subr.bf16.mxu0 %v6252_v54  ;;  %7482 = vst [vmem:[#allocation4_spill] sm:$0xff] %v6495_v32  ;;  %v6500_v36 = vrot.slane %v6488_v17, %v5527_v35 }
 0x19e   :  { %7467 = vst [vmem:[#allocation29_spill] sm:$0xff] %v6456_v42  ;;  %4705 = vmatpush3.bf16.msra.mxu1 %v6260_v57  ;;  %v6511_v42 = vld [vmem:[%s7268_s1 + $0x128] sm:$0xff]  }
 0x19f   :  { %4706 = vmatprep.subr.bf16.mxu1 %v6267_v59 }
 0x1a0   :  { %4685 = vmatpush3.bf16.msra.mxu0 %v6273_v33 }
 0x1a1   :  { %4714 = vmatprep.subr.bf16.mxu0 %v6279_v62 }
 0x1a2   :  { %4707 = vmatpush3.bf16.msra.mxu1 %v6285_v4 }
 0x1a3   :  { %1962 = vmatmul.mubr.bf16.vlgmr.msra.gmra.mrb[48].mxu0 %v1895_v55  ;;  %4736 = vmatprep.subr.bf16.mxu1 %v6291_v18  ;;  %v6505_v55 = vld [vmem:[%s7268_s1 + $0x1e8] sm:$0xff]  }
 0x1a4   :  { %4715 = vmatpush3.bf16.msra.mxu0 %v6297_v19  ;;  %2041 = vmatprep.mubr.bf16.mxu0 %v1916_v60  ;;  %7483 = vst [vmem:[#allocation5_spill] sm:$0xff] %v6505_v55 }
 0x1a5   :  { %2002 = vmatmul.mubr.bf16.vlgmr.msra.gmra.mrb[48].mxu1 %v1917_v12  ;;  %4716 = vmatprep.subr.bf16.mxu0 %v6303_v40 }
 0x1a6   :  { %4737 = vmatpush3.bf16.msra.mxu1 %v6309_v25  ;;  %2081 = vmatprep.mubr.bf16.mxu1 %v1920_v14 }
 0x1a7   :  { %4738 = vmatprep.subr.bf16.mxu1 %v6315_v26 }
 0x1a8   :  { %4717 = vmatpush3.bf16.msra.mxu0 %v7468_v58 }
 0x1a9   :  { %4718 = vmatprep.subr.bf16.mxu0 %v7469_v45 }
 0x1aa   :  { %4739 = vmatpush3.bf16.msra.mxu1 %v7470_v39 }
 0x1ab   :  { %4740 = vmatprep.subr.bf16.mxu1 %v7471_v46 }
 0x1ac   :  { %4719 = vmatpush3.bf16.msra.mxu0 %v7472_v24 }
 0x1ad   :  { %4720 = vmatprep.subr.bf16.mxu0 %v7473_v5 }
 0x1ae   :  { %4741 = vmatpush3.bf16.msra.mxu1 %v7474_v30 }
 0x1af   :  { %4742 = vmatprep.subr.bf16.mxu1 %v7475_v63 }
 0x1b0   :  { %4721 = vmatpush3.bf16.msra.mxu0 %v7476_v48 }
 0x1b1   :  { %4722 = vmatprep.subr.bf16.mxu0 %v7477_v53 }
 0x1b2   :  { %4743 = vmatpush3.bf16.msra.mxu1 %v7478_v56 }
 0x1b3   :  { %4744 = vmatprep.subr.bf16.mxu1 %v7479_v21 }
 0x1b4   :  { %4723 = vmatpush3.bf16.msra.mxu0 %v7480_v50  ;;  %v6517_v50 = vld [vmem:[%s7268_s1 + $0x170] sm:$0xff]  }
 0x1b5   :  { %4724 = vmatprep.subr.bf16.mxu0 %v7481_v28 }
 0x1b6   :  { %4745 = vmatpush3.bf16.msra.mxu1 %v6495_v32  ;;  %v4422_v34 = vpop.f32.mrb[24].mxu0 }
 0x1b7   :  { %v4423_v41 = vpop.f32.mrb[25].mxu0  ;;  %4746 = vmatprep.subr.bf16.mxu1 %v6505_v55 }
 0x1b8   :  { %v4444_v60 = vpop.f32.mrb[24].mxu1  ;;  %v4424_v12 = vadd.f32 %v4423_v41, %v4422_v34  ;;  %v4425_v14 = vpop.f32.mrb[26].mxu0  ;;  %4725 = vmatpush3.bf16.msra.mxu0 %v6511_v42  ;;  %v6523_v34 = vld [vmem:[%s7268_s1 + $0x1a8] sm:$0xff]   ;;  %v2107_v41 = vcombine.high %v6500_v36, %v6500_v36 }
 0x1b9   :  { %v4445_v32 = vpop.f32.mrb[25].mxu1  ;;  %v4426_v28 = vpop.f32.mrb[27].mxu0  ;;  %4726 = vmatprep.subr.bf16.mxu0 %v6517_v50  ;;  %v6531_v14 = vld [vmem:[%s7268_s1 + $0x1f0] sm:$0xff]  }
 0x1ba   :  { %v4446_v55 = vadd.f32 %v4445_v32, %v4444_v60  ;;  %v4447_v21 = vpop.f32.mrb[26].mxu1  ;;  %4747 = vmatpush3.bf16.msra.mxu1 %v6523_v34  ;;  %v6543_v60 = vld [vmem:[%s7268_s1 + $0x178] sm:$0xff]  }
 0x1bb   :  { %v4448_v28 = vpop.f32.mrb[27].mxu1  ;;  %4748 = vmatprep.subr.bf16.mxu1 %v6531_v14  ;;  %v6537_v21 = vld [vmem:[%s7268_s1 + $0x130] sm:$0xff]   ;;  %7485 = vst [vmem:[#allocation18_spill] sm:$0xff] %v6543_v60 }
 0x1bc   :  { %v1344_v32 = vadd.f32 %v4446_v55, %v4424_v12  ;;  %7484 = vst [vmem:[#allocation7_spill] sm:$0xff] %v6537_v21  ;;  %4727 = vmatpush3.bf16.msra.mxu0 %v6537_v21  ;;  %v1902_v28 = vrot.slane %v6447_v43, %v5527_v35  ;;  %v6551_v55 = vld [vmem:[%s7268_s1 + $0x1b0] sm:$0xff]   ;;  %v2129_v12 = vrot.slane %v2107_v41, %v5527_v35  ;;  %v6558_v21 = vld [vmem:[%s7268_s1 + $0x1f8] sm:$0xff]  }
 0x1bd   :  { %4728 = vmatprep.subr.bf16.mxu0 %v6543_v60  ;;  %7486 = vst [vmem:[#allocation19_spill] sm:$0xff] %v6551_v55  ;;  %v6564_v43 = vld [vmem:[%s7268_s1 + $0x138] sm:$0xff]  }
 0x1be   :  { %4749 = vmatpush3.bf16.msra.mxu1 %v6551_v55  ;;  %v1918_v60 = vcombine.high %v1902_v28, %v1902_v28  ;;  %v6571_v41 = vld [vmem:[%s7268_s1 + $0x1b8] sm:$0xff]   ;;  %v2139_v55 = vcombine.high %v2129_v12, %v2129_v12 }
 0x1bf   :  { %4750 = vmatprep.subr.bf16.mxu1 %v6558_v21 }
 0x1c0   :  { %4729 = vmatpush3.bf16.msra.mxu0 %v6564_v43 }
 0x1c1   :  { %4758 = vmatprep.subr.bf16.mxu0 %v5989_v29 }
 0x1c2   :  { %4751 = vmatpush3.bf16.msra.mxu1 %v6571_v41 }
 0x1c3   :  { %2042 = vmatmul.mubr.bf16.vlgmr.msra.gmra.mrb[52].mxu0 %v1902_v28  ;;  %4780 = vmatprep.subr.bf16.mxu1 %v5996_v1 }
 0x1c4   :  { %4759 = vmatpush3.bf16.msra.mxu0 %v6002_v44  ;;  %2181 = vmatprep.mubr.bf16.mxu0 %v2129_v12 }
 0x1c5   :  { %2082 = vmatmul.mubr.bf16.vlgmr.msra.gmra.mrb[52].mxu1 %v1918_v60  ;;  %4760 = vmatprep.subr.bf16.mxu0 %v6008_v49  ;;  %v2092_v60 = vcombine.high %v6488_v17, %v6488_v17 }
 0x1c6   :  { %4781 = vmatpush3.bf16.msra.mxu1 %v6014_v0  ;;  %2221 = vmatprep.mubr.bf16.mxu1 %v2139_v55 }
 0x1c7   :  { %4782 = vmatprep.subr.bf16.mxu1 %v7435_v38  ;;  %v6597_v55 = vrot.slane %v2092_v60, %v5527_v35 }
 0x1c8   :  { %4761 = vmatpush3.bf16.msra.mxu0 %v7436_v22 }
 0x1c9   :  { %4762 = vmatprep.subr.bf16.mxu0 %v7437_v7  ;;  %v2108_v60 = vcombine.high %v6597_v55, %v6597_v55 }
 0x1ca   :  { %4783 = vmatpush3.bf16.msra.mxu1 %v7438_v8 }
 0x1cb   :  { %4784 = vmatprep.subr.bf16.mxu1 %v7439_v9 }
 0x1cc   :  { %4763 = vmatpush3.bf16.msra.mxu0 %v7440_v10 }
 0x1cd   :  { %4764 = vmatprep.subr.bf16.mxu0 %v7441_v11 }
 0x1ce   :  { %4785 = vmatpush3.bf16.msra.mxu1 %v7442_v13 }
 0x1cf   :  { %4786 = vmatprep.subr.bf16.mxu1 %v7443_v61 }
 0x1d0   :  { %4765 = vmatpush3.bf16.msra.mxu0 %v7444_v6 }
 0x1d1   :  { %4766 = vmatprep.subr.bf16.mxu0 %v6176_v2 }
 0x1d2   :  { %4787 = vmatpush3.bf16.msra.mxu1 %v7446_v3 }
 0x1d3   :  { %4788 = vmatprep.subr.bf16.mxu1 %v6185_v15 }
 0x1d4   :  { %4767 = vmatpush3.bf16.msra.mxu0 %v6191_v23 }
 0x1d5   :  { %4768 = vmatprep.subr.bf16.mxu0 %v6197_v51 }
 0x1d6   :  { %4789 = vmatpush3.bf16.msra.mxu1 %v6203_v16  ;;  %v4466_v28 = vpop.f32.mrb[28].mxu0 }
 0x1d7   :  { %v4467_v12 = vpop.f32.mrb[29].mxu0  ;;  %4790 = vmatprep.subr.bf16.mxu1 %v6212_v20 }
 0x1d8   :  { %v4488_v2 = vpop.f32.mrb[28].mxu1  ;;  %v4468_v3 = vadd.f32 %v4467_v12, %v4466_v28  ;;  %v4469_v6 = vpop.f32.mrb[30].mxu0  ;;  %4769 = vmatpush3.bf16.msra.mxu0 %v6218_v27 }
 0x1d9   :  { %v4489_v17 = vpop.f32.mrb[29].mxu1  ;;  %v4470_v15 = vpop.f32.mrb[31].mxu0  ;;  %4770 = vmatprep.subr.bf16.mxu0 %v6224_v31  ;;  %v2115_v6 = vrot.slane %v6500_v36, %v5527_v35  ;;  %v7491_v36 = vld [vmem:[#allocation4_spill] sm:$0xff] }
 0x1da   :  { %v1384_v23 = vadd.f32 %v4468_v3, %v1344_v32  ;;  %v4490_v51 = vadd.f32 %v4489_v17, %v4488_v2  ;;  %v4491_v61 = vpop.f32.mrb[30].mxu1  ;;  %4791 = vmatpush3.bf16.msra.mxu1 %v6230_v37  ;;  %v7488_v15 = vld [vmem:[#allocation26_spill] sm:$0xff]  ;;  %v7492_v17 = vld [vmem:[#allocation5_spill] sm:$0xff] }
 0x1db   :  { %v4492_v16 = vpop.f32.mrb[31].mxu1  ;;  %4792 = vmatprep.subr.bf16.mxu1 %v6238_v47  ;;  %v2136_v61 = vrot.slane %v2108_v60, %v5527_v35  ;;  %v2137_v2 = vcombine.high %v2115_v6, %v2115_v6 }
 0x1dc   :  { %v6606_v20 = vadd.f32 %v4490_v51, %v1384_v23  ;;  %4771 = vmatpush3.bf16.msra.mxu0 %v6246_v52  ;;  %v4000_v23 = vld [vmem:[%s7269_s0 + $0x40] sm:$0xff]  ;;  %v7490_v16 = vld [vmem:[#allocation28_spill] sm:$0xff] }
 0x1dd   :  { %4772 = vmatprep.subr.bf16.mxu0 %v6252_v54  ;;  %v2140_v3 = vcombine.high %v2136_v61, %v2136_v61  ;;  %v7489_v51 = vld [vmem:[#allocation27_spill] sm:$0xff]  ;;  %v6642_v28 = vrot.slane %v4000_v23, %v5527_v35 }
 0x1de   :  { %7487 = vst [vmem:[#allocation20_spill] sm:$0xff] %v6606_v20  ;;  %4793 = vmatpush3.bf16.msra.mxu1 %v6260_v57 }
 0x1df   :  { %4794 = vmatprep.subr.bf16.mxu1 %v6267_v59 }
 0x1e0   :  { %4773 = vmatpush3.bf16.msra.mxu0 %v6273_v33 }
 0x1e1   :  { %4802 = vmatprep.subr.bf16.mxu0 %v6279_v62 }
 0x1e2   :  { %4795 = vmatpush3.bf16.msra.mxu1 %v6285_v4 }
 0x1e3   :  { %2182 = vmatmul.mubr.bf16.vlgmr.msra.gmra.mrb[56].mxu0 %v2115_v6  ;;  %4824 = vmatprep.subr.bf16.mxu1 %v6291_v18 }
 0x1e4   :  { %4803 = vmatpush3.bf16.msra.mxu0 %v6297_v19  ;;  %2261 = vmatprep.mubr.bf16.mxu0 %v2136_v61 }
 0x1e5   :  { %2222 = vmatmul.mubr.bf16.vlgmr.msra.gmra.mrb[56].mxu1 %v2137_v2  ;;  %4804 = vmatprep.subr.bf16.mxu0 %v6303_v40 }
 0x1e6   :  { %4825 = vmatpush3.bf16.msra.mxu1 %v6309_v25  ;;  %2301 = vmatprep.mubr.bf16.mxu1 %v2140_v3 }
 0x1e7   :  { %4826 = vmatprep.subr.bf16.mxu1 %v6315_v26 }
 0x1e8   :  { %4805 = vmatpush3.bf16.msra.mxu0 %v7468_v58 }
 0x1e9   :  { %4806 = vmatprep.subr.bf16.mxu0 %v7469_v45 }
 0x1ea   :  { %4827 = vmatpush3.bf16.msra.mxu1 %v7470_v39 }
 0x1eb   :  { %4828 = vmatprep.subr.bf16.mxu1 %v7471_v46 }
 0x1ec   :  { %4807 = vmatpush3.bf16.msra.mxu0 %v7472_v24 }
 0x1ed   :  { %4808 = vmatprep.subr.bf16.mxu0 %v7473_v5 }
 0x1ee   :  { %4829 = vmatpush3.bf16.msra.mxu1 %v7474_v30 }
 0x1ef   :  { %4830 = vmatprep.subr.bf16.mxu1 %v7475_v63 }
 0x1f0   :  { %4809 = vmatpush3.bf16.msra.mxu0 %v7476_v48 }
 0x1f1   :  { %4810 = vmatprep.subr.bf16.mxu0 %v7477_v53 }
 0x1f2   :  { %4831 = vmatpush3.bf16.msra.mxu1 %v7478_v56 }
 0x1f3   :  { %4832 = vmatprep.subr.bf16.mxu1 %v7488_v15  ;;  %v7493_v15 = vld [vmem:[#allocation7_spill] sm:$0xff] }
 0x1f4   :  { %4811 = vmatpush3.bf16.msra.mxu0 %v7489_v51 }
 0x1f5   :  { %4812 = vmatprep.subr.bf16.mxu0 %v7490_v16 }
 0x1f6   :  { %4833 = vmatpush3.bf16.msra.mxu1 %v7491_v36  ;;  %v4510_v32 = vpop.f32.mrb[32].mxu0  ;;  %v2327_v36 = vcombine.high %v6642_v28, %v6642_v28 }
 0x1f7   :  { %v4511_v12 = vpop.f32.mrb[33].mxu0  ;;  %4834 = vmatprep.subr.bf16.mxu1 %v7492_v17 }
 0x1f8   :  { %v4532_v60 = vpop.f32.mrb[32].mxu1  ;;  %v4512_v6 = vadd.f32 %v4511_v12, %v4510_v32  ;;  %v4513_v61 = vpop.f32.mrb[34].mxu0  ;;  %4813 = vmatpush3.bf16.msra.mxu0 %v6511_v42  ;;  %v7494_v32 = vld [vmem:[#allocation18_spill] sm:$0xff]  ;;  %v2122_v12 = vrot.slane %v6597_v55, %v5527_v35 }
 0x1f9   :  { %v4533_v2 = vpop.f32.mrb[33].mxu1  ;;  %v4514_v3 = vpop.f32.mrb[35].mxu0  ;;  %4814 = vmatprep.subr.bf16.mxu0 %v6517_v50  ;;  %v7495_v61 = vld [vmem:[#allocation19_spill] sm:$0xff] }
 0x1fa   :  { %v4534_v20 = vadd.f32 %v4533_v2, %v4532_v60  ;;  %v4535_v16 = vpop.f32.mrb[34].mxu1  ;;  %4835 = vmatpush3.bf16.msra.mxu1 %v6523_v34  ;;  %v2138_v60 = vcombine.high %v2122_v12, %v2122_v12 }
 0x1fb   :  { %v4536_v51 = vpop.f32.mrb[35].mxu1  ;;  %4836 = vmatprep.subr.bf16.mxu1 %v6531_v14  ;;  %v2349_v16 = vrot.slane %v2327_v36, %v5527_v35 }
 0x1fc   :  { %v1564_v17 = vadd.f32 %v4534_v20, %v4512_v6  ;;  %4815 = vmatpush3.bf16.msra.mxu0 %v7493_v15 }
 0x1fd   :  { %4816 = vmatprep.subr.bf16.mxu0 %v7494_v32  ;;  %v2359_v20 = vcombine.high %v2349_v16, %v2349_v16 }
 0x1fe   :  { %4837 = vmatpush3.bf16.msra.mxu1 %v7495_v61 }
 0x1ff   :  { %4838 = vmatprep.subr.bf16.mxu1 %v6558_v21 }
 0x200   :  { %4817 = vmatpush3.bf16.msra.mxu0 %v6564_v43 }
 0x201   :  { %4846 = vmatprep.subr.bf16.mxu0 %v5989_v29  ;;  %v7496_v29 = vld [vmem:[#allocation8_spill] sm:$0xff] }
 0x202   :  { %4839 = vmatpush3.bf16.msra.mxu1 %v6571_v41 }
 0x203   :  { %2262 = vmatmul.mubr.bf16.vlgmr.msra.gmra.mrb[60].mxu0 %v2122_v12  ;;  %4868 = vmatprep.subr.bf16.mxu1 %v5996_v1  ;;  %v7497_v1 = vld [vmem:[#allocation9_spill] sm:$0xff] }
 0x204   :  { %4847 = vmatpush3.bf16.msra.mxu0 %v6002_v44  ;;  %2401 = vmatprep.mubr.bf16.mxu0 %v2349_v16  ;;  %v7498_v44 = vld [vmem:[#allocation14_spill] sm:$0xff] }
 0x205   :  { %2302 = vmatmul.mubr.bf16.vlgmr.msra.gmra.mrb[60].mxu1 %v2138_v60  ;;  %4848 = vmatprep.subr.bf16.mxu0 %v6008_v49  ;;  %v7499_v49 = vld [vmem:[#allocation10_spill] sm:$0xff] }
 0x206   :  { %4869 = vmatpush3.bf16.msra.mxu1 %v6014_v0  ;;  %2441 = vmatprep.mubr.bf16.mxu1 %v2359_v20  ;;  %v2312_v0 = vcombine.high %v4000_v23, %v4000_v23 }
 0x207   :  { %4870 = vmatprep.subr.bf16.mxu1 %v7435_v38  ;;  %v7500_v38 = vld [vmem:[#allocation16_spill] sm:$0xff] }
 0x208   :  { %4849 = vmatpush3.bf16.msra.mxu0 %v7436_v22  ;;  %v7501_v22 = vld [vmem:[#allocation12_spill] sm:$0xff] }
 0x209   :  { %4850 = vmatprep.subr.bf16.mxu0 %v7437_v7  ;;  %v7502_v7 = vld [vmem:[#allocation13_spill] sm:$0xff] }
 0x20a   :  { %4871 = vmatpush3.bf16.msra.mxu1 %v7438_v8  ;;  %v7503_v8 = vld [vmem:[#allocation15_spill] sm:$0xff] }
 0x20b   :  { %4872 = vmatprep.subr.bf16.mxu1 %v7439_v9 }
 0x20c   :  { %4851 = vmatpush3.bf16.msra.mxu0 %v7440_v10  ;;  %v6682_v10 = vrot.slane %v2312_v0, %v5527_v35 }
 0x20d   :  { %4852 = vmatprep.subr.bf16.mxu0 %v7441_v11 }
 0x20e   :  { %4873 = vmatpush3.bf16.msra.mxu1 %v7442_v13  ;;  %v7504_v13 = vld [vmem:[#allocation17_spill] sm:$0xff]  ;;  %v2328_v16 = vcombine.high %v6682_v10, %v6682_v10 }
 0x20f   :  { %4874 = vmatprep.subr.bf16.mxu1 %v7496_v29 }
 0x210   :  { %4853 = vmatpush3.bf16.msra.mxu0 %v7497_v1 }
 0x211   :  { %4854 = vmatprep.subr.bf16.mxu0 %v7498_v44 }
 0x212   :  { %4875 = vmatpush3.bf16.msra.mxu1 %v7499_v49 }
 0x213   :  { %4876 = vmatprep.subr.bf16.mxu1 %v7500_v38 }
 0x214   :  { %4855 = vmatpush3.bf16.msra.mxu0 %v7501_v22 }
 0x215   :  { %4856 = vmatprep.subr.bf16.mxu0 %v7502_v7 }
 0x216   :  { %4877 = vmatpush3.bf16.msra.mxu1 %v7503_v8  ;;  %v4554_v9 = vpop.f32.mrb[36].mxu0 }
 0x217   :  { %v4555_v11 = vpop.f32.mrb[37].mxu0  ;;  %4878 = vmatprep.subr.bf16.mxu1 %v7504_v13 }
 0x218   :  { %v4576_v55 = vpop.f32.mrb[36].mxu1  ;;  %v4556_v51 = vadd.f32 %v4555_v11, %v4554_v9  ;;  %v4557_v36 = vpop.f32.mrb[38].mxu0  ;;  %4857 = vmatpush3.bf16.msra.mxu0 %v6218_v27  ;;  %v2335_v27 = vrot.slane %v6642_v28, %v5527_v35 }
 0x219   :  { %v4577_v23 = vpop.f32.mrb[37].mxu1  ;;  %v4558_v6 = vpop.f32.mrb[39].mxu0  ;;  %4858 = vmatprep.subr.bf16.mxu0 %v6224_v31  ;;  %v2356_v31 = vrot.slane %v2328_v16, %v5527_v35 }
 0x21a   :  { %v1604_v2 = vadd.f32 %v4556_v51, %v1564_v17  ;;  %v4578_v3 = vadd.f32 %v4577_v23, %v4576_v55  ;;  %v4579_v12 = vpop.f32.mrb[38].mxu1  ;;  %4879 = vmatpush3.bf16.msra.mxu1 %v6230_v37  ;;  %v2357_v37 = vcombine.high %v2335_v27, %v2335_v27 }
 0x21b   :  { %v4580_v60 = vpop.f32.mrb[39].mxu1  ;;  %4880 = vmatprep.subr.bf16.mxu1 %v6238_v47  ;;  %v2360_v47 = vcombine.high %v2356_v31, %v2356_v31 }
 0x21c   :  { %v6691_v20 = vadd.f32 %v4578_v3, %v1604_v2  ;;  %4859 = vmatpush3.bf16.msra.mxu0 %v6246_v52  ;;  %v7505_v52 = vld [vmem:[#allocation26_spill] sm:$0xff] }
 0x21d   :  { %4860 = vmatprep.subr.bf16.mxu0 %v6252_v54  ;;  %v7506_v54 = vld [vmem:[#allocation27_spill] sm:$0xff] }
 0x21e   :  { %4881 = vmatpush3.bf16.msra.mxu1 %v6260_v57  ;;  %v7507_v57 = vld [vmem:[#allocation28_spill] sm:$0xff] }
 0x21f   :  { %4882 = vmatprep.subr.bf16.mxu1 %v6267_v59  ;;  %v7508_v59 = vld [vmem:[#allocation4_spill] sm:$0xff] }
 0x220   :  { %4861 = vmatpush3.bf16.msra.mxu0 %v6273_v33 }
 0x221   :  { %4890 = vmatprep.subr.bf16.mxu0 %v6279_v62 }
 0x222   :  { %4883 = vmatpush3.bf16.msra.mxu1 %v6285_v4  ;;  %v7509_v4 = vld [vmem:[#allocation5_spill] sm:$0xff] }
 0x223   :  { %2402 = vmatmul.mubr.bf16.vlgmr.msra.gmra.mrb[64].mxu0 %v2335_v27  ;;  %4912 = vmatprep.subr.bf16.mxu1 %v6291_v18 }
 0x224   :  { %4891 = vmatpush3.bf16.msra.mxu0 %v6297_v19  ;;  %2481 = vmatprep.mubr.bf16.mxu0 %v2356_v31 }
 0x225   :  { %2442 = vmatmul.mubr.bf16.vlgmr.msra.gmra.mrb[64].mxu1 %v2357_v37  ;;  %4892 = vmatprep.subr.bf16.mxu0 %v6303_v40 }
 0x226   :  { %4913 = vmatpush3.bf16.msra.mxu1 %v6309_v25  ;;  %2521 = vmatprep.mubr.bf16.mxu1 %v2360_v47 }
 0x227   :  { %4914 = vmatprep.subr.bf16.mxu1 %v6315_v26 }
 0x228   :  { %4893 = vmatpush3.bf16.msra.mxu0 %v7468_v58 }
 0x229   :  { %4894 = vmatprep.subr.bf16.mxu0 %v7469_v45 }
 0x22a   :  { %4915 = vmatpush3.bf16.msra.mxu1 %v7470_v39 }
 0x22b   :  { %4916 = vmatprep.subr.bf16.mxu1 %v7471_v46 }
 0x22c   :  { %4895 = vmatpush3.bf16.msra.mxu0 %v7472_v24  ;;  %v2342_v24 = vrot.slane %v6682_v10, %v5527_v35 }
 0x22d   :  { %4896 = vmatprep.subr.bf16.mxu0 %v7473_v5 }
 0x22e   :  { %4917 = vmatpush3.bf16.msra.mxu1 %v7474_v30 }
 0x22f   :  { %4918 = vmatprep.subr.bf16.mxu1 %v7475_v63 }
 0x230   :  { %4897 = vmatpush3.bf16.msra.mxu0 %v7476_v48 }
 0x231   :  { %4898 = vmatprep.subr.bf16.mxu0 %v7477_v53 }
 0x232   :  { %4919 = vmatpush3.bf16.msra.mxu1 %v7478_v56 }
 0x233   :  { %4920 = vmatprep.subr.bf16.mxu1 %v7505_v52 }
 0x234   :  { %4899 = vmatpush3.bf16.msra.mxu0 %v7506_v54 }
 0x235   :  { %4900 = vmatprep.subr.bf16.mxu0 %v7507_v57 }
 0x236   :  { %4921 = vmatpush3.bf16.msra.mxu1 %v7508_v59  ;;  %v4598_v33 = vpop.f32.mrb[40].mxu0 }
 0x237   :  { %v4599_v62 = vpop.f32.mrb[41].mxu0  ;;  %4922 = vmatprep.subr.bf16.mxu1 %v7509_v4 }
 0x238   :  { %v4620_v18 = vpop.f32.mrb[40].mxu1  ;;  %v4600_v19 = vadd.f32 %v4599_v62, %v4598_v33  ;;  %v4601_v40 = vpop.f32.mrb[42].mxu0  ;;  %4901 = vmatpush3.bf16.msra.mxu0 %v6511_v42  ;;  %v2358_v42 = vcombine.high %v2342_v24, %v2342_v24 }
 0x239   :  { %v4621_v25 = vpop.f32.mrb[41].mxu1  ;;  %v4602_v26 = vpop.f32.mrb[43].mxu0  ;;  %4902 = vmatprep.subr.bf16.mxu0 %v6517_v50 }
 0x23a   :  { %v4622_v58 = vadd.f32 %v4621_v25, %v4620_v18  ;;  %v4623_v45 = vpop.f32.mrb[42].mxu1  ;;  %4923 = vmatpush3.bf16.msra.mxu1 %v6523_v34 }
 0x23b   :  { %v4624_v39 = vpop.f32.mrb[43].mxu1  ;;  %4924 = vmatprep.subr.bf16.mxu1 %v6531_v14 }
 0x23c   :  { %v1784_v46 = vadd.f32 %v4622_v58, %v4600_v19  ;;  %4903 = vmatpush3.bf16.msra.mxu0 %v7493_v15 }
 0x23d   :  { %4904 = vmatprep.subr.bf16.mxu0 %v7494_v32 }
 0x23e   :  { %4925 = vmatpush3.bf16.msra.mxu1 %v7495_v61 }
 0x23f   :  { %4926 = vmatprep.subr.bf16.mxu1 %v6558_v21 }
 0x240   :  { %4905 = vmatpush3.bf16.msra.mxu0 %v6564_v43 }
 0x242   :  { %4927 = vmatpush3.bf16.msra.mxu1 %v6571_v41 }
 0x243   :  { %2482 = vmatmul.mubr.bf16.vlgmr.msra.gmra.mrb[68].mxu0 %v2342_v24 }
 0x245   :  { %2522 = vmatmul.mubr.bf16.vlgmr.msra.gmra.mrb[68].mxu1 %v2358_v42 }
 0x256   :  { %v4642_v5 = vpop.f32.mrb[44].mxu0 }
 0x257   :  { %v4643_v30 = vpop.f32.mrb[45].mxu0 }
 0x258   :  { %v4664_v63 = vpop.f32.mrb[44].mxu1  ;;  %v4644_v48 = vadd.f32 %v4643_v30, %v4642_v5  ;;  %v4645_v53 = vpop.f32.mrb[46].mxu0 }
 0x259   :  { %v4665_v56 = vpop.f32.mrb[45].mxu1  ;;  %v4646_v50 = vpop.f32.mrb[47].mxu0 }
 0x25a   :  { %v1824_v34 = vadd.f32 %v4644_v48, %v1784_v46  ;;  %v4666_v35 = vadd.f32 %v4665_v56, %v4664_v63  ;;  %v4667_v14 = vpop.f32.mrb[46].mxu1  ;;  %v7510_v50 = vld [vmem:[#allocation6_spill] sm:$0xff] }
 0x25b   :  { %v4668_v15 = vpop.f32.mrb[47].mxu1 }
 0x25c   :  { %v6736_v28 = vadd.f32 %v4666_v35, %v1824_v34  ;;  %v2538_v34 = vsel %vm2529_vm0, %v7510_v50, 0.0  ;;  %v7511_v35 = vld [vmem:[#allocation11_spill] sm:$0xff]  ;;  %v7512_v15 = vld [vmem:[#allocation29_spill] sm:$0xff] }
 0x25d   :  { %v2530_v14 = vsel %vm2529_vm0, %v7511_v35, 0.0 }
 0x276   :  { %v4686_v21 = vpop.f32.mrb[48].mxu0 }
 0x277   :  { %v4687_v43 = vpop.f32.mrb[49].mxu0 }
 0x278   :  { %v4708_v17 = vpop.f32.mrb[48].mxu1  ;;  %v4688_v32 = vadd.f32 %v4687_v43, %v4686_v21  ;;  %v4689_v41 = vpop.f32.mrb[50].mxu0  ;;  %v2546_v21 = vsel %vm2529_vm0, %v7512_v15, 0.0  ;;  %v2539_v43 = vrot.slane %v2538_v34, 4 }
 0x279   :  { %v4709_v61 = vpop.f32.mrb[49].mxu1  ;;  %v4690_v29 = vpop.f32.mrb[51].mxu0  ;;  %v2531_v41 = vrot.slane %v2530_v14, 4 }
 0x27a   :  { %v4710_v1 = vadd.f32 %v4709_v61, %v4708_v17  ;;  %v4711_v44 = vpop.f32.mrb[50].mxu1  ;;  %v7513_v17 = vld [vmem:[#allocation20_spill] sm:$0xff]  ;;  %v2547_v61 = vrot.slane %v2546_v21, 4  ;;  %v2562_v29 = vsel %vm2529_vm0, %v6691_v20, 0.0 }
 0x27b   :  { %v4712_v49 = vpop.f32.mrb[51].mxu1 }
 0x27c   :  { %v2004_v0 = vadd.f32 %v4710_v1, %v4688_v32  ;;  %v2554_v32 = vsel %vm2529_vm0, %v7513_v17, 0.0  ;;  %v2540_v1 = vadd.f32 %v2539_v43, %v2538_v34  ;;  %v2570_v49 = vsel %vm2529_vm0, %v6736_v28, 0.0 }
 0x27d   :  { %v2555_v44 = vrot.slane %v2554_v32, 4 }
 0x296   :  { %v4730_v38 = vpop.f32.mrb[52].mxu0 }
 0x297   :  { %v4731_v22 = vpop.f32.mrb[53].mxu0 }
 0x298   :  { %v4752_v7 = vpop.f32.mrb[52].mxu1  ;;  %v4732_v8 = vadd.f32 %v4731_v22, %v4730_v38  ;;  %v4733_v9 = vpop.f32.mrb[54].mxu0  ;;  %v2548_v38 = vadd.f32 %v2547_v61, %v2546_v21  ;;  %v2563_v22 = vrot.slane %v2562_v29, 4 }
 0x299   :  { %v4753_v10 = vpop.f32.mrb[53].mxu1  ;;  %v4734_v11 = vpop.f32.mrb[55].mxu0  ;;  %v2556_v9 = vadd.f32 %v2555_v44, %v2554_v32 }
 0x29a   :  { %v2044_v13 = vadd.f32 %v4732_v8, %v2004_v0  ;;  %v4754_v55 = vadd.f32 %v4753_v10, %v4752_v7  ;;  %v4755_v51 = vpop.f32.mrb[54].mxu1  ;;  %v2532_v0 = vadd.f32 %v2531_v41, %v2530_v14  ;;  %v2541_v8 = vrot.slane %v2540_v1, 2 }
 0x29b   :  { %v4756_v36 = vpop.f32.mrb[55].mxu1  ;;  %v2571_v10 = vrot.slane %v2570_v49, 4  ;;  %v2564_v51 = vadd.f32 %v2563_v22, %v2562_v29 }
 0x29c   :  { %v6738_v23 = vadd.f32 %v4754_v55, %v2044_v13  ;;  %v2533_v13 = vrot.slane %v2532_v0, 2  ;;  %v2549_v55 = vrot.slane %v2548_v38, 2 }
 0x29e   :  { %v2578_v7 = vsel %vm2529_vm0, %v6738_v23, 0.0 }
 0x29f   :  { %v2579_v36 = vrot.slane %v2578_v7, 4 }
 0x2b6   :  { %v4774_v6 = vpop.f32.mrb[56].mxu0 }
 0x2b7   :  { %v4775_v2 = vpop.f32.mrb[57].mxu0 }
 0x2b8   :  { %v4796_v3 = vpop.f32.mrb[56].mxu1  ;;  %v4776_v12 = vadd.f32 %v4775_v2, %v4774_v6  ;;  %v4777_v16 = vpop.f32.mrb[58].mxu0  ;;  %v2542_v6 = vadd.f32 %v2541_v8, %v2540_v1  ;;  %v2557_v2 = vrot.slane %v2556_v9, 2 }
 0x2b9   :  { %v4797_v60 = vpop.f32.mrb[57].mxu1  ;;  %v4778_v27 = vpop.f32.mrb[59].mxu0  ;;  %v2534_v16 = vadd.f32 %v2533_v13, %v2532_v0 }
 0x2ba   :  { %v4798_v31 = vadd.f32 %v4797_v60, %v4796_v3  ;;  %v4799_v37 = vpop.f32.mrb[58].mxu1  ;;  %v2572_v3 = vadd.f32 %v2571_v10, %v2570_v49  ;;  %v2550_v60 = vadd.f32 %v2549_v55, %v2548_v38  ;;  %v2565_v27 = vrot.slane %v2564_v51, 2 }
 0x2bb   :  { %v4800_v47 = vpop.f32.mrb[59].mxu1  ;;  %v2543_v37 = vrot.slane %v2542_v6, 1 }
 0x2bc   :  { %v2224_v52 = vadd.f32 %v4798_v31, %v4776_v12  ;;  %v2580_v31 = vadd.f32 %v2579_v36, %v2578_v7  ;;  %v2558_v47 = vadd.f32 %v2557_v2, %v2556_v9 }
 0x2d6   :  { %v4818_v54 = vpop.f32.mrb[60].mxu0 }
 0x2d7   :  { %v4819_v57 = vpop.f32.mrb[61].mxu0 }
 0x2d8   :  { %v4840_v59 = vpop.f32.mrb[60].mxu1  ;;  %v4820_v33 = vadd.f32 %v4819_v57, %v4818_v54  ;;  %v4821_v62 = vpop.f32.mrb[62].mxu0 }
 0x2d9   :  { %v4841_v4 = vpop.f32.mrb[61].mxu1  ;;  %v4822_v18 = vpop.f32.mrb[63].mxu0  ;;  %v2566_v62 = vadd.f32 %v2565_v27, %v2564_v51 }
 0x2da   :  { %v2264_v19 = vadd.f32 %v4820_v33, %v2224_v52  ;;  %v4842_v40 = vadd.f32 %v4841_v4, %v4840_v59  ;;  %v4843_v25 = vpop.f32.mrb[62].mxu1  ;;  %v2573_v52 = vrot.slane %v2572_v3, 2  ;;  %v2535_v59 = vrot.slane %v2534_v16, 1 }
 0x2db   :  { %v4844_v26 = vpop.f32.mrb[63].mxu1  ;;  %v2551_v33 = vrot.slane %v2550_v60, 1  ;;  %v2581_v4 = vrot.slane %v2580_v31, 2  ;;  %v2567_v34 = vrot.slane %v2566_v62, 1 }
 0x2dc   :  { %v6740_v58 = vadd.f32 %v4842_v40, %v2264_v19  ;;  %v2544_v26 = vadd.f32 %v2543_v37, %v2542_v6 }
 0x2dd   :  { %v2582_v14 = vadd.f32 %v2581_v4, %v2580_v31  ;;  %v2568_v49 = vadd.f32 %v2567_v34, %v2566_v62 }
 0x2de   :  { %v2586_v11 = vsel %vm2529_vm0, %v6740_v58, 0.0 }
 0x2df   :  { %v2587_v12 = vrot.slane %v2586_v11, 4  ;;  %v2583_v0 = vrot.slane %v2582_v14, 1 }
 0x2e1   :  { %v2588_v54 = vadd.f32 %v2587_v12, %v2586_v11  ;;  %v2584_v10 = vadd.f32 %v2583_v0, %v2582_v14 }
 0x2f6   :  { %v4862_v45 = vpop.f32.mrb[64].mxu0 }
 0x2f7   :  { %v4863_v39 = vpop.f32.mrb[65].mxu0 }
 0x2f8   :  { %v4884_v46 = vpop.f32.mrb[64].mxu1  ;;  %v4864_v24 = vadd.f32 %v4863_v39, %v4862_v45  ;;  %v4865_v42 = vpop.f32.mrb[66].mxu0  ;;  %v2559_v45 = vrot.slane %v2558_v47, 1  ;;  %v2574_v39 = vadd.f32 %v2573_v52, %v2572_v3 }
 0x2f9   :  { %v4885_v5 = vpop.f32.mrb[65].mxu1  ;;  %v4866_v30 = vpop.f32.mrb[67].mxu0 }
 0x2fa   :  { %v4886_v63 = vadd.f32 %v4885_v5, %v4884_v46  ;;  %v4887_v48 = vpop.f32.mrb[66].mxu1  ;;  %v2589_v46 = vrot.slane %v2588_v54, 2  ;;  %v2560_v41 = vadd.f32 %v2559_v45, %v2558_v47  ;;  %v2575_v61 = vrot.slane %v2574_v39, 1 }
 0x2fb   :  { %v4888_v53 = vpop.f32.mrb[67].mxu1  ;;  %v2536_v48 = vadd.f32 %v2535_v59, %v2534_v16 }
 0x2fc   :  { %v2444_v56 = vadd.f32 %v4886_v63, %v4864_v24  ;;  %v2552_v53 = vadd.f32 %v2551_v33, %v2550_v60  ;;  %v2590_v29 = vadd.f32 %v2589_v46, %v2588_v54  ;;  %v2576_v22 = vadd.f32 %v2575_v61, %v2574_v39 }
 0x2fd   :  { %v2545_v32 = vadd.f32 %v2544_v26, %v2536_v48 }
 0x2fe   :  { %v2591_v7 = vrot.slane %v2590_v29, 1 }
 0x2ff   :  { %v2553_v44 = vadd.f32 %v2552_v53, %v2545_v32 }
 0x300   :  { %v2592_v55 = vadd.f32 %v2591_v7, %v2590_v29 }
 0x301   :  { %v2561_v38 = vadd.f32 %v2560_v41, %v2553_v44 }
 0x303   :  { %v2569_v9 = vadd.f32 %v2568_v49, %v2561_v38 }
 0x305   :  { %v2577_v13 = vadd.f32 %v2576_v22, %v2569_v9 }
 0x307   :  { %v2585_v36 = vadd.f32 %v2584_v10, %v2577_v13 }
 0x309   :  { %v2593_v2 = vadd.f32 %v2592_v55, %v2585_v36 }
 0x316   :  { %v4906_v57 = vpop.f32.mrb[68].mxu0 }
 0x317   :  { %v4907_v18 = vpop.f32.mrb[69].mxu0 }
 0x318   :  { %v4928_v19 = vpop.f32.mrb[68].mxu1  ;;  %v4908_v40 = vadd.f32 %v4907_v18, %v4906_v57  ;;  %v4909_v25 = vpop.f32.mrb[70].mxu0 }
 0x319   :  { %v4929_v24 = vpop.f32.mrb[69].mxu1  ;;  %v4910_v42 = vpop.f32.mrb[71].mxu0 }
 0x31a   :  { %v2484_v5 = vadd.f32 %v4908_v40, %v2444_v56  ;;  %v4930_v30 = vadd.f32 %v4929_v24, %v4928_v19  ;;  %v4931_v63 = vpop.f32.mrb[70].mxu1 }
 0x31b   :  { %v4932_v21 = vpop.f32.mrb[71].mxu1 }
 0x31c   :  { %v6758_v43 = vadd.f32 %v4930_v30, %v2484_v5 }
 0x31e   :  { %v2594_v1 = vsel %vm2529_vm0, %v6758_v43, 0.0 }
 0x31f   :  { %v2595_v56 = vrot.slane %v2594_v1, 4 }
 0x321   :  { %v2596_v8 = vadd.f32 %v2595_v56, %v2594_v1 }
 0x323   :  { %v2597_v11 = vrot.slane %v2596_v8, 2 }
 0x325   :  { %v2598_v51 = vadd.f32 %v2597_v11, %v2596_v8 }
 0x327   :  { %v2599_v6 = vrot.slane %v2598_v51, 1 }
 0x329   :  { %v2600_v3 = vadd.f32 %v2599_v6, %v2598_v51 }
 0x32b   :  { %v2601_v12 = vadd.f32 %v2600_v3, %v2593_v2 }
 0x32d   :  { %v6762_v16 = vmul.f32 0.055555556, %v2601_v12 }
 0x32f   :  { %v2603_v60 = vsub.f32 %v7511_v35, %v6762_v16  ;;  %v2613_v27 = vsub.f32 %v7510_v50, %v6762_v16  ;;  %v2623_v31 = vsub.f32 %v7512_v15, %v6762_v16  ;;  %v2633_v37 = vsub.f32 %v7513_v17, %v6762_v16 }
 0x330   :  { %v2643_v47 = vsub.f32 %v6691_v20, %v6762_v16  ;;  %v2653_v52 = vsub.f32 %v6736_v28, %v6762_v16  ;;  %v2663_v54 = vsub.f32 %v6738_v23, %v6762_v16  ;;  %v2673_v57 = vsub.f32 %v6740_v58, %v6762_v16 }
 0x331   :  { %v2604_v59 = vmul.f32 %v2603_v60, %v2603_v60  ;;  %v2614_v33 = vmul.f32 %v2613_v27, %v2613_v27  ;;  %v2624_v62 = vmul.f32 %v2623_v31, %v2623_v31  ;;  %v2634_v4 = vmul.f32 %v2633_v37, %v2633_v37 }
 0x332   :  { %v2644_v18 = vmul.f32 %v2643_v47, %v2643_v47  ;;  %v2654_v19 = vmul.f32 %v2653_v52, %v2653_v52  ;;  %v2664_v40 = vmul.f32 %v2663_v54, %v2663_v54  ;;  %v2674_v25 = vmul.f32 %v2673_v57, %v2673_v57 }
 0x333   :  { %v2605_v26 = vsel %vm2529_vm0, %v2604_v59, 0.0  ;;  %v2615_v45 = vsel %vm2529_vm0, %v2614_v33, 0.0  ;;  %v2625_v39 = vsel %vm2529_vm0, %v2624_v62, 0.0  ;;  %v2635_v46 = vsel %vm2529_vm0, %v2634_v4, 0.0 }
 0x334   :  { %v2606_v24 = vrot.slane %v2605_v26, 4  ;;  %v2616_v42 = vrot.slane %v2615_v45, 4  ;;  %v2626_v5 = vrot.slane %v2625_v39, 4  ;;  %v2636_v30 = vrot.slane %v2635_v46, 4 }
 0x335   :  { %v2645_v63 = vsel %vm2529_vm0, %v2644_v18, 0.0  ;;  %v2655_v48 = vsel %vm2529_vm0, %v2654_v19, 0.0  ;;  %v2665_v53 = vsel %vm2529_vm0, %v2664_v40, 0.0  ;;  %v2675_v34 = vsel %vm2529_vm0, %v2674_v25, 0.0 }
 0x336   :  { %v2607_v14 = vadd.f32 %v2606_v24, %v2605_v26  ;;  %v2617_v21 = vadd.f32 %v2616_v42, %v2615_v45  ;;  %v2627_v32 = vadd.f32 %v2626_v5, %v2625_v39  ;;  %v2637_v41 = vadd.f32 %v2636_v30, %v2635_v46 }
 0x337   :  { %v2646_v61 = vrot.slane %v2645_v63, 4  ;;  %v2656_v29 = vrot.slane %v2655_v48, 4  ;;  %v2666_v1 = vrot.slane %v2665_v53, 4  ;;  %v2676_v44 = vrot.slane %v2675_v34, 4 }
 0x338   :  { %v2608_v49 = vrot.slane %v2607_v14, 2  ;;  %v2618_v0 = vrot.slane %v2617_v21, 2  ;;  %v2628_v56 = vrot.slane %v2627_v32, 2  ;;  %v2638_v38 = vrot.slane %v2637_v41, 2 }
 0x339   :  { %v2647_v22 = vadd.f32 %v2646_v61, %v2645_v63  ;;  %v2657_v7 = vadd.f32 %v2656_v29, %v2655_v48  ;;  %v2667_v8 = vadd.f32 %v2666_v1, %v2665_v53  ;;  %v2677_v6 = vadd.f32 %v2676_v44, %v2675_v34 }
 0x33a   :  { %v2609_v9 = vadd.f32 %v2608_v49, %v2607_v14  ;;  %v2619_v10 = vadd.f32 %v2618_v0, %v2617_v21  ;;  %v2629_v11 = vadd.f32 %v2628_v56, %v2627_v32  ;;  %v2639_v13 = vadd.f32 %v2638_v38, %v2637_v41  ;;  %v2696_v0 = vld [vmem:[%s7270_s2] sm:$0x1]  ;;  %v7514_v56 = vld [vmem:[#allocation3_spill] sm:$0xff] }
 0x33b   :  { %v2648_v55 = vrot.slane %v2647_v22, 2  ;;  %v2658_v51 = vrot.slane %v2657_v7, 2  ;;  %v2668_v36 = vrot.slane %v2667_v8, 2  ;;  %v2678_v54 = vrot.slane %v2677_v6, 2 }
 0x33c   :  { %v2610_v2 = vrot.slane %v2609_v9, 1  ;;  %v2620_v3 = vrot.slane %v2619_v10, 1  ;;  %v2630_v12 = vrot.slane %v2629_v11, 1  ;;  %v2640_v37 = vrot.slane %v2639_v13, 1 }
 0x33d   :  { %v2649_v60 = vadd.f32 %v2648_v55, %v2647_v22  ;;  %v2659_v47 = vadd.f32 %v2658_v51, %v2657_v7  ;;  %v2669_v52 = vadd.f32 %v2668_v36, %v2667_v8  ;;  %v2683_v62 = vsub.f32 %v6758_v43, %v6762_v16  ;;  %v2698_v8 = vld [vmem:[%s7271_s3] sm:$0x1] }
 0x33e   :  { %v2611_v27 = vadd.f32 %v2610_v2, %v2609_v9  ;;  %v2621_v31 = vadd.f32 %v2620_v3, %v2619_v10  ;;  %v2631_v59 = vadd.f32 %v2630_v12, %v2629_v11  ;;  %v2641_v18 = vadd.f32 %v2640_v37, %v2639_v13 }
 0x33f   :  { %v2650_v33 = vrot.slane %v2649_v60, 1  ;;  %v2660_v19 = vrot.slane %v2659_v47, 1  ;;  %v2684_v40 = vmul.f32 %v2683_v62, %v2683_v62  ;;  %v2679_v25 = vadd.f32 %v2678_v54, %v2677_v6 }
 0x340   :  { %v2622_v57 = vadd.f32 %v2621_v31, %v2611_v27  ;;  %v2670_v39 = vrot.slane %v2669_v52, 1  ;;  %v6795_v38 = vsub.s32 0, %v7514_v56 }
 0x341   :  { %v2651_v45 = vadd.f32 %v2650_v33, %v2649_v60  ;;  %v2685_v46 = vsel %vm2529_vm0, %v2684_v40, 0.0  ;;  %v2661_v5 = vadd.f32 %v2660_v19, %v2659_v47  ;;  %v2680_v30 = vrot.slane %v2679_v25, 1 }
 0x342   :  { %v2632_v4 = vadd.f32 %v2631_v59, %v2622_v57  ;;  %v2686_v24 = vrot.slane %v2685_v46, 4  ;;  %v2671_v53 = vadd.f32 %v2670_v39, %v2669_v52  ;;  %v4002_v52 = vld [vmem:[%s7272_s4 + $0x1] ss:$0 sm:$0xff]  ;;  %v4006_v39 = vld [vmem:[%s7272_s4 + $0x5] ss:$0 sm:$0xff] }
 0x343   :  { %v2681_v21 = vadd.f32 %v2680_v30, %v2679_v25 }
 0x344   :  { %v2642_v26 = vadd.f32 %v2641_v18, %v2632_v4  ;;  %v2687_v63 = vadd.f32 %v2686_v24, %v2685_v46 }
 0x346   :  { %v2652_v42 = vadd.f32 %v2651_v45, %v2642_v26  ;;  %v2688_v34 = vrot.slane %v2687_v63, 2 }
 0x348   :  { %v2662_v48 = vadd.f32 %v2661_v5, %v2652_v42  ;;  %v2689_v32 = vadd.f32 %v2688_v34, %v2687_v63  ;;  %v4007_v34 = vld [vmem:[%s7272_s4 + $0x6] ss:$0 sm:$0xff] }
 0x34a   :  { %v2672_v14 = vadd.f32 %v2671_v53, %v2662_v48  ;;  %v2690_v61 = vrot.slane %v2689_v32, 1  ;;  %v4008_v48 = vld [vmem:[%s7272_s4 + $0x7] ss:$0 sm:$0xff] }
 0x34c   :  { %v2682_v41 = vadd.f32 %v2681_v21, %v2672_v14  ;;  %v2691_v29 = vadd.f32 %v2690_v61, %v2689_v32  ;;  %v4009_v61 = vld [vmem:[%s7272_s4 + $0x8] ss:$0 sm:$0xff] }
 0x34e   :  { %v2692_v1 = vadd.f32 %v2691_v29, %v2682_v41 }
 0x350   :  { %v2693_v44 = vmul.f32 0.055555556, %v2692_v1 }
 0x352   :  { %v2694_v49 = vadd.f32 1e-05, %v2693_v44 }
 0x354   :  { %5215 = vrsqrt.f32 %v2694_v49 }
 0x35e   :  { %v5216_v22 = vpop.eup %5215 }
 0x35f   :  { %v2697_v7 = vmul.f32 %v5216_v22, %v2696_v0  ;;  %v15_v0 = vstv %s7273_s5  ;;  %v5290_v22 = vmov 0  }
 0x360   :  { %16 = vst [vmem:[#allocation2] sm:$0x1] %v15_v0  ;;  %4948 = vset.pattern.permute.xlu1 %v5290_v22  ;;  %4949 = vset.pattern.permute.xlu0 %v5290_v22 }
 0x361   :  { %v2699_v9 = vmul.f32 %v2697_v7, %v6762_v16  ;;  %v2704_v10 = vrot.slane %v2697_v7, %v6795_v38  ;;  %v5023_v7 = vld [vmem:[%s7274_s8] ss:$8 sps:$4 sm:$0xff]  }
 0x363   :  { %v2700_v11 = vsub.f32 %v2698_v8, %v2699_v9  ;;  %v2736_v13 = vmul.f32 %v2704_v10, %v7512_v15  ;;  %v2711_v51 = vmul.f32 %v2704_v10, %v7511_v35  ;;  %v2749_v36 = vmul.f32 %v2704_v10, %v7513_v17  ;;  %v4003_v15 = vld [vmem:[%s7272_s4 + $0x2] ss:$0 sm:$0xff]  ;;  %v4001_v35 = vld [vmem:[%s7272_s4] ss:$0 sm:$0xff]  ;;  %v5025_v8 = vld [vmem:[%s7274_s8 + $0x4] ss:$8 sps:$4 sm:$0xff]  }
 0x364   :  { %v2723_v6 = vmul.f32 %v2704_v10, %v7510_v50  ;;  %v2775_v2 = vmul.f32 %v2704_v10, %v6736_v28  ;;  %v2762_v3 = vmul.f32 %v2704_v10, %v6691_v20  ;;  %v4004_v20 = vld [vmem:[%s7272_s4 + $0x3] ss:$0 sm:$0xff]  ;;  %v2801_v54 = vmul.f32 %v2704_v10, %v6740_v58  ;;  %3737 = vmatprep.subr.bf16.mxu1 %v5025_v8 }
 0x365   :  { %v2709_v55 = vrot.slane %v2700_v11, %v6795_v38  ;;  %v2788_v57 = vmul.f32 %v2704_v10, %v6738_v23  ;;  %v4005_v23 = vld [vmem:[%s7272_s4 + $0x4] ss:$0 sm:$0xff]  ;;  %v2814_v58 = vmul.f32 %v2704_v10, %v6758_v43  ;;  %v5026_v9 = vld [vmem:[%s7274_s8 + $0x200] ss:$8 sps:$4 sm:$0xff]   ;;  %v5029_v11 = vld [vmem:[%s7274_s8 + $0x10] ss:$8 sps:$4 sm:$0xff]   ;;  %3738 = vmatpush1.bf16.msra.mxu1 %v5023_v7 }
 0x366   :  { %v5028_v10 = vld [vmem:[%s7274_s8 + $0x204] ss:$8 sps:$4 sm:$0xff]  }
 0x367   :  { %v2737_v12 = vadd.f32 %v2736_v13, %v2709_v55  ;;  %v2712_v60 = vadd.f32 %v2711_v51, %v2709_v55  ;;  %v2750_v16 = vadd.f32 %v2749_v36, %v2709_v55  ;;  %v2724_v27 = vadd.f32 %v2723_v6, %v2709_v55  ;;  %v5031_v13 = vld [vmem:[%s7274_s8 + $0x14] ss:$8 sps:$4 sm:$0xff]   ;;  %3819 = vmatprep.subr.bf16.mxu0 %v5028_v10  ;;  %v5037_v36 = vld [vmem:[%s7274_s8 + $0x24] ss:$8 sps:$4 sm:$0xff]   ;;  %v5035_v6 = vld [vmem:[%s7274_s8 + $0x20] ss:$8 sps:$4 sm:$0xff]  }
 0x368   :  { %v2776_v31 = vadd.f32 %v2775_v2, %v2709_v55  ;;  %v2763_v17 = vadd.f32 %v2762_v3, %v2709_v55  ;;  %v2802_v18 = vadd.f32 %v2801_v54, %v2709_v55  ;;  %v2789_v19 = vadd.f32 %v2788_v57, %v2709_v55  ;;  %3820 = vmatpush1.bf16.msra.mxu0 %v5026_v9  ;;  %v5034_v51 = vld [vmem:[%s7274_s8 + $0x214] ss:$8 sps:$4 sm:$0xff]   ;;  %v5040_v2 = vld [vmem:[%s7274_s8 + $0x224] ss:$8 sps:$4 sm:$0xff]   ;;  %v5038_v3 = vld [vmem:[%s7274_s8 + $0x220] ss:$8 sps:$4 sm:$0xff]  }
 0x369   :  { %v2738_v37 = vmax.f32 %v2737_v12, 0.0  ;;  %v2713_v50 = vmax.f32 %v2712_v60, 0.0  ;;  %v2751_v47 = vmax.f32 %v2750_v16, 0.0  ;;  %v2725_v28 = vmax.f32 %v2724_v27, 0.0  ;;  %3739 = vmatprep.subr.bf16.mxu1 %v5031_v13  ;;  %3821 = vmatprep.subr.bf16.mxu0 %v5034_v51  ;;  %v5043_v12 = vld [vmem:[%s7274_s8 + $0x34] ss:$8 sps:$4 sm:$0xff]  }
 0x36a   :  { %v2777_v62 = vmax.f32 %v2776_v31, 0.0  ;;  %v2764_v4 = vmax.f32 %v2763_v17, 0.0  ;;  %v2803_v24 = vmax.f32 %v2802_v18, 0.0  ;;  %v2790_v42 = vmax.f32 %v2789_v19, 0.0  ;;  %3740 = vmatpush1.bf16.msra.mxu1 %v5029_v11  ;;  %v5046_v60 = vld [vmem:[%s7274_s8 + $0x234] ss:$8 sps:$4 sm:$0xff]  }
 0x36b   :  { %v2744_v59 = vmul.f32 %v4003_v15, %v2738_v37  ;;  %v2719_v33 = vmul.f32 %v4001_v35, %v2713_v50  ;;  %v2757_v26 = vmul.f32 %v4004_v20, %v2751_v47  ;;  %v2731_v45 = vmul.f32 %v4002_v52, %v2725_v28  ;;  %3741 = vmatprep.subr.bf16.mxu1 %v5037_v36  ;;  %v5041_v16 = vld [vmem:[%s7274_s8 + $0x30] ss:$8 sps:$4 sm:$0xff]   ;;  %v5049_v15 = vld [vmem:[%s7274_s8 + $0x44] ss:$8 sps:$4 sm:$0xff]   ;;  %v5047_v31 = vld [vmem:[%s7274_s8 + $0x40] ss:$8 sps:$4 sm:$0xff]  }
 0x36c   :  { %v2783_v46 = vmul.f32 %v4006_v39, %v2777_v62  ;;  %v2770_v63 = vmul.f32 %v4005_v23, %v2764_v4  ;;  %v2815_v53 = vadd.f32 %v2814_v58, %v2709_v55  ;;  %v2809_v43 = vmul.f32 %v4008_v48, %v2803_v24  ;;  %v5032_v55 = vld [vmem:[%s7274_s8 + $0x210] ss:$8 sps:$4 sm:$0xff]   ;;  %v5052_v35 = vld [vmem:[%s7274_s8 + $0x244] ss:$8 sps:$4 sm:$0xff]   ;;  %v5050_v17 = vld [vmem:[%s7274_s8 + $0x240] ss:$8 sps:$4 sm:$0xff]  }
 0x36d   :  { %v2745_v40 = vsel %vm2529_vm0, %v2744_v59, 0.0  ;;  %v2720_v25 = vsel %vm2529_vm0, %v2719_v33, 0.0  ;;  %v2758_v5 = vsel %vm2529_vm0, %v2757_v26, 0.0  ;;  %v2732_v30 = vsel %vm2529_vm0, %v2731_v45, 0.0  ;;  %3822 = vmatpush1.bf16.msra.mxu0 %v5032_v55  ;;  %v5044_v27 = vld [vmem:[%s7274_s8 + $0x230] ss:$8 sps:$4 sm:$0xff]  }
 0x36e   :  { %2746 = vadd.xlane.f32.xlu1 %v2745_v40  ;;  %2721 = vadd.xlane.f32.xlu0 %v2720_v25  ;;  %v2784_v14 = vsel %vm2529_vm0, %v2783_v46, 0.0  ;;  %v2771_v21 = vsel %vm2529_vm0, %v2770_v63, 0.0  ;;  %v2796_v32 = vmul.f32 %v4007_v34, %v2790_v42  ;;  %v2816_v41 = vmax.f32 %v2815_v53, 0.0  ;;  %v5055_v37 = vld [vmem:[%s7274_s8 + $0x54] ss:$8 sps:$4 sm:$0xff]  }
 0x36f   :  { %v2810_v29 = vsel %vm2529_vm0, %v2809_v43, 0.0  ;;  %3823 = vmatprep.subr.bf16.mxu0 %v5040_v2  ;;  %3742 = vmatpush1.bf16.msra.mxu1 %v5035_v6  ;;  %v5058_v50 = vld [vmem:[%s7274_s8 + $0x254] ss:$8 sps:$4 sm:$0xff]   ;;  %v5053_v47 = vld [vmem:[%s7274_s8 + $0x50] ss:$8 sps:$4 sm:$0xff]  }
 0x370   :  { %v2797_v1 = vsel %vm2529_vm0, %v2796_v32, 0.0  ;;  %v2822_v44 = vmul.f32 %v4009_v61, %v2816_v41  ;;  %3743 = vmatprep.subr.bf16.mxu1 %v5043_v12  ;;  %v5056_v28 = vld [vmem:[%s7274_s8 + $0x250] ss:$8 sps:$4 sm:$0xff]   ;;  %v5061_v20 = vld [vmem:[%s7274_s8 + $0x64] ss:$8 sps:$4 sm:$0xff]  }
 0x371   :  { %3824 = vmatpush1.bf16.msra.mxu0 %v5038_v3  ;;  %v5064_v52 = vld [vmem:[%s7274_s8 + $0x264] ss:$8 sps:$4 sm:$0xff]   ;;  %v5059_v54 = vld [vmem:[%s7274_s8 + $0x60] ss:$8 sps:$4 sm:$0xff]   ;;  %v5067_v59 = vld [vmem:[%s7274_s8 + $0x74] ss:$8 sps:$4 sm:$0xff]  }
 0x372   :  { %2759 = vadd.xlane.f32.xlu1 %v2758_v5  ;;  %2733 = vadd.xlane.f32.xlu0 %v2732_v30  ;;  %v2823_v49 = vsel %vm2529_vm0, %v2822_v44, 0.0  ;;  %v5062_v57 = vld [vmem:[%s7274_s8 + $0x260] ss:$8 sps:$4 sm:$0xff]   ;;  %v5070_v33 = vld [vmem:[%s7274_s8 + $0x274] ss:$8 sps:$4 sm:$0xff]  }
 0x373   :  { %3825 = vmatprep.subr.bf16.mxu0 %v5046_v60  ;;  %3744 = vmatpush1.bf16.msra.mxu1 %v5041_v16  ;;  %v5065_v62 = vld [vmem:[%s7274_s8 + $0x70] ss:$8 sps:$4 sm:$0xff]   ;;  %v5073_v18 = vld [vmem:[%s7274_s8 + $0x84] ss:$8 sps:$4 sm:$0xff]   ;;  %v5071_v40 = vld [vmem:[%s7274_s8 + $0x80] ss:$8 sps:$4 sm:$0xff]  }
 0x374   :  { %3745 = vmatprep.subr.bf16.mxu1 %v5049_v15  ;;  %v5068_v4 = vld [vmem:[%s7274_s8 + $0x270] ss:$8 sps:$4 sm:$0xff]   ;;  %v5076_v19 = vld [vmem:[%s7274_s8 + $0x284] ss:$8 sps:$4 sm:$0xff]   ;;  %v5074_v25 = vld [vmem:[%s7274_s8 + $0x280] ss:$8 sps:$4 sm:$0xff]  }
 0x375   :  { %3826 = vmatpush1.bf16.msra.mxu0 %v5044_v27  ;;  %v5079_v26 = vld [vmem:[%s7274_s8 + $0x94] ss:$8 sps:$4 sm:$0xff]   ;;  %v5077_v39 = vld [vmem:[%s7274_s8 + $0x90] ss:$8 sps:$4 sm:$0xff]   ;;  %v5085_v58 = vld [vmem:[%s7274_s8 + $0xa4] ss:$8 sps:$4 sm:$0xff]  }
 0x376   :  { %2785 = vadd.xlane.f32.xlu1 %v2784_v14  ;;  %2772 = vadd.xlane.f32.xlu0 %v2771_v21  ;;  %v5082_v45 = vld [vmem:[%s7274_s8 + $0x294] ss:$8 sps:$4 sm:$0xff]   ;;  %v5080_v23 = vld [vmem:[%s7274_s8 + $0x290] ss:$8 sps:$4 sm:$0xff]   ;;  %v5088_v46 = vld [vmem:[%s7274_s8 + $0x2a4] ss:$8 sps:$4 sm:$0xff]  }
 0x377   :  { %3827 = vmatprep.subr.bf16.mxu0 %v5052_v35  ;;  %3746 = vmatpush1.bf16.msra.mxu1 %v5047_v31  ;;  %v5083_v24 = vld [vmem:[%s7274_s8 + $0xa0] ss:$8 sps:$4 sm:$0xff]   ;;  %v5091_v5 = vld [vmem:[%s7274_s8 + $0xb4] ss:$8 sps:$4 sm:$0xff]   ;;  %v5089_v63 = vld [vmem:[%s7274_s8 + $0xb0] ss:$8 sps:$4 sm:$0xff]  }
 0x378   :  { %3747 = vmatprep.subr.bf16.mxu1 %v5055_v37  ;;  %v5086_v42 = vld [vmem:[%s7274_s8 + $0x2a0] ss:$8 sps:$4 sm:$0xff]   ;;  %v5094_v30 = vld [vmem:[%s7274_s8 + $0x2b4] ss:$8 sps:$4 sm:$0xff]   ;;  %v5092_v48 = vld [vmem:[%s7274_s8 + $0x2b0] ss:$8 sps:$4 sm:$0xff]  }
 0x379   :  { %3828 = vmatpush1.bf16.msra.mxu0 %v5050_v17  ;;  %v5097_v53 = vld [vmem:[%s7274_s8 + $0xc4] ss:$8 sps:$4 sm:$0xff]   ;;  %v5095_v43 = vld [vmem:[%s7274_s8 + $0xc0] ss:$8 sps:$4 sm:$0xff]   ;;  %v5103_v21 = vld [vmem:[%s7274_s8 + $0xd4] ss:$8 sps:$4 sm:$0xff]  }
 0x37a   :  { %2811 = vadd.xlane.f32.xlu1 %v2810_v29  ;;  %2798 = vadd.xlane.f32.xlu0 %v2797_v1  ;;  %v5100_v34 = vld [vmem:[%s7274_s8 + $0x2c4] ss:$8 sps:$4 sm:$0xff]   ;;  %v5098_v14 = vld [vmem:[%s7274_s8 + $0x2c0] ss:$8 sps:$4 sm:$0xff]   ;;  %v5106_v32 = vld [vmem:[%s7274_s8 + $0x2d4] ss:$8 sps:$4 sm:$0xff]  }
 0x37b   :  { %3829 = vmatprep.subr.bf16.mxu0 %v5058_v50  ;;  %3748 = vmatpush1.bf16.msra.mxu1 %v5053_v47  ;;  %v5101_v41 = vld [vmem:[%s7274_s8 + $0xd0] ss:$8 sps:$4 sm:$0xff]   ;;  %v4010_v6 = vld [vmem:[#allocation2] ss:$0 sm:$0xff]  ;;  %v5109_v27 = vld [vmem:[%s7274_s8 + $0xe4] ss:$8 sps:$4 sm:$0xff]  }
 0x37c   :  { %3749 = vmatprep.subr.bf16.mxu1 %v5061_v20  ;;  %v5104_v61 = vld [vmem:[%s7274_s8 + $0x2d0] ss:$8 sps:$4 sm:$0xff]   ;;  %v5107_v16 = vld [vmem:[%s7274_s8 + $0xe0] ss:$8 sps:$4 sm:$0xff]   ;;  %v5112_v35 = vld [vmem:[%s7274_s8 + $0x2e4] ss:$8 sps:$4 sm:$0xff]  }
 0x37d   :  { %3830 = vmatpush1.bf16.msra.mxu0 %v5056_v28  ;;  %v5110_v15 = vld [vmem:[%s7274_s8 + $0x2e0] ss:$8 sps:$4 sm:$0xff]   ;;  %v5115_v31 = vld [vmem:[%s7274_s8 + $0xf4] ss:$8 sps:$4 sm:$0xff]   ;;  %v5113_v37 = vld [vmem:[%s7274_s8 + $0xf0] ss:$8 sps:$4 sm:$0xff]  }
 0x37e   :  { %2824 = vadd.xlane.f32.xlu0 %v2823_v49  ;;  %3831 = vmatprep.subr.bf16.mxu0 %v5064_v52  ;;  %v5118_v17 = vld [vmem:[%s7274_s8 + $0x2f4] ss:$8 sps:$4 sm:$0xff]   ;;  %v5116_v50 = vld [vmem:[%s7274_s8 + $0x2f0] ss:$8 sps:$4 sm:$0xff]   ;;  %v5121_v47 = vld [vmem:[%s7274_s8 + $0x104] ss:$8 sps:$4 sm:$0xff]  }
 0x37f   :  { %3750 = vmatpush1.bf16.msra.mxu1 %v5059_v54  ;;  %v5124_v28 = vld [vmem:[%s7274_s8 + $0x304] ss:$8 sps:$4 sm:$0xff]   ;;  %v7050_v20 = vsub.s32 1, %v7514_v56  ;;  %v2865_v52 = vsub.s32 5, %v7514_v56  ;;  %v2861_v54 = vsub.s32 4, %v7514_v56 }
 0x380   :  { %3751 = vmatprep.subr.bf16.mxu1 %v5067_v59  ;;  %v2857_v59 = vsub.s32 3, %v7514_v56 }
 0x381   :  { %3832 = vmatpush1.bf16.msra.mxu0 %v5062_v57  ;;  %v2836_v57 = vld [vmem:[%s7275_s6] sm:$0xff] }
 0x382   :  { %3833 = vmatprep.subr.bf16.mxu0 %v5070_v33  ;;  %v2873_v33 = vsub.s32 7, %v7514_v56 }
 0x383   :  { %3752 = vmatpush1.bf16.msra.mxu1 %v5065_v62  ;;  %v2853_v62 = vsub.s32 2, %v7514_v56 }
 0x384   :  { %3753 = vmatprep.subr.bf16.mxu1 %v5073_v18  ;;  %v2891_v18 = vld [vmem:[%s7276_s7] sm:$0xff] }
 0x385   :  { %3834 = vmatpush1.bf16.msra.mxu0 %v5068_v4  ;;  %v2869_v4 = vsub.s32 6, %v7514_v56  ;;  %v2912_v56 = vrot.slane %v2891_v18, %v2861_v54 }
 0x386   :  { %3835 = vmatprep.subr.bf16.mxu0 %v5076_v19  ;;  %v2850_v19 = vrot.slane %v2836_v57, %v7050_v20 }
 0x387   :  { %3754 = vmatpush1.bf16.msra.mxu1 %v5071_v40  ;;  %v2866_v40 = vrot.slane %v2836_v57, %v2865_v52 }
 0x388   :  { %3755 = vmatprep.subr.bf16.mxu1 %v5079_v26  ;;  %v2862_v26 = vrot.slane %v2836_v57, %v2861_v54  ;;  %v5139_v54 = vld [vmem:[%s7274_s8 + $0x134] ss:$8 sps:$4 sm:$0xff]  }
 0x389   :  { %3836 = vmatpush1.bf16.msra.mxu0 %v5074_v25  ;;  %v2846_v25 = vrot.slane %v2836_v57, %v6795_v38 }
 0x38a   :  { %3837 = vmatprep.subr.bf16.mxu0 %v5082_v45  ;;  %v2858_v45 = vrot.slane %v2836_v57, %v2857_v59 }
 0x38b   :  { %3756 = vmatpush1.bf16.msra.mxu1 %v5077_v39  ;;  %v2874_v39 = vrot.slane %v2836_v57, %v2873_v33 }
 0x38c   :  { %3757 = vmatprep.subr.bf16.mxu1 %v5085_v58  ;;  %v2870_v58 = vrot.slane %v2836_v57, %v2869_v4 }
 0x38d   :  { %3838 = vmatpush1.bf16.msra.mxu0 %v5080_v23  ;;  %v2854_v23 = vrot.slane %v2836_v57, %v2853_v62  ;;  %v5142_v57 = vld [vmem:[%s7274_s8 + $0x334] ss:$8 sps:$4 sm:$0xff]  }
 0x38e   :  { %3839 = vmatprep.subr.bf16.mxu0 %v5088_v46  ;;  %v2900_v46 = vrot.slane %v2891_v18, %v7050_v20 }
 0x38f   :  { %3758 = vmatpush1.bf16.msra.mxu1 %v5083_v24  ;;  %v2916_v24 = vrot.slane %v2891_v18, %v2865_v52  ;;  %v5134_v52 = vld [vmem:[%s7274_s8 + $0x320] ss:$8 sps:$4 sm:$0xff]  }
 0x390   :  { %3759 = vmatprep.subr.bf16.mxu1 %v5091_v5 }
 0x391   :  { %3840 = vmatpush1.bf16.msra.mxu0 %v5086_v42  ;;  %v2896_v42 = vrot.slane %v2891_v18, %v6795_v38 }
 0x392   :  { %3841 = vmatprep.subr.bf16.mxu0 %v5094_v30  ;;  %v2908_v30 = vrot.slane %v2891_v18, %v2857_v59  ;;  %v5137_v59 = vld [vmem:[%s7274_s8 + $0x130] ss:$8 sps:$4 sm:$0xff]  }
 0x393   :  { %3760 = vmatpush1.bf16.msra.mxu1 %v5089_v63  ;;  %v2924_v63 = vrot.slane %v2891_v18, %v2873_v33  ;;  %v5140_v33 = vld [vmem:[%s7274_s8 + $0x330] ss:$8 sps:$4 sm:$0xff]  }
 0x394   :  { %3761 = vmatprep.subr.bf16.mxu1 %v5097_v53  ;;  %v2920_v53 = vrot.slane %v2891_v18, %v2869_v4  ;;  %v5148_v4 = vld [vmem:[%s7274_s8 + $0x344] ss:$8 sps:$4 sm:$0xff]  }
 0x395   :  { %3842 = vmatpush1.bf16.msra.mxu0 %v5092_v48  ;;  %v2904_v48 = vrot.slane %v2891_v18, %v2853_v62  ;;  %v5145_v62 = vld [vmem:[%s7274_s8 + $0x144] ss:$8 sps:$4 sm:$0xff]   ;;  %v5143_v18 = vld [vmem:[%s7274_s8 + $0x140] ss:$8 sps:$4 sm:$0xff]  }
 0x396   :  { %3843 = vmatprep.subr.bf16.mxu0 %v5100_v34 }
 0x397   :  { %3762 = vmatpush1.bf16.msra.mxu1 %v5095_v43 }
 0x398   :  { %3763 = vmatprep.subr.bf16.mxu1 %v5103_v21 }
 0x399   :  { %3844 = vmatpush1.bf16.msra.mxu0 %v5098_v14 }
 0x39a   :  { %3845 = vmatprep.subr.bf16.mxu0 %v5106_v32 }
 0x39b   :  { %3764 = vmatpush1.bf16.msra.mxu1 %v5101_v41 }
 0x39c   :  { %3765 = vmatprep.subr.bf16.mxu1 %v5109_v27  ;;  %v5127_v27 = vld [vmem:[%s7274_s8 + $0x114] ss:$8 sps:$4 sm:$0xff]  }
 0x39d   :  { %3846 = vmatpush1.bf16.msra.mxu0 %v5104_v61 }
 0x39e   :  { %3847 = vmatprep.subr.bf16.mxu0 %v5112_v35 }
 0x39f   :  { %3766 = vmatpush1.bf16.msra.mxu1 %v5107_v16 }
 0x3a0   :  { %3767 = vmatprep.subr.bf16.mxu1 %v5115_v31 }
 0x3a1   :  { %3848 = vmatpush1.bf16.msra.mxu0 %v5110_v15  ;;  %v5130_v15 = vld [vmem:[%s7274_s8 + $0x314] ss:$8 sps:$4 sm:$0xff]  }
 0x3a2   :  { %3849 = vmatprep.subr.bf16.mxu0 %v5118_v17  ;;  %v5125_v17 = vld [vmem:[%s7274_s8 + $0x110] ss:$8 sps:$4 sm:$0xff]  }
 0x3a3   :  { %3768 = vmatpush1.bf16.msra.mxu1 %v5113_v37  ;;  %v5128_v37 = vld [vmem:[%s7274_s8 + $0x310] ss:$8 sps:$4 sm:$0xff]  }
 0x3a4   :  { %3778 = vmatprep.subr.bf16.mxu1 %v5121_v47  ;;  %v5136_v47 = vld [vmem:[%s7274_s8 + $0x324] ss:$8 sps:$4 sm:$0xff]  }
 0x3a5   :  { %3850 = vmatpush1.bf16.msra.mxu0 %v5116_v50  ;;  %v5133_v50 = vld [vmem:[%s7274_s8 + $0x124] ss:$8 sps:$4 sm:$0xff]  }
 0x3a6   :  { %3860 = vmatprep.subr.bf16.mxu0 %v5124_v28  ;;  %v5131_v28 = vld [vmem:[%s7274_s8 + $0x120] ss:$8 sps:$4 sm:$0xff]  }
 0x3fb   :  { %v2747_v29 = vpop.xlane.xlu1 %2746  ;;  %v2722_v1 = vpop.xlane.xlu0 %2721 }
 0x3ff   :  { %v2760_v44 = vpop.xlane.xlu1 %2759  ;;  %v2734_v49 = vpop.xlane.xlu0 %2733 }
 0x400   :  { %v2735_v0 = vadd.f32 %v2734_v49, %v2722_v1 }
 0x402   :  { %v2748_v22 = vadd.f32 %v2747_v29, %v2735_v0 }
 0x403   :  { %v2773_v7 = vpop.xlane.xlu0 %2772  ;;  %v2786_v9 = vpop.xlane.xlu1 %2785 }
 0x404   :  { %v2761_v8 = vadd.f32 %v2760_v44, %v2748_v22 }
 0x406   :  { %v2774_v10 = vadd.f32 %v2773_v7, %v2761_v8 }
 0x407   :  { %v2799_v11 = vpop.xlane.xlu0 %2798  ;;  %v2812_v51 = vpop.xlane.xlu1 %2811 }
 0x408   :  { %v2787_v13 = vadd.f32 %v2786_v9, %v2774_v10 }
 0x40a   :  { %v2800_v55 = vadd.f32 %v2799_v11, %v2787_v13 }
 0x40b   :  { %v2825_v2 = vpop.xlane.xlu0 %2824 }
 0x40c   :  { %v2813_v36 = vadd.f32 %v2812_v51, %v2800_v55 }
 0x40e   :  { %v2826_v3 = vadd.f32 %v2825_v2, %v2813_v36  ;;  %v5119_v2 = vld [vmem:[%s7274_s8 + $0x100] ss:$8 sps:$4 sm:$0xff]  }
 0x410   :  { %v2834_v12 = vadd.f32 %v4010_v6, %v2826_v3 }
 0x412   :  { %v2835_v60 = vmax.f32 %v2834_v12, 0.0  ;;  %v5122_v12 = vld [vmem:[%s7274_s8 + $0x300] ss:$8 sps:$4 sm:$0xff]  }
 0x414   :  { %2839 = vperm.xlu1 %4948, %v2835_v60  }
 0x493   :  { %v2840_v5 = vpop.permute.xlu1 %2839 }
 0x494   :  { %v2884_v34 = vmul.f32 %v2850_v19, %v2840_v5  ;;  %v2888_v43 = vmul.f32 %v2866_v40, %v2840_v5  ;;  %v2883_v14 = vmul.f32 %v2846_v25, %v2840_v5  ;;  %v2887_v21 = vmul.f32 %v2862_v26, %v2840_v5  ;;  %v5146_v19 = vld [vmem:[%s7274_s8 + $0x340] ss:$8 sps:$4 sm:$0xff]   ;;  %v5151_v40 = vld [vmem:[%s7274_s8 + $0x154] ss:$8 sps:$4 sm:$0xff]   ;;  %v5149_v26 = vld [vmem:[%s7274_s8 + $0x150] ss:$8 sps:$4 sm:$0xff]  }
 0x495   :  { %v2886_v32 = vmul.f32 %v2858_v45, %v2840_v5  ;;  %v2890_v41 = vmul.f32 %v2874_v39, %v2840_v5  ;;  %v2885_v61 = vmul.f32 %v2854_v23, %v2840_v5  ;;  %v2889_v29 = vmul.f32 %v2870_v58, %v2840_v5  ;;  %v5154_v25 = vld [vmem:[%s7274_s8 + $0x354] ss:$8 sps:$4 sm:$0xff]   ;;  %v5152_v45 = vld [vmem:[%s7274_s8 + $0x350] ss:$8 sps:$4 sm:$0xff]   ;;  %v5157_v39 = vld [vmem:[%s7274_s8 + $0x164] ss:$8 sps:$4 sm:$0xff]  }
 0x496   :  { %v2934_v1 = vadd.f32 %v2900_v46, %v2884_v34  ;;  %v2938_v44 = vadd.f32 %v2916_v24, %v2888_v43  ;;  %v2933_v49 = vadd.f32 %v2896_v42, %v2883_v14  ;;  %v2937_v0 = vadd.f32 %v2912_v56, %v2887_v21  ;;  %v5160_v23 = vld [vmem:[%s7274_s8 + $0x364] ss:$8 sps:$4 sm:$0xff]   ;;  %v5155_v58 = vld [vmem:[%s7274_s8 + $0x160] ss:$8 sps:$4 sm:$0xff]   ;;  %v5163_v24 = vld [vmem:[%s7274_s8 + $0x174] ss:$8 sps:$4 sm:$0xff]  }
 0x497   :  { %v2936_v22 = vadd.f32 %v2908_v30, %v2886_v32  ;;  %v2940_v7 = vadd.f32 %v2924_v63, %v2890_v41  ;;  %v7068_v8 = vadd.f32 %v2904_v48, %v2885_v61  ;;  %v7070_v9 = vadd.f32 %v2920_v53, %v2889_v29  ;;  %v5158_v46 = vld [vmem:[%s7274_s8 + $0x360] ss:$8 sps:$4 sm:$0xff]   ;;  %v5166_v42 = vld [vmem:[%s7274_s8 + $0x374] ss:$8 sps:$4 sm:$0xff]   ;;  %v5161_v56 = vld [vmem:[%s7274_s8 + $0x170] ss:$8 sps:$4 sm:$0xff]  }
 0x498   :  { %v2942_v10 = vmax.f32 %v2934_v1, 0.0  ;;  %v2946_v11 = vmax.f32 %v2938_v44, 0.0  ;;  %v2941_v13 = vmax.f32 %v2933_v49, 0.0  ;;  %v2945_v55 = vmax.f32 %v2937_v0, 0.0  ;;  %v5164_v5 = vld [vmem:[%s7274_s8 + $0x370] ss:$8 sps:$4 sm:$0xff]  }
 0x499   :  { %v2944_v51 = vmax.f32 %v2936_v22, 0.0  ;;  %v2948_v36 = vmax.f32 %v2940_v7, 0.0  ;;  %v5169_v30 = vld [vmem:[%s7274_s8 + $0x184] ss:$8 sps:$4 sm:$0xff]   ;;  %v5167_v48 = vld [vmem:[%s7274_s8 + $0x180] ss:$8 sps:$4 sm:$0xff]  }
 0x49a   :  { %v2950_v6 = vpack.c.bf16 %v2942_v10, %v2942_v10  ;;  %v2954_v3 = vpack.c.bf16 %v2946_v11, %v2946_v11  ;;  %v2949_v60 = vpack.c.bf16 %v2941_v13, %v2941_v13  ;;  %v2953_v16 = vpack.c.bf16 %v2945_v55, %v2945_v55  ;;  %v5172_v63 = vld [vmem:[%s7274_s8 + $0x384] ss:$8 sps:$4 sm:$0xff]   ;;  %v5170_v53 = vld [vmem:[%s7274_s8 + $0x380] ss:$8 sps:$4 sm:$0xff]   ;;  %v5175_v34 = vld [vmem:[%s7274_s8 + $0x194] ss:$8 sps:$4 sm:$0xff]  }
 0x49b   :  { %v2952_v35 = vpack.c.bf16 %v2944_v51, %v2944_v51  ;;  %v2956_v31 = vpack.c.bf16 %v2948_v36, %v2948_v36  ;;  %v5178_v43 = vld [vmem:[%s7274_s8 + $0x394] ss:$8 sps:$4 sm:$0xff]   ;;  %v5173_v14 = vld [vmem:[%s7274_s8 + $0x190] ss:$8 sps:$4 sm:$0xff]   ;;  %v5181_v32 = vld [vmem:[%s7274_s8 + $0x1a4] ss:$8 sps:$4 sm:$0xff]  }
 0x49c   :  { %3769 = vmatprep.mubr.bf16.mxu1 %v2950_v6  ;;  %3851 = vmatprep.mubr.bf16.mxu0 %v2954_v3  ;;  %v5176_v21 = vld [vmem:[%s7274_s8 + $0x390] ss:$8 sps:$4 sm:$0xff]   ;;  %v5184_v41 = vld [vmem:[%s7274_s8 + $0x3a4] ss:$8 sps:$4 sm:$0xff]   ;;  %v5179_v61 = vld [vmem:[%s7274_s8 + $0x1a0] ss:$8 sps:$4 sm:$0xff]  }
 0x49d   :  { %3770 = vmatmul.mubr.bf16.vlgmr.msra.gmra.mrb[72].mxu1 %v2949_v60  ;;  %3852 = vmatmul.mubr.bf16.vlgmr.msra.gmra.mrb[72].mxu0 %v2953_v16  ;;  %v5182_v29 = vld [vmem:[%s7274_s8 + $0x3a0] ss:$8 sps:$4 sm:$0xff]   ;;  %v5187_v1 = vld [vmem:[%s7274_s8 + $0x1b4] ss:$8 sps:$4 sm:$0xff]   ;;  %v5185_v49 = vld [vmem:[%s7274_s8 + $0x1b0] ss:$8 sps:$4 sm:$0xff]  }
 0x49e   :  { %3779 = vmatpush1.bf16.msra.mxu1 %v5119_v2  ;;  %3861 = vmatpush1.bf16.msra.mxu0 %v5122_v12  ;;  %v5190_v44 = vld [vmem:[%s7274_s8 + $0x3b4] ss:$8 sps:$4 sm:$0xff]   ;;  %v5188_v0 = vld [vmem:[%s7274_s8 + $0x3b0] ss:$8 sps:$4 sm:$0xff]   ;;  %v5193_v22 = vld [vmem:[%s7274_s8 + $0x1c4] ss:$8 sps:$4 sm:$0xff]  }
 0x49f   :  { %3810 = vmatprep.mubr.bf16.mxu1 %v2952_v35  ;;  %3892 = vmatprep.mubr.bf16.mxu0 %v2956_v31  ;;  %v5196_v7 = vld [vmem:[%s7274_s8 + $0x3c4] ss:$8 sps:$4 sm:$0xff]   ;;  %v5191_v10 = vld [vmem:[%s7274_s8 + $0x1c0] ss:$8 sps:$4 sm:$0xff]   ;;  %v5199_v13 = vld [vmem:[%s7274_s8 + $0x1d4] ss:$8 sps:$4 sm:$0xff]  }
 0x4a0   :  { %3780 = vmatprep.subr.bf16.mxu1 %v5127_v27  ;;  %3862 = vmatprep.subr.bf16.mxu0 %v5130_v15  ;;  %v5194_v11 = vld [vmem:[%s7274_s8 + $0x3c0] ss:$8 sps:$4 sm:$0xff]   ;;  %v5202_v55 = vld [vmem:[%s7274_s8 + $0x3d4] ss:$8 sps:$4 sm:$0xff]   ;;  %v5197_v51 = vld [vmem:[%s7274_s8 + $0x1d0] ss:$8 sps:$4 sm:$0xff]  }
 0x4a1   :  { %v5200_v36 = vld [vmem:[%s7274_s8 + $0x3d0] ss:$8 sps:$4 sm:$0xff]   ;;  %v5205_v6 = vld [vmem:[%s7274_s8 + $0x1e4] ss:$8 sps:$4 sm:$0xff]   ;;  %v5203_v3 = vld [vmem:[%s7274_s8 + $0x1e0] ss:$8 sps:$4 sm:$0xff]  }
 0x4a2   :  { %3781 = vmatpush1.bf16.msra.mxu1 %v5125_v17  ;;  %3863 = vmatpush1.bf16.msra.mxu0 %v5128_v37  ;;  %v5208_v2 = vld [vmem:[%s7274_s8 + $0x3e4] ss:$8 sps:$4 sm:$0xff]   ;;  %v5206_v12 = vld [vmem:[%s7274_s8 + $0x3e0] ss:$8 sps:$4 sm:$0xff]   ;;  %v5211_v60 = vld [vmem:[%s7274_s8 + $0x1f4] ss:$8 sps:$4 sm:$0xff]  }
 0x4a3   :  { %3782 = vmatprep.subr.bf16.mxu1 %v5133_v50  ;;  %3864 = vmatprep.subr.bf16.mxu0 %v5136_v47  ;;  %v5214_v16 = vld [vmem:[%s7274_s8 + $0x3f4] ss:$8 sps:$4 sm:$0xff]   ;;  %v5209_v27 = vld [vmem:[%s7274_s8 + $0x1f0] ss:$8 sps:$4 sm:$0xff]   ;;  %v2943_v35 = vmax.f32 %v7068_v8, 0.0  ;;  %v2947_v31 = vmax.f32 %v7070_v9, 0.0 }
 0x4a4   :  { %v5212_v15 = vld [vmem:[%s7274_s8 + $0x3f0] ss:$8 sps:$4 sm:$0xff]   ;;  %v3085_v50 = vld [vmem:[%s7277_s9] sm:$0x3] }
 0x4a5   :  { %v2951_v17 = vpack.c.bf16 %v2943_v35, %v2943_v35  ;;  %v2955_v37 = vpack.c.bf16 %v2947_v31, %v2947_v31  ;;  %v3090_v47 = vrot.slane %v3085_v50, %v6795_v38 }
 0x4a6   :  { %3783 = vmatpush1.bf16.msra.mxu1 %v5131_v28  ;;  %3865 = vmatpush1.bf16.msra.mxu0 %v5134_v52  ;;  %v3094_v28 = vrot.slane %v3085_v50, %v7050_v20 }
 0x4a7   :  { %3784 = vmatprep.subr.bf16.mxu1 %v5139_v54  ;;  %3866 = vmatprep.subr.bf16.mxu0 %v5142_v57 }
 0x4aa   :  { %3785 = vmatpush1.bf16.msra.mxu1 %v5137_v59  ;;  %3867 = vmatpush1.bf16.msra.mxu0 %v5140_v33 }
 0x4ab   :  { %3786 = vmatprep.subr.bf16.mxu1 %v5145_v62  ;;  %3868 = vmatprep.subr.bf16.mxu0 %v5148_v4 }
 0x4ae   :  { %3787 = vmatpush1.bf16.msra.mxu1 %v5143_v18  ;;  %3869 = vmatpush1.bf16.msra.mxu0 %v5146_v19 }
 0x4af   :  { %3788 = vmatprep.subr.bf16.mxu1 %v5151_v40  ;;  %3870 = vmatprep.subr.bf16.mxu0 %v5154_v25 }
 0x4b2   :  { %3789 = vmatpush1.bf16.msra.mxu1 %v5149_v26  ;;  %3871 = vmatpush1.bf16.msra.mxu0 %v5152_v45 }
 0x4b3   :  { %3790 = vmatprep.subr.bf16.mxu1 %v5157_v39  ;;  %3872 = vmatprep.subr.bf16.mxu0 %v5160_v23 }
 0x4b6   :  { %3791 = vmatpush1.bf16.msra.mxu1 %v5155_v58  ;;  %3873 = vmatpush1.bf16.msra.mxu0 %v5158_v46 }
 0x4b7   :  { %3792 = vmatprep.subr.bf16.mxu1 %v5163_v24  ;;  %3874 = vmatprep.subr.bf16.mxu0 %v5166_v42 }
 0x4ba   :  { %3793 = vmatpush1.bf16.msra.mxu1 %v5161_v56  ;;  %3875 = vmatpush1.bf16.msra.mxu0 %v5164_v5 }
 0x4bb   :  { %3794 = vmatprep.subr.bf16.mxu1 %v5169_v30  ;;  %3876 = vmatprep.subr.bf16.mxu0 %v5172_v63 }
 0x4be   :  { %3795 = vmatpush1.bf16.msra.mxu1 %v5167_v48  ;;  %3877 = vmatpush1.bf16.msra.mxu0 %v5170_v53 }
 0x4bf   :  { %3796 = vmatprep.subr.bf16.mxu1 %v5175_v34  ;;  %3878 = vmatprep.subr.bf16.mxu0 %v5178_v43 }
 0x4c2   :  { %3797 = vmatpush1.bf16.msra.mxu1 %v5173_v14  ;;  %3879 = vmatpush1.bf16.msra.mxu0 %v5176_v21 }
 0x4c3   :  { %3798 = vmatprep.subr.bf16.mxu1 %v5181_v32  ;;  %3880 = vmatprep.subr.bf16.mxu0 %v5184_v41 }
 0x4c6   :  { %3799 = vmatpush1.bf16.msra.mxu1 %v5179_v61  ;;  %3881 = vmatpush1.bf16.msra.mxu0 %v5182_v29 }
 0x4c7   :  { %3800 = vmatprep.subr.bf16.mxu1 %v5187_v1  ;;  %3882 = vmatprep.subr.bf16.mxu0 %v5190_v44 }
 0x4ca   :  { %3801 = vmatpush1.bf16.msra.mxu1 %v5185_v49  ;;  %3883 = vmatpush1.bf16.msra.mxu0 %v5188_v0 }
 0x4cb   :  { %3802 = vmatprep.subr.bf16.mxu1 %v5193_v22  ;;  %3884 = vmatprep.subr.bf16.mxu0 %v5196_v7 }
 0x4ce   :  { %3803 = vmatpush1.bf16.msra.mxu1 %v5191_v10  ;;  %3885 = vmatpush1.bf16.msra.mxu0 %v5194_v11 }
 0x4cf   :  { %3804 = vmatprep.subr.bf16.mxu1 %v5199_v13  ;;  %3886 = vmatprep.subr.bf16.mxu0 %v5202_v55 }
 0x4d2   :  { %3805 = vmatpush1.bf16.msra.mxu1 %v5197_v51  ;;  %3887 = vmatpush1.bf16.msra.mxu0 %v5200_v36 }
 0x4d3   :  { %3806 = vmatprep.subr.bf16.mxu1 %v5205_v6  ;;  %3888 = vmatprep.subr.bf16.mxu0 %v5208_v2 }
 0x4d6   :  { %3807 = vmatpush1.bf16.msra.mxu1 %v5203_v3  ;;  %3889 = vmatpush1.bf16.msra.mxu0 %v5206_v12 }
 0x4d7   :  { %3808 = vmatprep.subr.bf16.mxu1 %v5211_v60  ;;  %3890 = vmatprep.subr.bf16.mxu0 %v5214_v16 }
 0x4da   :  { %3809 = vmatpush1.bf16.msra.mxu1 %v5209_v27  ;;  %3891 = vmatpush1.bf16.msra.mxu0 %v5212_v15 }
 0x4dd   :  { %3811 = vmatmul.mubr.bf16.vlgmr.msra.gmra.mrb[72].mxu1 %v2951_v17  ;;  %3893 = vmatmul.mubr.bf16.vlgmr.msra.gmra.mrb[72].mxu0 %v2955_v37 }
 0x5b0   :  { %v3812_v52 = vpop.f32.mrb[72].mxu1  ;;  %v3894_v54 = vpop.f32.mrb[72].mxu0 }
 0x5b1   :  { %v4934_v57 = vadd.f32 %v3812_v52, %v3090_v47  ;;  %v3814_v8 = vpop.f32.mrb[73].mxu1  ;;  %v3896_v59 = vpop.f32.mrb[73].mxu0 }
 0x5b2   :  { %v4936_v9 = vadd.f32 %v3814_v8, %v3094_v28  ;;  %v3816_v33 = vpop.f32.mrb[74].mxu1  ;;  %v3898_v62 = vpop.f32.mrb[74].mxu0 }
 0x5b3   :  { %v4935_v4 = vadd.f32 %v4934_v57, %v3894_v54  ;;  %v3817_v18 = vpop.f32.mrb[75].mxu1  ;;  %v3899_v19 = vpop.f32.mrb[75].mxu0 }
 0x5b4   :  { %v4937_v40 = vadd.f32 %v4936_v9, %v3896_v59 }
 0x5b5   :  { %v4139_v25 = vmul.f32 -1.442695, %v4935_v4 }
 0x5b6   :  { %v4140_v26 = vmul.f32 -1.442695, %v4937_v40 }
 0x5b7   :  { %5217 = vpow2.f32 %v4139_v25 }
 0x5b8   :  { %5219 = vpow2.f32 %v4140_v26 }
 0x5c1   :  { %v5218_v45 = vpop.eup %5217 }
 0x5c2   :  { %v5220_v38 = vpop.eup %5219  ;;  %v3907_v39 = vadd.f32 1.0, %v5218_v45 }
 0x5c3   :  { %v3908_v20 = vadd.f32 1.0, %v5220_v38 }
 0x5c4   :  { %5221 = vrcp.f32 %v3907_v39 }
 0x5c5   :  { %5223 = vrcp.f32 %v3908_v20 }
 0x5ce   :  { %v5222_v23 = vpop.eup %5221 }
 0x5cf   :  { %v5224_v58 = vpop.eup %5223 }
 0x5d0   :  { %v3915_v46 = vcombine.low %v5222_v23, %v5224_v58 }
 0x5d2   :  { %4141 = vst.sshfl [vmem:[%s7278_s10] sm:$0x33 pattern:$0x76325410] %v3915_v46 }

</bundles_post_ra>
